<compile_context>
chip_gen: v6e
topology: v6e:2x2x1
jax: 0.10.0
libtpu: 0.0.40
codegen_flags: <defaults>
</compile_context>

<pallas_src>
import functools

import numpy as np
import jax
import jax.numpy as jnp
from jax.experimental import pallas as pl
from jax.experimental.pallas import tpu as pltpu


# ----------------------------- kernel -----------------------------------------

def _pointwise(y, pwT, bias, *, cin, use_mxu):
    """1x1 conv:  (Cout, Cin) x (Cin, L) + (Cout, 1) bias."""
    if use_mxu:
        # TODO(synk): at production widths store pwT directly in bf16 in the
        # packed weight array (halves weight DMA + VMEM on v6e/v7x).
        z = jnp.dot(pwT.astype(jnp.bfloat16), y.astype(jnp.bfloat16),
                    preferred_element_type=jnp.float32)
    else:
        # K = 4..16 would fill <7% of an MXU pass; a short VPU outer-product
        # accumulation is cheaper at these channel counts.
        z = pwT[:, 0:1] * y[0:1, :]
        for c in range(1, cin):
            z = z + pwT[:, c:c + 1] * y[c:c + 1, :]
    return z + bias


def _xception_kernel(x_ref, masks_ref, w_ref, out_ref, *,
                     W, L, seg, chans, use_mxu):
    """One lane-dense (C, L=B_SUB*H*W) block of the full XceptionBlock."""
    c0, c1, c2, c3 = chans
    x = x_ref[...].astype(jnp.float32)                       # (C0, L)

    # Factored border masks (1 inside, 0 where the tap would leave the image;
    # they also kill the roll wrap-around between images / across the block).
    cm_l = masks_ref[0:1, :]   # dx = -1 valid  (w >= 1)
    cm_r = masks_ref[1:2, :]   # dx = +1 valid  (w <= W-2)
    rm_u = masks_ref[2:3, :]   # dy = -1 valid  (h >= 1)
    rm_d = masks_ref[3:4, :]   # dy = +1 valid  (h <= H-2)

    def wslice(name, rows, cols):
        off = seg[name]                                      # static offsets
        return w_ref[off:off + rows, 0:cols]

    def sep_conv(a, i, cin, cout):
        """relu -> depthwise3x3 (+folded BN) -> pointwise (+folded BN)."""
        dw = wslice(f"dw{i}", cin, 9)                        # (Cin, 9) taps
        pwT = wslice(f"pw{i}", cout, cin)                    # (Cout, Cin)
        b = wslice(f"b{i}", cout, 1)                         # (Cout, 1)

        a = jnp.maximum(a, 0.0)                              # ReLU (relu_first)
        # Horizontal pass: 2 lane rolls, column masks applied once.
        a_l = pltpu.roll(a, shift=1, axis=1) * cm_l          # reads (h, w-1)
        a_r = pltpu.roll(a, shift=L - 1, axis=1) * cm_r      # reads (h, w+1)

        def hrow(r):                                         # r = dy + 1
            return (a_l * dw[:, 3 * r + 0:3 * r + 1]
                    + a * dw[:, 3 * r + 1:3 * r + 2]
                    + a_r * dw[:, 3 * r + 2:3 * r + 3])

        # Vertical pass: roll only the dy = -1 / +1 row sums by +/- W.
        y = hrow(1)
        y = y + pltpu.roll(hrow(0), shift=W, axis=1) * rm_u      # reads row h-1
        y = y + pltpu.roll(hrow(2), shift=L - W, axis=1) * rm_d  # reads row h+1
        return _pointwise(y, pwT, b, cin=cin, use_mxu=use_mxu)

    sc1 = sep_conv(x, 1, c0, c1)
    sc2 = sep_conv(sc1, 2, c1, c2)
    residual = sep_conv(sc2, 3, c2, c3)

    # skip_connection_type == 'conv': 1x1 conv + folded BN on the raw input.
    shortcut = _pointwise(x, wslice("wsc", c3, c0), wslice("bsc", c3, 1),
                          cin=c0, use_mxu=use_mxu)

    out_ref[...] = (residual + shortcut).astype(out_ref.dtype)   # full-lane store


# --------------------------- one-time host-side prep ---------------------------

def _make_masks(H, W, b_sub):
    """(4, b_sub*H*W) f32: [col dx=-1, col dx=+1, row dy=-1, row dy=+1] validity."""
    j = np.arange(H * W)
    h, w = j // W, j % W
    m = np.stack([(w >= 1), (w <= W - 2), (h >= 1), (h <= H - 2)]).astype(np.float32)
    return jnp.asarray(np.tile(m, (1, b_sub)))


def _fold_and_pack(params):
    """Fold inference BatchNorms into the conv weights and pack all 11 tensors
    into one lane-padded, sublane-aligned f32 array.  Returns (packed, seg, chans)."""
    c0 = params["dw1"].shape[-1]
    c1 = params["pw1"].shape[-1]
    c2 = params["pw2"].shape[-1]
    c3 = params["pw3"].shape[-1]

    pieces = []
    for i in (1, 2, 3):
        dw = params[f"dw{i}"]                      # (3, 3, Cin)
        sd, bd = params[f"sd{i}"], params[f"bd{i}"]
        pw = params[f"pw{i}"]                      # (Cin, Cout)
        sp, bp = params[f"sp{i}"], params[f"bp{i}"]
        cin = dw.shape[-1]
        # z = sp * (pw^T @ (sd * dwconv + bd)) + bp
        #   = (pw * sd[:,None] * sp[None,:])^T @ dwconv + (sp * (bd @ pw) + bp)
        pieces.append((f"dw{i}", dw.reshape(9, cin).T))                    # (Cin, 9)
        pieces.append((f"pw{i}", (pw * sd[:, None] * sp[None, :]).T))      # (Cout, Cin)
        pieces.append((f"b{i}", (sp * (bd @ pw) + bp)[:, None]))           # (Cout, 1)
    pieces.append(("wsc", (params["wsc"] * params["ssc"][None, :]).T))     # (C3, C0)
    pieces.append(("bsc", params["bsc"][:, None]))                         # (C3, 1)

    max_cols = max(a.shape[1] for _, a in pieces)
    cols = max(128, -(-max_cols // 128) * 128)     # lane-pad the packed tile
    seg, rows, off = {}, [], 0
    for name, arr in pieces:
        r, c = arr.shape
        seg[name] = off
        pad_r = (-r) % 8                           # keep each segment sublane-aligned
        rows.append(jnp.pad(arr.astype(jnp.float32), ((0, pad_r), (0, cols - c))))
        off += r + pad_r
    packed = jnp.concatenate(rows, axis=0)
    return packed, seg, (c0, c1, c2, c3)


def _pick_bsub(n):
    # Batch images per grid step to amortize the ~0.35 us per-step overhead,
    # but keep >= 2 grid steps so both v7x TensorCores get work.
    best = 1
    for b in range(1, n // 2 + 1):
        if n % b == 0:
            best = b
    return best


def prepare_block(params, H, W, n_images):
    """One-time prep: BN folding, weight packing, mask construction (hoisted
    out of the per-call path)."""
    packed, seg, chans = _fold_and_pack(params)
    b_sub = _pick_bsub(n_images)
    return dict(packed=packed, seg=seg, chans=chans,
                masks=_make_masks(H, W, b_sub), H=H, W=W, b_sub=b_sub)


# ------------------------------- wrapper ---------------------------------------

def xception_block(x_nchw, prep):
    N, C0, H, W = x_nchw.shape
    chans = prep["chans"]
    assert C0 == chans[0] and H == prep["H"] and W == prep["W"]
    C3 = chans[3]
    b_sub = prep["b_sub"]
    assert N % b_sub == 0
    HW = H * W
    L = b_sub * HW                                            # lane width per block

    # NCHW -> lane-dense (C, N*H*W): channels on sublanes, batch+space on lanes.
    x = jnp.transpose(x_nchw, (1, 0, 2, 3)).reshape(C0, N * HW)

    use_mxu = max(chans[:3]) >= 32
    kernel = functools.partial(_xception_kernel, W=W, L=L, seg=prep["seg"],
                               chans=chans, use_mxu=use_mxu)
    masks, packed = prep["masks"], prep["packed"]

    def build(single_buffer_consts):
        ckw = {}
        if single_buffer_consts and hasattr(pl, "Buffered"):
            ckw["pipeline_mode"] = pl.Buffered(1)   # grid-invariant: 1 buffer
        const_spec = lambda shp: pl.BlockSpec(shp, lambda n: (0, 0), **ckw)
        return pl.pallas_call(
            kernel,
            out_shape=jax.ShapeDtypeStruct((C3, N * HW), x_nchw.dtype),
            grid=(N // b_sub,),
            in_specs=[pl.BlockSpec((C0, L), lambda n: (0, n)),
                      const_spec(masks.shape),
                      const_spec(packed.shape)],
            out_specs=pl.BlockSpec((C3, L), lambda n: (0, n)),
            compiler_params=pltpu.CompilerParams(
                dimension_semantics=("parallel",),
                vmem_limit_bytes=32 * 1024 * 1024),
        )

    try:
        out = build(True)(x, masks, packed)
    except Exception:
        # pipeline_mode=pl.Buffered(1) not supported on this jax/backend combo:
        # fall back to default double buffering (identical results).
        out = build(False)(x, masks, packed)

    return jnp.transpose(out.reshape(C3, N, H, W), (1, 0, 2, 3))   # back to NCHW


# --------------------------- parameter construction ----------------------------

def _folded_bn(key, c, eps=1e-5):
    k1, k2, k3, k4 = jax.random.split(key, 4)
    gamma = jax.random.uniform(k1, (c,), minval=0.5, maxval=1.5)
    beta = 0.1 * jax.random.normal(k2, (c,))
    mean = 0.1 * jax.random.normal(k3, (c,))
    var = jax.random.uniform(k4, (c,), minval=0.5, maxval=1.5)
    scale = gamma / jnp.sqrt(var + eps)
    bias = beta - mean * scale
    return scale.astype(jnp.float32), bias.astype(jnp.float32)


def make_params(key, channel_list):
    c0, c1, c2, c3 = channel_list
    params = {}
    ks = jax.random.split(key, 16)
    ki = iter(range(16))
    for i, (cin, cout) in enumerate([(c0, c1), (c1, c2), (c2, c3)], start=1):
        params[f"dw{i}"] = (0.1 * jax.random.normal(ks[next(ki)], (3, 3, cin))
                            ).astype(jnp.float32)
        params[f"sd{i}"], params[f"bd{i}"] = _folded_bn(ks[next(ki)], cin)
        params[f"pw{i}"] = (0.1 * jax.random.normal(ks[next(ki)], (cin, cout))
                            ).astype(jnp.float32)
        params[f"sp{i}"], params[f"bp{i}"] = _folded_bn(ks[next(ki)], cout)
    params["wsc"] = (0.1 * jax.random.normal(ks[next(ki)], (c0, c3))).astype(jnp.float32)
    params["ssc"], params["bsc"] = _folded_bn(ks[next(ki)], c3)
    return params


# ------------------------------ pure-JAX reference -----------------------------

def _ref_sep(x, dw, sd, bd, pw, sp, bp):
    cin = x.shape[-1]
    x = jnp.maximum(x, 0.0)
    y = jax.lax.conv_general_dilated(
        x, dw.reshape(3, 3, 1, cin), (1, 1), ((1, 1), (1, 1)),
        dimension_numbers=("NHWC", "HWIO", "NHWC"),
        feature_group_count=cin, precision=jax.lax.Precision.HIGHEST)
    y = y * sd + bd
    y = jnp.einsum("nhwc,cd->nhwd", y, pw, precision=jax.lax.Precision.HIGHEST)
    return y * sp + bp


def ref_block(x_nchw, p):
    x = jnp.transpose(x_nchw, (0, 2, 3, 1))
    sc1 = _ref_sep(x, p["dw1"], p["sd1"], p["bd1"], p["pw1"], p["sp1"], p["bp1"])
    sc2 = _ref_sep(sc1, p["dw2"], p["sd2"], p["bd2"], p["pw2"], p["sp2"], p["bp2"])
    residual = _ref_sep(sc2, p["dw3"], p["sd3"], p["bd3"], p["pw3"], p["sp3"], p["bp3"])
    shortcut = jnp.einsum("nhwc,cd->nhwd", x, p["wsc"],
                          precision=jax.lax.Precision.HIGHEST)
    shortcut = shortcut * p["ssc"] + p["bsc"]
    return jnp.transpose(residual + shortcut, (0, 3, 1, 2))


# ----------------------------------- main --------------------------------------

if __name__ == "__main__":
    key = jax.random.PRNGKey(0)
    kx, kp = jax.random.split(key)

    channel_list = [4, 8, 8, 16]
    N, H, W = 2, 16, 16
    x = jax.random.normal(kx, (N, channel_list[0], H, W), dtype=jnp.float32)  # NCHW
    params = make_params(kp, channel_list)

    prep = prepare_block(params, H, W, N)          # one-time: BN fold, pack, masks
    out = jax.block_until_ready(xception_block(x, prep))

    ref = jax.block_until_ready(ref_block(x, params))
    assert out.shape == (N, channel_list[3], H, W), out.shape
    assert jnp.allclose(out, ref, atol=3e-2, rtol=3e-2), float(jnp.max(jnp.abs(out - ref)))

    print("KERNEL_OK")
</pallas_src>

<mosaic_0001>
module attributes {stable_mosaic.version = 11 : i64} {
  func.func @_xception_kernel(%arg0: i32, %arg1: memref<4x256xf32, #tpu.memory_space<vmem>>, %arg2: memref<4x256xf32, #tpu.memory_space<vmem>>, %arg3: memref<120x128xf32, #tpu.memory_space<vmem>>, %arg4: memref<16x256xf32, #tpu.memory_space<vmem>>) attributes {dimension_semantics = [#tpu.dimension_semantics<parallel>], iteration_bounds = array<i64: 2>, scalar_prefetch = 0 : i64, scratch_operands = 0 : i64, tpu.core_type = #tpu.core_type<tc>, window_params = [{transform_indices = @transform_0, window_bounds = array<i64: 4, 256>}, {pipeline_mode = #tpu.pipeline_mode<synchronous>, transform_indices = @transform_1, window_bounds = array<i64: 4, 256>}, {pipeline_mode = #tpu.pipeline_mode<synchronous>, transform_indices = @transform_2, window_bounds = array<i64: 120, 128>}, {transform_indices = @transform_3, window_bounds = array<i64: 16, 256>}]} {
    %c0 = arith.constant 0 : index
    %c0_0 = arith.constant 0 : index
    %0 = vector.load %arg1[%c0, %c0_0] : memref<4x256xf32, #tpu.memory_space<vmem>>, vector<4x256xf32>
    %c0_1 = arith.constant 0 : index
    %c0_2 = arith.constant 0 : index
    %1 = vector.load %arg2[%c0_1, %c0_2] : memref<4x256xf32, #tpu.memory_space<vmem>>, vector<1x256xf32>
    %c1 = arith.constant 1 : index
    %c0_3 = arith.constant 0 : index
    %2 = vector.load %arg2[%c1, %c0_3] : memref<4x256xf32, #tpu.memory_space<vmem>>, vector<1x256xf32>
    %c2 = arith.constant 2 : index
    %c0_4 = arith.constant 0 : index
    %3 = vector.load %arg2[%c2, %c0_4] : memref<4x256xf32, #tpu.memory_space<vmem>>, vector<1x256xf32>
    %c3 = arith.constant 3 : index
    %c0_5 = arith.constant 0 : index
    %4 = vector.load %arg2[%c3, %c0_5] : memref<4x256xf32, #tpu.memory_space<vmem>>, vector<1x256xf32>
    %c0_6 = arith.constant 0 : index
    %c0_7 = arith.constant 0 : index
    %5 = vector.load %arg3[%c0_6, %c0_7] : memref<120x128xf32, #tpu.memory_space<vmem>>, vector<4x9xf32>
    %c8 = arith.constant 8 : index
    %c0_8 = arith.constant 0 : index
    %6 = vector.load %arg3[%c8, %c0_8] : memref<120x128xf32, #tpu.memory_space<vmem>>, vector<8x4xf32>
    %c16 = arith.constant 16 : index
    %c0_9 = arith.constant 0 : index
    %7 = vector.load %arg3[%c16, %c0_9] : memref<120x128xf32, #tpu.memory_space<vmem>>, vector<8x1xf32>
    %cst = arith.constant 0.000000e+00 : f32
    %8 = vector.broadcast %cst : f32 to vector<4x256xf32>
    %9 = arith.maximumf %0, %8 : vector<4x256xf32>
    %c1_i32 = arith.constant 1 : i32
    %10 = tpu.dynamic_rotate %9 by %c1_i32 dim 1 : vector<4x256xf32>, i32 -> vector<4x256xf32>
    %11 = vector.broadcast %1 : vector<1x256xf32> to vector<4x256xf32>
    %12 = arith.mulf %10, %11 : vector<4x256xf32>
    %c255_i32 = arith.constant 255 : i32
    %13 = tpu.dynamic_rotate %9 by %c255_i32 dim 1 : vector<4x256xf32>, i32 -> vector<4x256xf32>
    %14 = vector.broadcast %2 : vector<1x256xf32> to vector<4x256xf32>
    %15 = arith.mulf %13, %14 : vector<4x256xf32>
    %16 = vector.extract_strided_slice %5 {offsets = [0, 3], sizes = [4, 1], strides = [1, 1]} : vector<4x9xf32> to vector<4x1xf32>
    %17 = vector.broadcast %16 : vector<4x1xf32> to vector<4x256xf32>
    %18 = arith.mulf %12, %17 : vector<4x256xf32>
    %19 = vector.extract_strided_slice %5 {offsets = [0, 4], sizes = [4, 1], strides = [1, 1]} : vector<4x9xf32> to vector<4x1xf32>
    %20 = vector.broadcast %19 : vector<4x1xf32> to vector<4x256xf32>
    %21 = arith.mulf %9, %20 : vector<4x256xf32>
    %22 = arith.addf %18, %21 : vector<4x256xf32>
    %23 = vector.extract_strided_slice %5 {offsets = [0, 5], sizes = [4, 1], strides = [1, 1]} : vector<4x9xf32> to vector<4x1xf32>
    %24 = vector.broadcast %23 : vector<4x1xf32> to vector<4x256xf32>
    %25 = arith.mulf %15, %24 : vector<4x256xf32>
    %26 = arith.addf %22, %25 : vector<4x256xf32>
    %27 = vector.extract_strided_slice %5 {offsets = [0, 0], sizes = [4, 1], strides = [1, 1]} : vector<4x9xf32> to vector<4x1xf32>
    %28 = vector.broadcast %27 : vector<4x1xf32> to vector<4x256xf32>
    %29 = arith.mulf %12, %28 : vector<4x256xf32>
    %30 = vector.extract_strided_slice %5 {offsets = [0, 1], sizes = [4, 1], strides = [1, 1]} : vector<4x9xf32> to vector<4x1xf32>
    %31 = vector.broadcast %30 : vector<4x1xf32> to vector<4x256xf32>
    %32 = arith.mulf %9, %31 : vector<4x256xf32>
    %33 = arith.addf %29, %32 : vector<4x256xf32>
    %34 = vector.extract_strided_slice %5 {offsets = [0, 2], sizes = [4, 1], strides = [1, 1]} : vector<4x9xf32> to vector<4x1xf32>
    %35 = vector.broadcast %34 : vector<4x1xf32> to vector<4x256xf32>
    %36 = arith.mulf %15, %35 : vector<4x256xf32>
    %37 = arith.addf %33, %36 : vector<4x256xf32>
    %c16_i32 = arith.constant 16 : i32
    %38 = tpu.dynamic_rotate %37 by %c16_i32 dim 1 : vector<4x256xf32>, i32 -> vector<4x256xf32>
    %39 = vector.broadcast %3 : vector<1x256xf32> to vector<4x256xf32>
    %40 = arith.mulf %38, %39 : vector<4x256xf32>
    %41 = arith.addf %26, %40 : vector<4x256xf32>
    %42 = vector.extract_strided_slice %5 {offsets = [0, 6], sizes = [4, 1], strides = [1, 1]} : vector<4x9xf32> to vector<4x1xf32>
    %43 = vector.broadcast %42 : vector<4x1xf32> to vector<4x256xf32>
    %44 = arith.mulf %12, %43 : vector<4x256xf32>
    %45 = vector.extract_strided_slice %5 {offsets = [0, 7], sizes = [4, 1], strides = [1, 1]} : vector<4x9xf32> to vector<4x1xf32>
    %46 = vector.broadcast %45 : vector<4x1xf32> to vector<4x256xf32>
    %47 = arith.mulf %9, %46 : vector<4x256xf32>
    %48 = arith.addf %44, %47 : vector<4x256xf32>
    %49 = vector.extract_strided_slice %5 {offsets = [0, 8], sizes = [4, 1], strides = [1, 1]} : vector<4x9xf32> to vector<4x1xf32>
    %50 = vector.broadcast %49 : vector<4x1xf32> to vector<4x256xf32>
    %51 = arith.mulf %15, %50 : vector<4x256xf32>
    %52 = arith.addf %48, %51 : vector<4x256xf32>
    %c240_i32 = arith.constant 240 : i32
    %53 = tpu.dynamic_rotate %52 by %c240_i32 dim 1 : vector<4x256xf32>, i32 -> vector<4x256xf32>
    %54 = vector.broadcast %4 : vector<1x256xf32> to vector<4x256xf32>
    %55 = arith.mulf %53, %54 : vector<4x256xf32>
    %56 = arith.addf %41, %55 : vector<4x256xf32>
    %57 = vector.extract_strided_slice %6 {offsets = [0, 0], sizes = [8, 1], strides = [1, 1]} : vector<8x4xf32> to vector<8x1xf32>
    %58 = vector.extract_strided_slice %56 {offsets = [0, 0], sizes = [1, 256], strides = [1, 1]} : vector<4x256xf32> to vector<1x256xf32>
    %59 = vector.broadcast %57 : vector<8x1xf32> to vector<8x256xf32>
    %60 = vector.broadcast %58 : vector<1x256xf32> to vector<8x256xf32>
    %61 = arith.mulf %59, %60 : vector<8x256xf32>
    %62 = vector.extract_strided_slice %6 {offsets = [0, 1], sizes = [8, 1], strides = [1, 1]} : vector<8x4xf32> to vector<8x1xf32>
    %63 = vector.extract_strided_slice %56 {offsets = [1, 0], sizes = [1, 256], strides = [1, 1]} : vector<4x256xf32> to vector<1x256xf32>
    %64 = vector.broadcast %62 : vector<8x1xf32> to vector<8x256xf32>
    %65 = vector.broadcast %63 : vector<1x256xf32> to vector<8x256xf32>
    %66 = arith.mulf %64, %65 : vector<8x256xf32>
    %67 = arith.addf %61, %66 : vector<8x256xf32>
    %68 = vector.extract_strided_slice %6 {offsets = [0, 2], sizes = [8, 1], strides = [1, 1]} : vector<8x4xf32> to vector<8x1xf32>
    %69 = vector.extract_strided_slice %56 {offsets = [2, 0], sizes = [1, 256], strides = [1, 1]} : vector<4x256xf32> to vector<1x256xf32>
    %70 = vector.broadcast %68 : vector<8x1xf32> to vector<8x256xf32>
    %71 = vector.broadcast %69 : vector<1x256xf32> to vector<8x256xf32>
    %72 = arith.mulf %70, %71 : vector<8x256xf32>
    %73 = arith.addf %67, %72 : vector<8x256xf32>
    %74 = vector.extract_strided_slice %6 {offsets = [0, 3], sizes = [8, 1], strides = [1, 1]} : vector<8x4xf32> to vector<8x1xf32>
    %75 = vector.extract_strided_slice %56 {offsets = [3, 0], sizes = [1, 256], strides = [1, 1]} : vector<4x256xf32> to vector<1x256xf32>
    %76 = vector.broadcast %74 : vector<8x1xf32> to vector<8x256xf32>
    %77 = vector.broadcast %75 : vector<1x256xf32> to vector<8x256xf32>
    %78 = arith.mulf %76, %77 : vector<8x256xf32>
    %79 = arith.addf %73, %78 : vector<8x256xf32>
    %80 = vector.broadcast %7 : vector<8x1xf32> to vector<8x256xf32>
    %81 = arith.addf %79, %80 : vector<8x256xf32>
    %c24 = arith.constant 24 : index
    %c0_10 = arith.constant 0 : index
    %82 = vector.load %arg3[%c24, %c0_10] : memref<120x128xf32, #tpu.memory_space<vmem>>, vector<8x9xf32>
    %c32 = arith.constant 32 : index
    %c0_11 = arith.constant 0 : index
    %83 = vector.load %arg3[%c32, %c0_11] : memref<120x128xf32, #tpu.memory_space<vmem>>, vector<8x8xf32>
    %c40 = arith.constant 40 : index
    %c0_12 = arith.constant 0 : index
    %84 = vector.load %arg3[%c40, %c0_12] : memref<120x128xf32, #tpu.memory_space<vmem>>, vector<8x1xf32>
    %cst_13 = arith.constant 0.000000e+00 : f32
    %85 = vector.broadcast %cst_13 : f32 to vector<8x256xf32>
    %86 = arith.maximumf %81, %85 : vector<8x256xf32>
    %c1_i32_14 = arith.constant 1 : i32
    %87 = tpu.dynamic_rotate %86 by %c1_i32_14 dim 1 : vector<8x256xf32>, i32 -> vector<8x256xf32>
    %88 = vector.broadcast %1 : vector<1x256xf32> to vector<8x256xf32>
    %89 = arith.mulf %87, %88 : vector<8x256xf32>
    %c255_i32_15 = arith.constant 255 : i32
    %90 = tpu.dynamic_rotate %86 by %c255_i32_15 dim 1 : vector<8x256xf32>, i32 -> vector<8x256xf32>
    %91 = vector.broadcast %2 : vector<1x256xf32> to vector<8x256xf32>
    %92 = arith.mulf %90, %91 : vector<8x256xf32>
    %93 = vector.extract_strided_slice %82 {offsets = [0, 3], sizes = [8, 1], strides = [1, 1]} : vector<8x9xf32> to vector<8x1xf32>
    %94 = vector.broadcast %93 : vector<8x1xf32> to vector<8x256xf32>
    %95 = arith.mulf %89, %94 : vector<8x256xf32>
    %96 = vector.extract_strided_slice %82 {offsets = [0, 4], sizes = [8, 1], strides = [1, 1]} : vector<8x9xf32> to vector<8x1xf32>
    %97 = vector.broadcast %96 : vector<8x1xf32> to vector<8x256xf32>
    %98 = arith.mulf %86, %97 : vector<8x256xf32>
    %99 = arith.addf %95, %98 : vector<8x256xf32>
    %100 = vector.extract_strided_slice %82 {offsets = [0, 5], sizes = [8, 1], strides = [1, 1]} : vector<8x9xf32> to vector<8x1xf32>
    %101 = vector.broadcast %100 : vector<8x1xf32> to vector<8x256xf32>
    %102 = arith.mulf %92, %101 : vector<8x256xf32>
    %103 = arith.addf %99, %102 : vector<8x256xf32>
    %104 = vector.extract_strided_slice %82 {offsets = [0, 0], sizes = [8, 1], strides = [1, 1]} : vector<8x9xf32> to vector<8x1xf32>
    %105 = vector.broadcast %104 : vector<8x1xf32> to vector<8x256xf32>
    %106 = arith.mulf %89, %105 : vector<8x256xf32>
    %107 = vector.extract_strided_slice %82 {offsets = [0, 1], sizes = [8, 1], strides = [1, 1]} : vector<8x9xf32> to vector<8x1xf32>
    %108 = vector.broadcast %107 : vector<8x1xf32> to vector<8x256xf32>
    %109 = arith.mulf %86, %108 : vector<8x256xf32>
    %110 = arith.addf %106, %109 : vector<8x256xf32>
    %111 = vector.extract_strided_slice %82 {offsets = [0, 2], sizes = [8, 1], strides = [1, 1]} : vector<8x9xf32> to vector<8x1xf32>
    %112 = vector.broadcast %111 : vector<8x1xf32> to vector<8x256xf32>
    %113 = arith.mulf %92, %112 : vector<8x256xf32>
    %114 = arith.addf %110, %113 : vector<8x256xf32>
    %c16_i32_16 = arith.constant 16 : i32
    %115 = tpu.dynamic_rotate %114 by %c16_i32_16 dim 1 : vector<8x256xf32>, i32 -> vector<8x256xf32>
    %116 = vector.broadcast %3 : vector<1x256xf32> to vector<8x256xf32>
    %117 = arith.mulf %115, %116 : vector<8x256xf32>
    %118 = arith.addf %103, %117 : vector<8x256xf32>
    %119 = vector.extract_strided_slice %82 {offsets = [0, 6], sizes = [8, 1], strides = [1, 1]} : vector<8x9xf32> to vector<8x1xf32>
    %120 = vector.broadcast %119 : vector<8x1xf32> to vector<8x256xf32>
    %121 = arith.mulf %89, %120 : vector<8x256xf32>
    %122 = vector.extract_strided_slice %82 {offsets = [0, 7], sizes = [8, 1], strides = [1, 1]} : vector<8x9xf32> to vector<8x1xf32>
    %123 = vector.broadcast %122 : vector<8x1xf32> to vector<8x256xf32>
    %124 = arith.mulf %86, %123 : vector<8x256xf32>
    %125 = arith.addf %121, %124 : vector<8x256xf32>
    %126 = vector.extract_strided_slice %82 {offsets = [0, 8], sizes = [8, 1], strides = [1, 1]} : vector<8x9xf32> to vector<8x1xf32>
    %127 = vector.broadcast %126 : vector<8x1xf32> to vector<8x256xf32>
    %128 = arith.mulf %92, %127 : vector<8x256xf32>
    %129 = arith.addf %125, %128 : vector<8x256xf32>
    %c240_i32_17 = arith.constant 240 : i32
    %130 = tpu.dynamic_rotate %129 by %c240_i32_17 dim 1 : vector<8x256xf32>, i32 -> vector<8x256xf32>
    %131 = vector.broadcast %4 : vector<1x256xf32> to vector<8x256xf32>
    %132 = arith.mulf %130, %131 : vector<8x256xf32>
    %133 = arith.addf %118, %132 : vector<8x256xf32>
    %134 = vector.extract_strided_slice %83 {offsets = [0, 0], sizes = [8, 1], strides = [1, 1]} : vector<8x8xf32> to vector<8x1xf32>
    %135 = vector.extract_strided_slice %133 {offsets = [0, 0], sizes = [1, 256], strides = [1, 1]} : vector<8x256xf32> to vector<1x256xf32>
    %136 = vector.broadcast %134 : vector<8x1xf32> to vector<8x256xf32>
    %137 = vector.broadcast %135 : vector<1x256xf32> to vector<8x256xf32>
    %138 = arith.mulf %136, %137 : vector<8x256xf32>
    %139 = vector.extract_strided_slice %83 {offsets = [0, 1], sizes = [8, 1], strides = [1, 1]} : vector<8x8xf32> to vector<8x1xf32>
    %140 = vector.extract_strided_slice %133 {offsets = [1, 0], sizes = [1, 256], strides = [1, 1]} : vector<8x256xf32> to vector<1x256xf32>
    %141 = vector.broadcast %139 : vector<8x1xf32> to vector<8x256xf32>
    %142 = vector.broadcast %140 : vector<1x256xf32> to vector<8x256xf32>
    %143 = arith.mulf %141, %142 : vector<8x256xf32>
    %144 = arith.addf %138, %143 : vector<8x256xf32>
    %145 = vector.extract_strided_slice %83 {offsets = [0, 2], sizes = [8, 1], strides = [1, 1]} : vector<8x8xf32> to vector<8x1xf32>
    %146 = vector.extract_strided_slice %133 {offsets = [2, 0], sizes = [1, 256], strides = [1, 1]} : vector<8x256xf32> to vector<1x256xf32>
    %147 = vector.broadcast %145 : vector<8x1xf32> to vector<8x256xf32>
    %148 = vector.broadcast %146 : vector<1x256xf32> to vector<8x256xf32>
    %149 = arith.mulf %147, %148 : vector<8x256xf32>
    %150 = arith.addf %144, %149 : vector<8x256xf32>
    %151 = vector.extract_strided_slice %83 {offsets = [0, 3], sizes = [8, 1], strides = [1, 1]} : vector<8x8xf32> to vector<8x1xf32>
    %152 = vector.extract_strided_slice %133 {offsets = [3, 0], sizes = [1, 256], strides = [1, 1]} : vector<8x256xf32> to vector<1x256xf32>
    %153 = vector.broadcast %151 : vector<8x1xf32> to vector<8x256xf32>
    %154 = vector.broadcast %152 : vector<1x256xf32> to vector<8x256xf32>
    %155 = arith.mulf %153, %154 : vector<8x256xf32>
    %156 = arith.addf %150, %155 : vector<8x256xf32>
    %157 = vector.extract_strided_slice %83 {offsets = [0, 4], sizes = [8, 1], strides = [1, 1]} : vector<8x8xf32> to vector<8x1xf32>
    %158 = vector.extract_strided_slice %133 {offsets = [4, 0], sizes = [1, 256], strides = [1, 1]} : vector<8x256xf32> to vector<1x256xf32>
    %159 = vector.broadcast %157 : vector<8x1xf32> to vector<8x256xf32>
    %160 = vector.broadcast %158 : vector<1x256xf32> to vector<8x256xf32>
    %161 = arith.mulf %159, %160 : vector<8x256xf32>
    %162 = arith.addf %156, %161 : vector<8x256xf32>
    %163 = vector.extract_strided_slice %83 {offsets = [0, 5], sizes = [8, 1], strides = [1, 1]} : vector<8x8xf32> to vector<8x1xf32>
    %164 = vector.extract_strided_slice %133 {offsets = [5, 0], sizes = [1, 256], strides = [1, 1]} : vector<8x256xf32> to vector<1x256xf32>
    %165 = vector.broadcast %163 : vector<8x1xf32> to vector<8x256xf32>
    %166 = vector.broadcast %164 : vector<1x256xf32> to vector<8x256xf32>
    %167 = arith.mulf %165, %166 : vector<8x256xf32>
    %168 = arith.addf %162, %167 : vector<8x256xf32>
    %169 = vector.extract_strided_slice %83 {offsets = [0, 6], sizes = [8, 1], strides = [1, 1]} : vector<8x8xf32> to vector<8x1xf32>
    %170 = vector.extract_strided_slice %133 {offsets = [6, 0], sizes = [1, 256], strides = [1, 1]} : vector<8x256xf32> to vector<1x256xf32>
    %171 = vector.broadcast %169 : vector<8x1xf32> to vector<8x256xf32>
    %172 = vector.broadcast %170 : vector<1x256xf32> to vector<8x256xf32>
    %173 = arith.mulf %171, %172 : vector<8x256xf32>
    %174 = arith.addf %168, %173 : vector<8x256xf32>
    %175 = vector.extract_strided_slice %83 {offsets = [0, 7], sizes = [8, 1], strides = [1, 1]} : vector<8x8xf32> to vector<8x1xf32>
    %176 = vector.extract_strided_slice %133 {offsets = [7, 0], sizes = [1, 256], strides = [1, 1]} : vector<8x256xf32> to vector<1x256xf32>
    %177 = vector.broadcast %175 : vector<8x1xf32> to vector<8x256xf32>
    %178 = vector.broadcast %176 : vector<1x256xf32> to vector<8x256xf32>
    %179 = arith.mulf %177, %178 : vector<8x256xf32>
    %180 = arith.addf %174, %179 : vector<8x256xf32>
    %181 = vector.broadcast %84 : vector<8x1xf32> to vector<8x256xf32>
    %182 = arith.addf %180, %181 : vector<8x256xf32>
    %c48 = arith.constant 48 : index
    %c0_18 = arith.constant 0 : index
    %183 = vector.load %arg3[%c48, %c0_18] : memref<120x128xf32, #tpu.memory_space<vmem>>, vector<8x9xf32>
    %c56 = arith.constant 56 : index
    %c0_19 = arith.constant 0 : index
    %184 = vector.load %arg3[%c56, %c0_19] : memref<120x128xf32, #tpu.memory_space<vmem>>, vector<16x8xf32>
    %c72 = arith.constant 72 : index
    %c0_20 = arith.constant 0 : index
    %185 = vector.load %arg3[%c72, %c0_20] : memref<120x128xf32, #tpu.memory_space<vmem>>, vector<16x1xf32>
    %cst_21 = arith.constant 0.000000e+00 : f32
    %186 = vector.broadcast %cst_21 : f32 to vector<8x256xf32>
    %187 = arith.maximumf %182, %186 : vector<8x256xf32>
    %c1_i32_22 = arith.constant 1 : i32
    %188 = tpu.dynamic_rotate %187 by %c1_i32_22 dim 1 : vector<8x256xf32>, i32 -> vector<8x256xf32>
    %189 = vector.broadcast %1 : vector<1x256xf32> to vector<8x256xf32>
    %190 = arith.mulf %188, %189 : vector<8x256xf32>
    %c255_i32_23 = arith.constant 255 : i32
    %191 = tpu.dynamic_rotate %187 by %c255_i32_23 dim 1 : vector<8x256xf32>, i32 -> vector<8x256xf32>
    %192 = vector.broadcast %2 : vector<1x256xf32> to vector<8x256xf32>
    %193 = arith.mulf %191, %192 : vector<8x256xf32>
    %194 = vector.extract_strided_slice %183 {offsets = [0, 3], sizes = [8, 1], strides = [1, 1]} : vector<8x9xf32> to vector<8x1xf32>
    %195 = vector.broadcast %194 : vector<8x1xf32> to vector<8x256xf32>
    %196 = arith.mulf %190, %195 : vector<8x256xf32>
    %197 = vector.extract_strided_slice %183 {offsets = [0, 4], sizes = [8, 1], strides = [1, 1]} : vector<8x9xf32> to vector<8x1xf32>
    %198 = vector.broadcast %197 : vector<8x1xf32> to vector<8x256xf32>
    %199 = arith.mulf %187, %198 : vector<8x256xf32>
    %200 = arith.addf %196, %199 : vector<8x256xf32>
    %201 = vector.extract_strided_slice %183 {offsets = [0, 5], sizes = [8, 1], strides = [1, 1]} : vector<8x9xf32> to vector<8x1xf32>
    %202 = vector.broadcast %201 : vector<8x1xf32> to vector<8x256xf32>
    %203 = arith.mulf %193, %202 : vector<8x256xf32>
    %204 = arith.addf %200, %203 : vector<8x256xf32>
    %205 = vector.extract_strided_slice %183 {offsets = [0, 0], sizes = [8, 1], strides = [1, 1]} : vector<8x9xf32> to vector<8x1xf32>
    %206 = vector.broadcast %205 : vector<8x1xf32> to vector<8x256xf32>
    %207 = arith.mulf %190, %206 : vector<8x256xf32>
    %208 = vector.extract_strided_slice %183 {offsets = [0, 1], sizes = [8, 1], strides = [1, 1]} : vector<8x9xf32> to vector<8x1xf32>
    %209 = vector.broadcast %208 : vector<8x1xf32> to vector<8x256xf32>
    %210 = arith.mulf %187, %209 : vector<8x256xf32>
    %211 = arith.addf %207, %210 : vector<8x256xf32>
    %212 = vector.extract_strided_slice %183 {offsets = [0, 2], sizes = [8, 1], strides = [1, 1]} : vector<8x9xf32> to vector<8x1xf32>
    %213 = vector.broadcast %212 : vector<8x1xf32> to vector<8x256xf32>
    %214 = arith.mulf %193, %213 : vector<8x256xf32>
    %215 = arith.addf %211, %214 : vector<8x256xf32>
    %c16_i32_24 = arith.constant 16 : i32
    %216 = tpu.dynamic_rotate %215 by %c16_i32_24 dim 1 : vector<8x256xf32>, i32 -> vector<8x256xf32>
    %217 = vector.broadcast %3 : vector<1x256xf32> to vector<8x256xf32>
    %218 = arith.mulf %216, %217 : vector<8x256xf32>
    %219 = arith.addf %204, %218 : vector<8x256xf32>
    %220 = vector.extract_strided_slice %183 {offsets = [0, 6], sizes = [8, 1], strides = [1, 1]} : vector<8x9xf32> to vector<8x1xf32>
    %221 = vector.broadcast %220 : vector<8x1xf32> to vector<8x256xf32>
    %222 = arith.mulf %190, %221 : vector<8x256xf32>
    %223 = vector.extract_strided_slice %183 {offsets = [0, 7], sizes = [8, 1], strides = [1, 1]} : vector<8x9xf32> to vector<8x1xf32>
    %224 = vector.broadcast %223 : vector<8x1xf32> to vector<8x256xf32>
    %225 = arith.mulf %187, %224 : vector<8x256xf32>
    %226 = arith.addf %222, %225 : vector<8x256xf32>
    %227 = vector.extract_strided_slice %183 {offsets = [0, 8], sizes = [8, 1], strides = [1, 1]} : vector<8x9xf32> to vector<8x1xf32>
    %228 = vector.broadcast %227 : vector<8x1xf32> to vector<8x256xf32>
    %229 = arith.mulf %193, %228 : vector<8x256xf32>
    %230 = arith.addf %226, %229 : vector<8x256xf32>
    %c240_i32_25 = arith.constant 240 : i32
    %231 = tpu.dynamic_rotate %230 by %c240_i32_25 dim 1 : vector<8x256xf32>, i32 -> vector<8x256xf32>
    %232 = vector.broadcast %4 : vector<1x256xf32> to vector<8x256xf32>
    %233 = arith.mulf %231, %232 : vector<8x256xf32>
    %234 = arith.addf %219, %233 : vector<8x256xf32>
    %235 = vector.extract_strided_slice %184 {offsets = [0, 0], sizes = [16, 1], strides = [1, 1]} : vector<16x8xf32> to vector<16x1xf32>
    %236 = vector.extract_strided_slice %234 {offsets = [0, 0], sizes = [1, 256], strides = [1, 1]} : vector<8x256xf32> to vector<1x256xf32>
    %237 = vector.broadcast %235 : vector<16x1xf32> to vector<16x256xf32>
    %238 = vector.broadcast %236 : vector<1x256xf32> to vector<16x256xf32>
    %239 = arith.mulf %237, %238 : vector<16x256xf32>
    %240 = vector.extract_strided_slice %184 {offsets = [0, 1], sizes = [16, 1], strides = [1, 1]} : vector<16x8xf32> to vector<16x1xf32>
    %241 = vector.extract_strided_slice %234 {offsets = [1, 0], sizes = [1, 256], strides = [1, 1]} : vector<8x256xf32> to vector<1x256xf32>
    %242 = vector.broadcast %240 : vector<16x1xf32> to vector<16x256xf32>
    %243 = vector.broadcast %241 : vector<1x256xf32> to vector<16x256xf32>
    %244 = arith.mulf %242, %243 : vector<16x256xf32>
    %245 = arith.addf %239, %244 : vector<16x256xf32>
    %246 = vector.extract_strided_slice %184 {offsets = [0, 2], sizes = [16, 1], strides = [1, 1]} : vector<16x8xf32> to vector<16x1xf32>
    %247 = vector.extract_strided_slice %234 {offsets = [2, 0], sizes = [1, 256], strides = [1, 1]} : vector<8x256xf32> to vector<1x256xf32>
    %248 = vector.broadcast %246 : vector<16x1xf32> to vector<16x256xf32>
    %249 = vector.broadcast %247 : vector<1x256xf32> to vector<16x256xf32>
    %250 = arith.mulf %248, %249 : vector<16x256xf32>
    %251 = arith.addf %245, %250 : vector<16x256xf32>
    %252 = vector.extract_strided_slice %184 {offsets = [0, 3], sizes = [16, 1], strides = [1, 1]} : vector<16x8xf32> to vector<16x1xf32>
    %253 = vector.extract_strided_slice %234 {offsets = [3, 0], sizes = [1, 256], strides = [1, 1]} : vector<8x256xf32> to vector<1x256xf32>
    %254 = vector.broadcast %252 : vector<16x1xf32> to vector<16x256xf32>
    %255 = vector.broadcast %253 : vector<1x256xf32> to vector<16x256xf32>
    %256 = arith.mulf %254, %255 : vector<16x256xf32>
    %257 = arith.addf %251, %256 : vector<16x256xf32>
    %258 = vector.extract_strided_slice %184 {offsets = [0, 4], sizes = [16, 1], strides = [1, 1]} : vector<16x8xf32> to vector<16x1xf32>
    %259 = vector.extract_strided_slice %234 {offsets = [4, 0], sizes = [1, 256], strides = [1, 1]} : vector<8x256xf32> to vector<1x256xf32>
    %260 = vector.broadcast %258 : vector<16x1xf32> to vector<16x256xf32>
    %261 = vector.broadcast %259 : vector<1x256xf32> to vector<16x256xf32>
    %262 = arith.mulf %260, %261 : vector<16x256xf32>
    %263 = arith.addf %257, %262 : vector<16x256xf32>
    %264 = vector.extract_strided_slice %184 {offsets = [0, 5], sizes = [16, 1], strides = [1, 1]} : vector<16x8xf32> to vector<16x1xf32>
    %265 = vector.extract_strided_slice %234 {offsets = [5, 0], sizes = [1, 256], strides = [1, 1]} : vector<8x256xf32> to vector<1x256xf32>
    %266 = vector.broadcast %264 : vector<16x1xf32> to vector<16x256xf32>
    %267 = vector.broadcast %265 : vector<1x256xf32> to vector<16x256xf32>
    %268 = arith.mulf %266, %267 : vector<16x256xf32>
    %269 = arith.addf %263, %268 : vector<16x256xf32>
    %270 = vector.extract_strided_slice %184 {offsets = [0, 6], sizes = [16, 1], strides = [1, 1]} : vector<16x8xf32> to vector<16x1xf32>
    %271 = vector.extract_strided_slice %234 {offsets = [6, 0], sizes = [1, 256], strides = [1, 1]} : vector<8x256xf32> to vector<1x256xf32>
    %272 = vector.broadcast %270 : vector<16x1xf32> to vector<16x256xf32>
    %273 = vector.broadcast %271 : vector<1x256xf32> to vector<16x256xf32>
    %274 = arith.mulf %272, %273 : vector<16x256xf32>
    %275 = arith.addf %269, %274 : vector<16x256xf32>
    %276 = vector.extract_strided_slice %184 {offsets = [0, 7], sizes = [16, 1], strides = [1, 1]} : vector<16x8xf32> to vector<16x1xf32>
    %277 = vector.extract_strided_slice %234 {offsets = [7, 0], sizes = [1, 256], strides = [1, 1]} : vector<8x256xf32> to vector<1x256xf32>
    %278 = vector.broadcast %276 : vector<16x1xf32> to vector<16x256xf32>
    %279 = vector.broadcast %277 : vector<1x256xf32> to vector<16x256xf32>
    %280 = arith.mulf %278, %279 : vector<16x256xf32>
    %281 = arith.addf %275, %280 : vector<16x256xf32>
    %282 = vector.broadcast %185 : vector<16x1xf32> to vector<16x256xf32>
    %283 = arith.addf %281, %282 : vector<16x256xf32>
    %c88 = arith.constant 88 : index
    %c0_26 = arith.constant 0 : index
    %284 = vector.load %arg3[%c88, %c0_26] : memref<120x128xf32, #tpu.memory_space<vmem>>, vector<16x4xf32>
    %c104 = arith.constant 104 : index
    %c0_27 = arith.constant 0 : index
    %285 = vector.load %arg3[%c104, %c0_27] : memref<120x128xf32, #tpu.memory_space<vmem>>, vector<16x1xf32>
    %286 = vector.extract_strided_slice %284 {offsets = [0, 0], sizes = [16, 1], strides = [1, 1]} : vector<16x4xf32> to vector<16x1xf32>
    %287 = vector.extract_strided_slice %0 {offsets = [0, 0], sizes = [1, 256], strides = [1, 1]} : vector<4x256xf32> to vector<1x256xf32>
    %288 = vector.broadcast %286 : vector<16x1xf32> to vector<16x256xf32>
    %289 = vector.broadcast %287 : vector<1x256xf32> to vector<16x256xf32>
    %290 = arith.mulf %288, %289 : vector<16x256xf32>
    %291 = vector.extract_strided_slice %284 {offsets = [0, 1], sizes = [16, 1], strides = [1, 1]} : vector<16x4xf32> to vector<16x1xf32>
    %292 = vector.extract_strided_slice %0 {offsets = [1, 0], sizes = [1, 256], strides = [1, 1]} : vector<4x256xf32> to vector<1x256xf32>
    %293 = vector.broadcast %291 : vector<16x1xf32> to vector<16x256xf32>
    %294 = vector.broadcast %292 : vector<1x256xf32> to vector<16x256xf32>
    %295 = arith.mulf %293, %294 : vector<16x256xf32>
    %296 = arith.addf %290, %295 : vector<16x256xf32>
    %297 = vector.extract_strided_slice %284 {offsets = [0, 2], sizes = [16, 1], strides = [1, 1]} : vector<16x4xf32> to vector<16x1xf32>
    %298 = vector.extract_strided_slice %0 {offsets = [2, 0], sizes = [1, 256], strides = [1, 1]} : vector<4x256xf32> to vector<1x256xf32>
    %299 = vector.broadcast %297 : vector<16x1xf32> to vector<16x256xf32>
    %300 = vector.broadcast %298 : vector<1x256xf32> to vector<16x256xf32>
    %301 = arith.mulf %299, %300 : vector<16x256xf32>
    %302 = arith.addf %296, %301 : vector<16x256xf32>
    %303 = vector.extract_strided_slice %284 {offsets = [0, 3], sizes = [16, 1], strides = [1, 1]} : vector<16x4xf32> to vector<16x1xf32>
    %304 = vector.extract_strided_slice %0 {offsets = [3, 0], sizes = [1, 256], strides = [1, 1]} : vector<4x256xf32> to vector<1x256xf32>
    %305 = vector.broadcast %303 : vector<16x1xf32> to vector<16x256xf32>
    %306 = vector.broadcast %304 : vector<1x256xf32> to vector<16x256xf32>
    %307 = arith.mulf %305, %306 : vector<16x256xf32>
    %308 = arith.addf %302, %307 : vector<16x256xf32>
    %309 = vector.broadcast %285 : vector<16x1xf32> to vector<16x256xf32>
    %310 = arith.addf %308, %309 : vector<16x256xf32>
    %311 = arith.addf %283, %310 : vector<16x256xf32>
    %c0_28 = arith.constant 0 : index
    %c0_29 = arith.constant 0 : index
    %312 = vector.load %arg4[%c0_28, %c0_29] : memref<16x256xf32, #tpu.memory_space<vmem>>, vector<16x256xf32>
    tpu.vector_store %arg4[%c0_28, %c0_29], %311 {strides = array<i32>} : memref<16x256xf32, #tpu.memory_space<vmem>>, vector<16x256xf32>,
    return
  }
  func.func @transform_0(%arg0: i32) -> (i32, i32) {
    %c0_i32 = arith.constant 0 : i32
    %c0_i32_0 = arith.constant 0 : i32
    return %c0_i32, %arg0 : i32, i32
  }
  func.func @transform_1(%arg0: i32) -> (i32, i32) {
    %c0_i32 = arith.constant 0 : i32
    %c0_i32_0 = arith.constant 0 : i32
    %c0_i32_1 = arith.constant 0 : i32
    return %c0_i32, %c0_i32_0 : i32, i32
  }
  func.func @transform_2(%arg0: i32) -> (i32, i32) {
    %c0_i32 = arith.constant 0 : i32
    %c0_i32_0 = arith.constant 0 : i32
    %c0_i32_1 = arith.constant 0 : i32
    return %c0_i32, %c0_i32_0 : i32, i32
  }
  func.func @transform_3(%arg0: i32) -> (i32, i32) {
    %c0_i32 = arith.constant 0 : i32
    %c0_i32_0 = arith.constant 0 : i32
    return %c0_i32, %arg0 : i32, i32
  }
}

module attributes {stable_mosaic.version = 11 : i64} {
  func.func @_xception_kernel(%arg0: i32, %arg1: memref<4x256xf32, #tpu.memory_space<vmem>>, %arg2: memref<4x256xf32, #tpu.memory_space<vmem>>, %arg3: memref<120x128xf32, #tpu.memory_space<vmem>>, %arg4: memref<16x256xf32, #tpu.memory_space<vmem>>) attributes {dimension_semantics = [#tpu.dimension_semantics<parallel>], iteration_bounds = array<i64: 2>, scalar_prefetch = 0 : i64, scratch_operands = 0 : i64, tpu.core_type = #tpu.core_type<tc>, window_params = [{transform_indices = @transform_0, window_bounds = array<i64: 4, 256>}, {pipeline_mode = #tpu.pipeline_mode<synchronous>, transform_indices = @transform_1, window_bounds = array<i64: 4, 256>}, {pipeline_mode = #tpu.pipeline_mode<synchronous>, transform_indices = @transform_2, window_bounds = array<i64: 120, 128>}, {transform_indices = @transform_3, window_bounds = array<i64: 16, 256>}]} {
    %c0 = arith.constant 0 : index
    %c0_0 = arith.constant 0 : index
    %0 = vector.load %arg1[%c0, %c0_0] : memref<4x256xf32, #tpu.memory_space<vmem>>, vector<4x256xf32>
    %c0_1 = arith.constant 0 : index
    %c0_2 = arith.constant 0 : index
    %1 = vector.load %arg2[%c0_1, %c0_2] : memref<4x256xf32, #tpu.memory_space<vmem>>, vector<1x256xf32>
    %c1 = arith.constant 1 : index
    %c0_3 = arith.constant 0 : index
    %2 = vector.load %arg2[%c1, %c0_3] : memref<4x256xf32, #tpu.memory_space<vmem>>, vector<1x256xf32>
    %c2 = arith.constant 2 : index
    %c0_4 = arith.constant 0 : index
    %3 = vector.load %arg2[%c2, %c0_4] : memref<4x256xf32, #tpu.memory_space<vmem>>, vector<1x256xf32>
    %c3 = arith.constant 3 : index
    %c0_5 = arith.constant 0 : index
    %4 = vector.load %arg2[%c3, %c0_5] : memref<4x256xf32, #tpu.memory_space<vmem>>, vector<1x256xf32>
    %c0_6 = arith.constant 0 : index
    %c0_7 = arith.constant 0 : index
    %5 = vector.load %arg3[%c0_6, %c0_7] : memref<120x128xf32, #tpu.memory_space<vmem>>, vector<4x9xf32>
    %c8 = arith.constant 8 : index
    %c0_8 = arith.constant 0 : index
    %6 = vector.load %arg3[%c8, %c0_8] : memref<120x128xf32, #tpu.memory_space<vmem>>, vector<8x4xf32>
    %c16 = arith.constant 16 : index
    %c0_9 = arith.constant 0 : index
    %7 = vector.load %arg3[%c16, %c0_9] : memref<120x128xf32, #tpu.memory_space<vmem>>, vector<8x1xf32>
    %cst = arith.constant 0.000000e+00 : f32
    %8 = vector.broadcast %cst : f32 to vector<4x256xf32>
    %9 = arith.maximumf %0, %8 : vector<4x256xf32>
    %c1_i32 = arith.constant 1 : i32
    %10 = tpu.dynamic_rotate %9 by %c1_i32 dim 1 : vector<4x256xf32>, i32 -> vector<4x256xf32>
    %11 = vector.broadcast %1 : vector<1x256xf32> to vector<4x256xf32>
    %12 = arith.mulf %10, %11 : vector<4x256xf32>
    %c255_i32 = arith.constant 255 : i32
    %13 = tpu.dynamic_rotate %9 by %c255_i32 dim 1 : vector<4x256xf32>, i32 -> vector<4x256xf32>
    %14 = vector.broadcast %2 : vector<1x256xf32> to vector<4x256xf32>
    %15 = arith.mulf %13, %14 : vector<4x256xf32>
    %16 = vector.extract_strided_slice %5 {offsets = [0, 3], sizes = [4, 1], strides = [1, 1]} : vector<4x9xf32> to vector<4x1xf32>
    %17 = vector.broadcast %16 : vector<4x1xf32> to vector<4x256xf32>
    %18 = arith.mulf %12, %17 : vector<4x256xf32>
    %19 = vector.extract_strided_slice %5 {offsets = [0, 4], sizes = [4, 1], strides = [1, 1]} : vector<4x9xf32> to vector<4x1xf32>
    %20 = vector.broadcast %19 : vector<4x1xf32> to vector<4x256xf32>
    %21 = arith.mulf %9, %20 : vector<4x256xf32>
    %22 = arith.addf %18, %21 : vector<4x256xf32>
    %23 = vector.extract_strided_slice %5 {offsets = [0, 5], sizes = [4, 1], strides = [1, 1]} : vector<4x9xf32> to vector<4x1xf32>
    %24 = vector.broadcast %23 : vector<4x1xf32> to vector<4x256xf32>
    %25 = arith.mulf %15, %24 : vector<4x256xf32>
    %26 = arith.addf %22, %25 : vector<4x256xf32>
    %27 = vector.extract_strided_slice %5 {offsets = [0, 0], sizes = [4, 1], strides = [1, 1]} : vector<4x9xf32> to vector<4x1xf32>
    %28 = vector.broadcast %27 : vector<4x1xf32> to vector<4x256xf32>
    %29 = arith.mulf %12, %28 : vector<4x256xf32>
    %30 = vector.extract_strided_slice %5 {offsets = [0, 1], sizes = [4, 1], strides = [1, 1]} : vector<4x9xf32> to vector<4x1xf32>
    %31 = vector.broadcast %30 : vector<4x1xf32> to vector<4x256xf32>
    %32 = arith.mulf %9, %31 : vector<4x256xf32>
    %33 = arith.addf %29, %32 : vector<4x256xf32>
    %34 = vector.extract_strided_slice %5 {offsets = [0, 2], sizes = [4, 1], strides = [1, 1]} : vector<4x9xf32> to vector<4x1xf32>
    %35 = vector.broadcast %34 : vector<4x1xf32> to vector<4x256xf32>
    %36 = arith.mulf %15, %35 : vector<4x256xf32>
    %37 = arith.addf %33, %36 : vector<4x256xf32>
    %c16_i32 = arith.constant 16 : i32
    %38 = tpu.dynamic_rotate %37 by %c16_i32 dim 1 : vector<4x256xf32>, i32 -> vector<4x256xf32>
    %39 = vector.broadcast %3 : vector<1x256xf32> to vector<4x256xf32>
    %40 = arith.mulf %38, %39 : vector<4x256xf32>
    %41 = arith.addf %26, %40 : vector<4x256xf32>
    %42 = vector.extract_strided_slice %5 {offsets = [0, 6], sizes = [4, 1], strides = [1, 1]} : vector<4x9xf32> to vector<4x1xf32>
    %43 = vector.broadcast %42 : vector<4x1xf32> to vector<4x256xf32>
    %44 = arith.mulf %12, %43 : vector<4x256xf32>
    %45 = vector.extract_strided_slice %5 {offsets = [0, 7], sizes = [4, 1], strides = [1, 1]} : vector<4x9xf32> to vector<4x1xf32>
    %46 = vector.broadcast %45 : vector<4x1xf32> to vector<4x256xf32>
    %47 = arith.mulf %9, %46 : vector<4x256xf32>
    %48 = arith.addf %44, %47 : vector<4x256xf32>
    %49 = vector.extract_strided_slice %5 {offsets = [0, 8], sizes = [4, 1], strides = [1, 1]} : vector<4x9xf32> to vector<4x1xf32>
    %50 = vector.broadcast %49 : vector<4x1xf32> to vector<4x256xf32>
    %51 = arith.mulf %15, %50 : vector<4x256xf32>
    %52 = arith.addf %48, %51 : vector<4x256xf32>
    %c240_i32 = arith.constant 240 : i32
    %53 = tpu.dynamic_rotate %52 by %c240_i32 dim 1 : vector<4x256xf32>, i32 -> vector<4x256xf32>
    %54 = vector.broadcast %4 : vector<1x256xf32> to vector<4x256xf32>
    %55 = arith.mulf %53, %54 : vector<4x256xf32>
    %56 = arith.addf %41, %55 : vector<4x256xf32>
    %57 = vector.extract_strided_slice %6 {offsets = [0, 0], sizes = [8, 1], strides = [1, 1]} : vector<8x4xf32> to vector<8x1xf32>
    %58 = vector.extract_strided_slice %56 {offsets = [0, 0], sizes = [1, 256], strides = [1, 1]} : vector<4x256xf32> to vector<1x256xf32>
    %59 = vector.broadcast %57 : vector<8x1xf32> to vector<8x256xf32>
    %60 = vector.broadcast %58 : vector<1x256xf32> to vector<8x256xf32>
    %61 = arith.mulf %59, %60 : vector<8x256xf32>
    %62 = vector.extract_strided_slice %6 {offsets = [0, 1], sizes = [8, 1], strides = [1, 1]} : vector<8x4xf32> to vector<8x1xf32>
    %63 = vector.extract_strided_slice %56 {offsets = [1, 0], sizes = [1, 256], strides = [1, 1]} : vector<4x256xf32> to vector<1x256xf32>
    %64 = vector.broadcast %62 : vector<8x1xf32> to vector<8x256xf32>
    %65 = vector.broadcast %63 : vector<1x256xf32> to vector<8x256xf32>
    %66 = arith.mulf %64, %65 : vector<8x256xf32>
    %67 = arith.addf %61, %66 : vector<8x256xf32>
    %68 = vector.extract_strided_slice %6 {offsets = [0, 2], sizes = [8, 1], strides = [1, 1]} : vector<8x4xf32> to vector<8x1xf32>
    %69 = vector.extract_strided_slice %56 {offsets = [2, 0], sizes = [1, 256], strides = [1, 1]} : vector<4x256xf32> to vector<1x256xf32>
    %70 = vector.broadcast %68 : vector<8x1xf32> to vector<8x256xf32>
    %71 = vector.broadcast %69 : vector<1x256xf32> to vector<8x256xf32>
    %72 = arith.mulf %70, %71 : vector<8x256xf32>
    %73 = arith.addf %67, %72 : vector<8x256xf32>
    %74 = vector.extract_strided_slice %6 {offsets = [0, 3], sizes = [8, 1], strides = [1, 1]} : vector<8x4xf32> to vector<8x1xf32>
    %75 = vector.extract_strided_slice %56 {offsets = [3, 0], sizes = [1, 256], strides = [1, 1]} : vector<4x256xf32> to vector<1x256xf32>
    %76 = vector.broadcast %74 : vector<8x1xf32> to vector<8x256xf32>
    %77 = vector.broadcast %75 : vector<1x256xf32> to vector<8x256xf32>
    %78 = arith.mulf %76, %77 : vector<8x256xf32>
    %79 = arith.addf %73, %78 : vector<8x256xf32>
    %80 = vector.broadcast %7 : vector<8x1xf32> to vector<8x256xf32>
    %81 = arith.addf %79, %80 : vector<8x256xf32>
    %c24 = arith.constant 24 : index
    %c0_10 = arith.constant 0 : index
    %82 = vector.load %arg3[%c24, %c0_10] : memref<120x128xf32, #tpu.memory_space<vmem>>, vector<8x9xf32>
    %c32 = arith.constant 32 : index
    %c0_11 = arith.constant 0 : index
    %83 = vector.load %arg3[%c32, %c0_11] : memref<120x128xf32, #tpu.memory_space<vmem>>, vector<8x8xf32>
    %c40 = arith.constant 40 : index
    %c0_12 = arith.constant 0 : index
    %84 = vector.load %arg3[%c40, %c0_12] : memref<120x128xf32, #tpu.memory_space<vmem>>, vector<8x1xf32>
    %cst_13 = arith.constant 0.000000e+00 : f32
    %85 = vector.broadcast %cst_13 : f32 to vector<8x256xf32>
    %86 = arith.maximumf %81, %85 : vector<8x256xf32>
    %c1_i32_14 = arith.constant 1 : i32
    %87 = tpu.dynamic_rotate %86 by %c1_i32_14 dim 1 : vector<8x256xf32>, i32 -> vector<8x256xf32>
    %88 = vector.broadcast %1 : vector<1x256xf32> to vector<8x256xf32>
    %89 = arith.mulf %87, %88 : vector<8x256xf32>
    %c255_i32_15 = arith.constant 255 : i32
    %90 = tpu.dynamic_rotate %86 by %c255_i32_15 dim 1 : vector<8x256xf32>, i32 -> vector<8x256xf32>
    %91 = vector.broadcast %2 : vector<1x256xf32> to vector<8x256xf32>
    %92 = arith.mulf %90, %91 : vector<8x256xf32>
    %93 = vector.extract_strided_slice %82 {offsets = [0, 3], sizes = [8, 1], strides = [1, 1]} : vector<8x9xf32> to vector<8x1xf32>
    %94 = vector.broadcast %93 : vector<8x1xf32> to vector<8x256xf32>
    %95 = arith.mulf %89, %94 : vector<8x256xf32>
    %96 = vector.extract_strided_slice %82 {offsets = [0, 4], sizes = [8, 1], strides = [1, 1]} : vector<8x9xf32> to vector<8x1xf32>
    %97 = vector.broadcast %96 : vector<8x1xf32> to vector<8x256xf32>
    %98 = arith.mulf %86, %97 : vector<8x256xf32>
    %99 = arith.addf %95, %98 : vector<8x256xf32>
    %100 = vector.extract_strided_slice %82 {offsets = [0, 5], sizes = [8, 1], strides = [1, 1]} : vector<8x9xf32> to vector<8x1xf32>
    %101 = vector.broadcast %100 : vector<8x1xf32> to vector<8x256xf32>
    %102 = arith.mulf %92, %101 : vector<8x256xf32>
    %103 = arith.addf %99, %102 : vector<8x256xf32>
    %104 = vector.extract_strided_slice %82 {offsets = [0, 0], sizes = [8, 1], strides = [1, 1]} : vector<8x9xf32> to vector<8x1xf32>
    %105 = vector.broadcast %104 : vector<8x1xf32> to vector<8x256xf32>
    %106 = arith.mulf %89, %105 : vector<8x256xf32>
    %107 = vector.extract_strided_slice %82 {offsets = [0, 1], sizes = [8, 1], strides = [1, 1]} : vector<8x9xf32> to vector<8x1xf32>
    %108 = vector.broadcast %107 : vector<8x1xf32> to vector<8x256xf32>
    %109 = arith.mulf %86, %108 : vector<8x256xf32>
    %110 = arith.addf %106, %109 : vector<8x256xf32>
    %111 = vector.extract_strided_slice %82 {offsets = [0, 2], sizes = [8, 1], strides = [1, 1]} : vector<8x9xf32> to vector<8x1xf32>
    %112 = vector.broadcast %111 : vector<8x1xf32> to vector<8x256xf32>
    %113 = arith.mulf %92, %112 : vector<8x256xf32>
    %114 = arith.addf %110, %113 : vector<8x256xf32>
    %c16_i32_16 = arith.constant 16 : i32
    %115 = tpu.dynamic_rotate %114 by %c16_i32_16 dim 1 : vector<8x256xf32>, i32 -> vector<8x256xf32>
    %116 = vector.broadcast %3 : vector<1x256xf32> to vector<8x256xf32>
    %117 = arith.mulf %115, %116 : vector<8x256xf32>
    %118 = arith.addf %103, %117 : vector<8x256xf32>
    %119 = vector.extract_strided_slice %82 {offsets = [0, 6], sizes = [8, 1], strides = [1, 1]} : vector<8x9xf32> to vector<8x1xf32>
    %120 = vector.broadcast %119 : vector<8x1xf32> to vector<8x256xf32>
    %121 = arith.mulf %89, %120 : vector<8x256xf32>
    %122 = vector.extract_strided_slice %82 {offsets = [0, 7], sizes = [8, 1], strides = [1, 1]} : vector<8x9xf32> to vector<8x1xf32>
    %123 = vector.broadcast %122 : vector<8x1xf32> to vector<8x256xf32>
    %124 = arith.mulf %86, %123 : vector<8x256xf32>
    %125 = arith.addf %121, %124 : vector<8x256xf32>
    %126 = vector.extract_strided_slice %82 {offsets = [0, 8], sizes = [8, 1], strides = [1, 1]} : vector<8x9xf32> to vector<8x1xf32>
    %127 = vector.broadcast %126 : vector<8x1xf32> to vector<8x256xf32>
    %128 = arith.mulf %92, %127 : vector<8x256xf32>
    %129 = arith.addf %125, %128 : vector<8x256xf32>
    %c240_i32_17 = arith.constant 240 : i32
    %130 = tpu.dynamic_rotate %129 by %c240_i32_17 dim 1 : vector<8x256xf32>, i32 -> vector<8x256xf32>
    %131 = vector.broadcast %4 : vector<1x256xf32> to vector<8x256xf32>
    %132 = arith.mulf %130, %131 : vector<8x256xf32>
    %133 = arith.addf %118, %132 : vector<8x256xf32>
    %134 = vector.extract_strided_slice %83 {offsets = [0, 0], sizes = [8, 1], strides = [1, 1]} : vector<8x8xf32> to vector<8x1xf32>
    %135 = vector.extract_strided_slice %133 {offsets = [0, 0], sizes = [1, 256], strides = [1, 1]} : vector<8x256xf32> to vector<1x256xf32>
    %136 = vector.broadcast %134 : vector<8x1xf32> to vector<8x256xf32>
    %137 = vector.broadcast %135 : vector<1x256xf32> to vector<8x256xf32>
    %138 = arith.mulf %136, %137 : vector<8x256xf32>
    %139 = vector.extract_strided_slice %83 {offsets = [0, 1], sizes = [8, 1], strides = [1, 1]} : vector<8x8xf32> to vector<8x1xf32>
    %140 = vector.extract_strided_slice %133 {offsets = [1, 0], sizes = [1, 256], strides = [1, 1]} : vector<8x256xf32> to vector<1x256xf32>
    %141 = vector.broadcast %139 : vector<8x1xf32> to vector<8x256xf32>
    %142 = vector.broadcast %140 : vector<1x256xf32> to vector<8x256xf32>
    %143 = arith.mulf %141, %142 : vector<8x256xf32>
    %144 = arith.addf %138, %143 : vector<8x256xf32>
    %145 = vector.extract_strided_slice %83 {offsets = [0, 2], sizes = [8, 1], strides = [1, 1]} : vector<8x8xf32> to vector<8x1xf32>
    %146 = vector.extract_strided_slice %133 {offsets = [2, 0], sizes = [1, 256], strides = [1, 1]} : vector<8x256xf32> to vector<1x256xf32>
    %147 = vector.broadcast %145 : vector<8x1xf32> to vector<8x256xf32>
    %148 = vector.broadcast %146 : vector<1x256xf32> to vector<8x256xf32>
    %149 = arith.mulf %147, %148 : vector<8x256xf32>
    %150 = arith.addf %144, %149 : vector<8x256xf32>
    %151 = vector.extract_strided_slice %83 {offsets = [0, 3], sizes = [8, 1], strides = [1, 1]} : vector<8x8xf32> to vector<8x1xf32>
    %152 = vector.extract_strided_slice %133 {offsets = [3, 0], sizes = [1, 256], strides = [1, 1]} : vector<8x256xf32> to vector<1x256xf32>
    %153 = vector.broadcast %151 : vector<8x1xf32> to vector<8x256xf32>
    %154 = vector.broadcast %152 : vector<1x256xf32> to vector<8x256xf32>
    %155 = arith.mulf %153, %154 : vector<8x256xf32>
    %156 = arith.addf %150, %155 : vector<8x256xf32>
    %157 = vector.extract_strided_slice %83 {offsets = [0, 4], sizes = [8, 1], strides = [1, 1]} : vector<8x8xf32> to vector<8x1xf32>
    %158 = vector.extract_strided_slice %133 {offsets = [4, 0], sizes = [1, 256], strides = [1, 1]} : vector<8x256xf32> to vector<1x256xf32>
    %159 = vector.broadcast %157 : vector<8x1xf32> to vector<8x256xf32>
    %160 = vector.broadcast %158 : vector<1x256xf32> to vector<8x256xf32>
    %161 = arith.mulf %159, %160 : vector<8x256xf32>
    %162 = arith.addf %156, %161 : vector<8x256xf32>
    %163 = vector.extract_strided_slice %83 {offsets = [0, 5], sizes = [8, 1], strides = [1, 1]} : vector<8x8xf32> to vector<8x1xf32>
    %164 = vector.extract_strided_slice %133 {offsets = [5, 0], sizes = [1, 256], strides = [1, 1]} : vector<8x256xf32> to vector<1x256xf32>
    %165 = vector.broadcast %163 : vector<8x1xf32> to vector<8x256xf32>
    %166 = vector.broadcast %164 : vector<1x256xf32> to vector<8x256xf32>
    %167 = arith.mulf %165, %166 : vector<8x256xf32>
    %168 = arith.addf %162, %167 : vector<8x256xf32>
    %169 = vector.extract_strided_slice %83 {offsets = [0, 6], sizes = [8, 1], strides = [1, 1]} : vector<8x8xf32> to vector<8x1xf32>
    %170 = vector.extract_strided_slice %133 {offsets = [6, 0], sizes = [1, 256], strides = [1, 1]} : vector<8x256xf32> to vector<1x256xf32>
    %171 = vector.broadcast %169 : vector<8x1xf32> to vector<8x256xf32>
    %172 = vector.broadcast %170 : vector<1x256xf32> to vector<8x256xf32>
    %173 = arith.mulf %171, %172 : vector<8x256xf32>
    %174 = arith.addf %168, %173 : vector<8x256xf32>
    %175 = vector.extract_strided_slice %83 {offsets = [0, 7], sizes = [8, 1], strides = [1, 1]} : vector<8x8xf32> to vector<8x1xf32>
    %176 = vector.extract_strided_slice %133 {offsets = [7, 0], sizes = [1, 256], strides = [1, 1]} : vector<8x256xf32> to vector<1x256xf32>
    %177 = vector.broadcast %175 : vector<8x1xf32> to vector<8x256xf32>
    %178 = vector.broadcast %176 : vector<1x256xf32> to vector<8x256xf32>
    %179 = arith.mulf %177, %178 : vector<8x256xf32>
    %180 = arith.addf %174, %179 : vector<8x256xf32>
    %181 = vector.broadcast %84 : vector<8x1xf32> to vector<8x256xf32>
    %182 = arith.addf %180, %181 : vector<8x256xf32>
    %c48 = arith.constant 48 : index
    %c0_18 = arith.constant 0 : index
    %183 = vector.load %arg3[%c48, %c0_18] : memref<120x128xf32, #tpu.memory_space<vmem>>, vector<8x9xf32>
    %c56 = arith.constant 56 : index
    %c0_19 = arith.constant 0 : index
    %184 = vector.load %arg3[%c56, %c0_19] : memref<120x128xf32, #tpu.memory_space<vmem>>, vector<16x8xf32>
    %c72 = arith.constant 72 : index
    %c0_20 = arith.constant 0 : index
    %185 = vector.load %arg3[%c72, %c0_20] : memref<120x128xf32, #tpu.memory_space<vmem>>, vector<16x1xf32>
    %cst_21 = arith.constant 0.000000e+00 : f32
    %186 = vector.broadcast %cst_21 : f32 to vector<8x256xf32>
    %187 = arith.maximumf %182, %186 : vector<8x256xf32>
    %c1_i32_22 = arith.constant 1 : i32
    %188 = tpu.dynamic_rotate %187 by %c1_i32_22 dim 1 : vector<8x256xf32>, i32 -> vector<8x256xf32>
    %189 = vector.broadcast %1 : vector<1x256xf32> to vector<8x256xf32>
    %190 = arith.mulf %188, %189 : vector<8x256xf32>
    %c255_i32_23 = arith.constant 255 : i32
    %191 = tpu.dynamic_rotate %187 by %c255_i32_23 dim 1 : vector<8x256xf32>, i32 -> vector<8x256xf32>
    %192 = vector.broadcast %2 : vector<1x256xf32> to vector<8x256xf32>
    %193 = arith.mulf %191, %192 : vector<8x256xf32>
    %194 = vector.extract_strided_slice %183 {offsets = [0, 3], sizes = [8, 1], strides = [1, 1]} : vector<8x9xf32> to vector<8x1xf32>
    %195 = vector.broadcast %194 : vector<8x1xf32> to vector<8x256xf32>
    %196 = arith.mulf %190, %195 : vector<8x256xf32>
    %197 = vector.extract_strided_slice %183 {offsets = [0, 4], sizes = [8, 1], strides = [1, 1]} : vector<8x9xf32> to vector<8x1xf32>
    %198 = vector.broadcast %197 : vector<8x1xf32> to vector<8x256xf32>
    %199 = arith.mulf %187, %198 : vector<8x256xf32>
    %200 = arith.addf %196, %199 : vector<8x256xf32>
    %201 = vector.extract_strided_slice %183 {offsets = [0, 5], sizes = [8, 1], strides = [1, 1]} : vector<8x9xf32> to vector<8x1xf32>
    %202 = vector.broadcast %201 : vector<8x1xf32> to vector<8x256xf32>
    %203 = arith.mulf %193, %202 : vector<8x256xf32>
    %204 = arith.addf %200, %203 : vector<8x256xf32>
    %205 = vector.extract_strided_slice %183 {offsets = [0, 0], sizes = [8, 1], strides = [1, 1]} : vector<8x9xf32> to vector<8x1xf32>
    %206 = vector.broadcast %205 : vector<8x1xf32> to vector<8x256xf32>
    %207 = arith.mulf %190, %206 : vector<8x256xf32>
    %208 = vector.extract_strided_slice %183 {offsets = [0, 1], sizes = [8, 1], strides = [1, 1]} : vector<8x9xf32> to vector<8x1xf32>
    %209 = vector.broadcast %208 : vector<8x1xf32> to vector<8x256xf32>
    %210 = arith.mulf %187, %209 : vector<8x256xf32>
    %211 = arith.addf %207, %210 : vector<8x256xf32>
    %212 = vector.extract_strided_slice %183 {offsets = [0, 2], sizes = [8, 1], strides = [1, 1]} : vector<8x9xf32> to vector<8x1xf32>
    %213 = vector.broadcast %212 : vector<8x1xf32> to vector<8x256xf32>
    %214 = arith.mulf %193, %213 : vector<8x256xf32>
    %215 = arith.addf %211, %214 : vector<8x256xf32>
    %c16_i32_24 = arith.constant 16 : i32
    %216 = tpu.dynamic_rotate %215 by %c16_i32_24 dim 1 : vector<8x256xf32>, i32 -> vector<8x256xf32>
    %217 = vector.broadcast %3 : vector<1x256xf32> to vector<8x256xf32>
    %218 = arith.mulf %216, %217 : vector<8x256xf32>
    %219 = arith.addf %204, %218 : vector<8x256xf32>
    %220 = vector.extract_strided_slice %183 {offsets = [0, 6], sizes = [8, 1], strides = [1, 1]} : vector<8x9xf32> to vector<8x1xf32>
    %221 = vector.broadcast %220 : vector<8x1xf32> to vector<8x256xf32>
    %222 = arith.mulf %190, %221 : vector<8x256xf32>
    %223 = vector.extract_strided_slice %183 {offsets = [0, 7], sizes = [8, 1], strides = [1, 1]} : vector<8x9xf32> to vector<8x1xf32>
    %224 = vector.broadcast %223 : vector<8x1xf32> to vector<8x256xf32>
    %225 = arith.mulf %187, %224 : vector<8x256xf32>
    %226 = arith.addf %222, %225 : vector<8x256xf32>
    %227 = vector.extract_strided_slice %183 {offsets = [0, 8], sizes = [8, 1], strides = [1, 1]} : vector<8x9xf32> to vector<8x1xf32>
    %228 = vector.broadcast %227 : vector<8x1xf32> to vector<8x256xf32>
    %229 = arith.mulf %193, %228 : vector<8x256xf32>
    %230 = arith.addf %226, %229 : vector<8x256xf32>
    %c240_i32_25 = arith.constant 240 : i32
    %231 = tpu.dynamic_rotate %230 by %c240_i32_25 dim 1 : vector<8x256xf32>, i32 -> vector<8x256xf32>
    %232 = vector.broadcast %4 : vector<1x256xf32> to vector<8x256xf32>
    %233 = arith.mulf %231, %232 : vector<8x256xf32>
    %234 = arith.addf %219, %233 : vector<8x256xf32>
    %235 = vector.extract_strided_slice %184 {offsets = [0, 0], sizes = [16, 1], strides = [1, 1]} : vector<16x8xf32> to vector<16x1xf32>
    %236 = vector.extract_strided_slice %234 {offsets = [0, 0], sizes = [1, 256], strides = [1, 1]} : vector<8x256xf32> to vector<1x256xf32>
    %237 = vector.broadcast %235 : vector<16x1xf32> to vector<16x256xf32>
    %238 = vector.broadcast %236 : vector<1x256xf32> to vector<16x256xf32>
    %239 = arith.mulf %237, %238 : vector<16x256xf32>
    %240 = vector.extract_strided_slice %184 {offsets = [0, 1], sizes = [16, 1], strides = [1, 1]} : vector<16x8xf32> to vector<16x1xf32>
    %241 = vector.extract_strided_slice %234 {offsets = [1, 0], sizes = [1, 256], strides = [1, 1]} : vector<8x256xf32> to vector<1x256xf32>
    %242 = vector.broadcast %240 : vector<16x1xf32> to vector<16x256xf32>
    %243 = vector.broadcast %241 : vector<1x256xf32> to vector<16x256xf32>
    %244 = arith.mulf %242, %243 : vector<16x256xf32>
    %245 = arith.addf %239, %244 : vector<16x256xf32>
    %246 = vector.extract_strided_slice %184 {offsets = [0, 2], sizes = [16, 1], strides = [1, 1]} : vector<16x8xf32> to vector<16x1xf32>
    %247 = vector.extract_strided_slice %234 {offsets = [2, 0], sizes = [1, 256], strides = [1, 1]} : vector<8x256xf32> to vector<1x256xf32>
    %248 = vector.broadcast %246 : vector<16x1xf32> to vector<16x256xf32>
    %249 = vector.broadcast %247 : vector<1x256xf32> to vector<16x256xf32>
    %250 = arith.mulf %248, %249 : vector<16x256xf32>
    %251 = arith.addf %245, %250 : vector<16x256xf32>
    %252 = vector.extract_strided_slice %184 {offsets = [0, 3], sizes = [16, 1], strides = [1, 1]} : vector<16x8xf32> to vector<16x1xf32>
    %253 = vector.extract_strided_slice %234 {offsets = [3, 0], sizes = [1, 256], strides = [1, 1]} : vector<8x256xf32> to vector<1x256xf32>
    %254 = vector.broadcast %252 : vector<16x1xf32> to vector<16x256xf32>
    %255 = vector.broadcast %253 : vector<1x256xf32> to vector<16x256xf32>
    %256 = arith.mulf %254, %255 : vector<16x256xf32>
    %257 = arith.addf %251, %256 : vector<16x256xf32>
    %258 = vector.extract_strided_slice %184 {offsets = [0, 4], sizes = [16, 1], strides = [1, 1]} : vector<16x8xf32> to vector<16x1xf32>
    %259 = vector.extract_strided_slice %234 {offsets = [4, 0], sizes = [1, 256], strides = [1, 1]} : vector<8x256xf32> to vector<1x256xf32>
    %260 = vector.broadcast %258 : vector<16x1xf32> to vector<16x256xf32>
    %261 = vector.broadcast %259 : vector<1x256xf32> to vector<16x256xf32>
    %262 = arith.mulf %260, %261 : vector<16x256xf32>
    %263 = arith.addf %257, %262 : vector<16x256xf32>
    %264 = vector.extract_strided_slice %184 {offsets = [0, 5], sizes = [16, 1], strides = [1, 1]} : vector<16x8xf32> to vector<16x1xf32>
    %265 = vector.extract_strided_slice %234 {offsets = [5, 0], sizes = [1, 256], strides = [1, 1]} : vector<8x256xf32> to vector<1x256xf32>
    %266 = vector.broadcast %264 : vector<16x1xf32> to vector<16x256xf32>
    %267 = vector.broadcast %265 : vector<1x256xf32> to vector<16x256xf32>
    %268 = arith.mulf %266, %267 : vector<16x256xf32>
    %269 = arith.addf %263, %268 : vector<16x256xf32>
    %270 = vector.extract_strided_slice %184 {offsets = [0, 6], sizes = [16, 1], strides = [1, 1]} : vector<16x8xf32> to vector<16x1xf32>
    %271 = vector.extract_strided_slice %234 {offsets = [6, 0], sizes = [1, 256], strides = [1, 1]} : vector<8x256xf32> to vector<1x256xf32>
    %272 = vector.broadcast %270 : vector<16x1xf32> to vector<16x256xf32>
    %273 = vector.broadcast %271 : vector<1x256xf32> to vector<16x256xf32>
    %274 = arith.mulf %272, %273 : vector<16x256xf32>
    %275 = arith.addf %269, %274 : vector<16x256xf32>
    %276 = vector.extract_strided_slice %184 {offsets = [0, 7], sizes = [16, 1], strides = [1, 1]} : vector<16x8xf32> to vector<16x1xf32>
    %277 = vector.extract_strided_slice %234 {offsets = [7, 0], sizes = [1, 256], strides = [1, 1]} : vector<8x256xf32> to vector<1x256xf32>
    %278 = vector.broadcast %276 : vector<16x1xf32> to vector<16x256xf32>
    %279 = vector.broadcast %277 : vector<1x256xf32> to vector<16x256xf32>
    %280 = arith.mulf %278, %279 : vector<16x256xf32>
    %281 = arith.addf %275, %280 : vector<16x256xf32>
    %282 = vector.broadcast %185 : vector<16x1xf32> to vector<16x256xf32>
    %283 = arith.addf %281, %282 : vector<16x256xf32>
    %c88 = arith.constant 88 : index
    %c0_26 = arith.constant 0 : index
    %284 = vector.load %arg3[%c88, %c0_26] : memref<120x128xf32, #tpu.memory_space<vmem>>, vector<16x4xf32>
    %c104 = arith.constant 104 : index
    %c0_27 = arith.constant 0 : index
    %285 = vector.load %arg3[%c104, %c0_27] : memref<120x128xf32, #tpu.memory_space<vmem>>, vector<16x1xf32>
    %286 = vector.extract_strided_slice %284 {offsets = [0, 0], sizes = [16, 1], strides = [1, 1]} : vector<16x4xf32> to vector<16x1xf32>
    %287 = vector.extract_strided_slice %0 {offsets = [0, 0], sizes = [1, 256], strides = [1, 1]} : vector<4x256xf32> to vector<1x256xf32>
    %288 = vector.broadcast %286 : vector<16x1xf32> to vector<16x256xf32>
    %289 = vector.broadcast %287 : vector<1x256xf32> to vector<16x256xf32>
    %290 = arith.mulf %288, %289 : vector<16x256xf32>
    %291 = vector.extract_strided_slice %284 {offsets = [0, 1], sizes = [16, 1], strides = [1, 1]} : vector<16x4xf32> to vector<16x1xf32>
    %292 = vector.extract_strided_slice %0 {offsets = [1, 0], sizes = [1, 256], strides = [1, 1]} : vector<4x256xf32> to vector<1x256xf32>
    %293 = vector.broadcast %291 : vector<16x1xf32> to vector<16x256xf32>
    %294 = vector.broadcast %292 : vector<1x256xf32> to vector<16x256xf32>
    %295 = arith.mulf %293, %294 : vector<16x256xf32>
    %296 = arith.addf %290, %295 : vector<16x256xf32>
    %297 = vector.extract_strided_slice %284 {offsets = [0, 2], sizes = [16, 1], strides = [1, 1]} : vector<16x4xf32> to vector<16x1xf32>
    %298 = vector.extract_strided_slice %0 {offsets = [2, 0], sizes = [1, 256], strides = [1, 1]} : vector<4x256xf32> to vector<1x256xf32>
    %299 = vector.broadcast %297 : vector<16x1xf32> to vector<16x256xf32>
    %300 = vector.broadcast %298 : vector<1x256xf32> to vector<16x256xf32>
    %301 = arith.mulf %299, %300 : vector<16x256xf32>
    %302 = arith.addf %296, %301 : vector<16x256xf32>
    %303 = vector.extract_strided_slice %284 {offsets = [0, 3], sizes = [16, 1], strides = [1, 1]} : vector<16x4xf32> to vector<16x1xf32>
    %304 = vector.extract_strided_slice %0 {offsets = [3, 0], sizes = [1, 256], strides = [1, 1]} : vector<4x256xf32> to vector<1x256xf32>
    %305 = vector.broadcast %303 : vector<16x1xf32> to vector<16x256xf32>
    %306 = vector.broadcast %304 : vector<1x256xf32> to vector<16x256xf32>
    %307 = arith.mulf %305, %306 : vector<16x256xf32>
    %308 = arith.addf %302, %307 : vector<16x256xf32>
    %309 = vector.broadcast %285 : vector<16x1xf32> to vector<16x256xf32>
    %310 = arith.addf %308, %309 : vector<16x256xf32>
    %311 = arith.addf %283, %310 : vector<16x256xf32>
    %c0_28 = arith.constant 0 : index
    %c0_29 = arith.constant 0 : index
    %312 = vector.load %arg4[%c0_28, %c0_29] : memref<16x256xf32, #tpu.memory_space<vmem>>, vector<16x256xf32>
    tpu.vector_store %arg4[%c0_28, %c0_29], %311 {strides = array<i32>} : memref<16x256xf32, #tpu.memory_space<vmem>>, vector<16x256xf32>,
    return
  }
  func.func @transform_0(%arg0: i32) -> (i32, i32) {
    %c0_i32 = arith.constant 0 : i32
    %c0_i32_0 = arith.constant 0 : i32
    return %c0_i32, %arg0 : i32, i32
  }
  func.func @transform_1(%arg0: i32) -> (i32, i32) {
    %c0_i32 = arith.constant 0 : i32
    %c0_i32_0 = arith.constant 0 : i32
    %c0_i32_1 = arith.constant 0 : i32
    return %c0_i32, %c0_i32_0 : i32, i32
  }
  func.func @transform_2(%arg0: i32) -> (i32, i32) {
    %c0_i32 = arith.constant 0 : i32
    %c0_i32_0 = arith.constant 0 : i32
    %c0_i32_1 = arith.constant 0 : i32
    return %c0_i32, %c0_i32_0 : i32, i32
  }
  func.func @transform_3(%arg0: i32) -> (i32, i32) {
    %c0_i32 = arith.constant 0 : i32
    %c0_i32_0 = arith.constant 0 : i32
    return %c0_i32, %arg0 : i32, i32
  }
}

</mosaic_0001>

<bundles_post_ra>
// kernel: tpu_custom_call.1
= control target key start
LH: loop header
LB: loop body
LE: loop exit
PB: predicated region body
PF: predicated region fallthrough
CT: control target
= control target key end

     0   :  { %8 = vsyncpa [#allocation3], 0  ;;  %s2310_s0 = inlined_call_operand.hbm [shape: f32[4,512], index: 0, kind: input, shape index: {}]   ;;  %s2311_s1 = inlined_call_operand.hbm [shape: f32[4,256], index: 1, kind: input, shape index: {}]   ;;  %s2312_s2 = inlined_call_operand.hbm [shape: f32[120,128], index: 2, kind: input, shape index: {}]   ;;  %s2313_s3 = inlined_call_operand.hbm [shape: f32[16,512], index: 3, kind: output, shape index: {}]  }
   0x1   :  { %10 = vsyncpa [#allocation3 + $0x1], 0 }
   0x2   :  { %11 = vsyncpa [#allocation6], 0 }
   0x3   :  { %12 = vsyncpa [#allocation4], 0 }
   0x4   :  { %14 = vsyncpa [#allocation4 + $0x1], 0  ;;  %s1660_s12 = smov 0   ;;  %s1662_s13 = smov 0  }
   0x5   :  { %s1664_s14 = smov 0   ;;  %s1666_s15 = smov 0  }
   0x6 LB: > { %s1681_s16 = sadd.s32 4294967295, %s1616_s15   ;;  %s1304_s17 = sadd.s32 4294967294, %s1616_s15   ;;  %s1616_s15 = sphi %s1666_s15, %s2335_s15   ;;  %s1612_s14 = sphi %s1664_s14, %s2334_s14   ;;  %s1608_s13 = sphi %s1662_s13, %s2333_s13   ;;  %s1604_s12 = sphi %s1660_s12, %s2332_s12  }
   0x7   : > { %p40_p0 = scmp.ne.s32.totalorder %s1608_s13, %s1604_s12  ;;  %p2314_p1 = scmp.eq.s32.totalorder %s1681_s16, 0 }
   0x8   : > { %p112_p3 = scmp.eq.s32.totalorder %s1304_s17, 1  ;;  %p1305_p5 = scmp.ge.s32.totalorder %s1616_s15, 1 }
   0x9   : > { %p1690_p4 = por %p2314_p1, %p40_p0  ;;  %p119_p7 = scmp.lt.s32.totalorder %s1616_s15, 3 }
   0xa   : > { %p1695_p6 = por %p112_p3, %p40_p0  ;;  %s1618_s21 = smov [#allocation5]  }
   0xb   : > { %s2318_s18 = scalar_select %p1690_p4, 1, 0 }
   0xc   : > { %s2319_s19 = scalar_select %p1695_p6, 1, 0 }
   0xd   : > { %p1700_p8 = pnand %p1305_p5, %p119_p7  ;;  %s132_s22 = sshll.u32 %s1618_s21, 4  ;;  %s133_s22 = int_to_ptr.vmem [resolvable:$true] %s132_s22 }
   0xe   : > { %s1619_s23 = smov [#allocation7]   ;;  %s1479_s26 = scalar_lea.vmem %s133_s22, 128 }
   0xf   : > { %s2320_s20 = scalar_select %p1700_p8, 1, 0 }
  0x10   : > { %p1336_p10 = pneg %p1700_p8  ;;  %s142_s24 = sshll.u32 %s1619_s23, 4  ;;  %s143_s24 = int_to_ptr.vmem [resolvable:$true] %s142_s24 }
  0x11   : > { %p1480_p13 = scmp.ne.s32.totalorder %s133_s22, %s1479_s26  ;;  %p1487_p5 = scmp.lt.s32.totalorder %s133_s22, %s133_s22 }
  0x12   : > { %p1709_p11 = pnand %p1336_p10, %p2314_p1  ;;  %p1488_p7 = scmp.lt.s32.totalorder %s1479_s26, %s1479_s26 }
  0x14   : > { %p1470_p12 = pneg %p1709_p11  ;;  %p1489_p9 = por %p1488_p7, %p1487_p5 }
  0x16   : > { %p1482_p0 = pnand %p1480_p13, %p1470_p12 }
  0x18   : > { %p1483_p3 = pneg %p1482_p0 }
  0x1a   : > { %p1490_p2 = pnand %p1489_p9, %p1483_p3 }
  0x1c   : > { %1493 = shalt.err (!%p1490_p2)
}
  0x1d   : > { %1339 = dma.hbm_to_vmem [thread:$0]  (!%p1709_p11), %s2311_s1, 128, %s133_s22, [#allocation6]  }
  0x1e   : > { %s1505_s29 = scalar_lea.vmem %s143_s24, 1920  ;;  %p1513_p13 = scmp.lt.s32.totalorder %s143_s24, %s143_s24 }
  0x1f   : > { %p1506_p10 = scmp.ne.s32.totalorder %s143_s24, %s1505_s29  ;;  %p1514_p0 = scmp.lt.s32.totalorder %s1505_s29, %s1505_s29 }
  0x21   : > { %p1508_p1 = pnand %p1506_p10, %p1470_p12  ;;  %p1515_p4 = por %p1514_p0, %p1513_p13 }
  0x23   : > { %p1509_p6 = pneg %p1508_p1 }
  0x25   : > { %p1516_p8 = pnand %p1515_p4, %p1509_p6 }
  0x27   : > { %1519 = shalt.err (!%p1516_p8)
}
  0x28   : > { %s1620_s30 = smov 128   ;;  %s1621_s4 = smov 8  }
  0x29   : > { %1342 = dma.hbm_to_vmem [thread:$0]  (!%p1709_p11), %s2312_s2, 1920, %s143_s24, [#allocation6], %s1620_s30, %s1620_s30, %s1621_s4  }
  0x2a   : > { %s1732_s7 = sadd.s32 1, %s1616_s15   ;;  %s27_s8 = sadd.s32 1, %s1612_s14 }
  0x2b   : > { %s24_s9 = ssub.s32 %s1616_s15, %s1732_s7  ;;  %p34_p1 = scmp.ne.s32.totalorder %s1612_s14, %s1608_s13 }
  0x2c   : > { %p25_p2 = scmp.eq.s32.totalorder %s24_s9, 0  ;;  %p35_p4 = scmp.eq.s32.totalorder %s1616_s15, 0 }
  0x2d   : > { %p2322_p6 = scmp.eq.s32.totalorder %s1681_s16, 1  ;;  %p1353_p9 = scmp.lt.s32.totalorder %s1616_s15, 2 }
  0x2e   : > { %s1748_s11 = scalar_select %p25_p2, %s1612_s14, %s27_s8  }
  0x2f   : > { %p1742_p8 = por %p2322_p6, %p34_p1  ;;  %p36_p12 = por %p35_p4, %p34_p1 }
  0x30   : > { %s156_s17 = sand.u32 1, %s1612_s14   ;;  %s1322_s22 = sshll.u32 %s1616_s15, 7 }
  0x31   : > { %s2323_s10 = scalar_select %p1742_p8, 1, 0 }
  0x32   : > { %s1309_s21 = sshll.u32 %s156_s17, 3  ;;  %s1755_s25 = scalar_lea.hbm %s2310_s0, %s1322_s22 }
  0x33   : > { %s160_s26 = scalar_lea.vmem [#allocation2], %s1309_s21  ;;  %p1757_p11 = pnand %p1353_p9, %p36_p12 }
  0x34   : > { %s168_s27 = sshll.u32 %s160_s26, 4  ;;  %s157_s29 = scalar_lea.sflag [#allocation3], %s156_s17  ;;  %s169_s27 = int_to_ptr.vmem [resolvable:$true] %s168_s27 }
  0x35   : > { %s1520_s30 = scalar_lea.hbm %s1755_s25, 128  ;;  %p1522_p5 = pneg %p1757_p11 }
  0x36   : > { %p1521_p3 = scmp.ne.s32.totalorder %s1755_s25, %s1520_s30  ;;  %s1525_s6 = scalar_lea.hbm %s2310_s0, 256 }
  0x37   : > { %p1526_p13 = scmp.lt.s32.totalorder %s1755_s25, %s2310_s0  ;;  %p1527_p0 = scmp.lt.s32.totalorder %s1525_s6, %s1520_s30 }
  0x38   : > { %p1523_p7 = pnand %p1522_p5, %p1521_p3 }
  0x39   : > { %p1528_p1 = por %p1527_p0, %p1526_p13 }
  0x3a   : > { %p1524_p10 = pneg %p1523_p7 }
  0x3c   : > { %p1529_p2 = pnand %p1528_p1, %p1524_p10 }
  0x3e   : > { %1532 = shalt.err (!%p1529_p2)
}
  0x3f   : > { %s1533_s21 = scalar_lea.vmem %s169_s27, 128  ;;  %s1622_s17 = smov [#allocation2]  }
  0x40   : > { %p1534_p4 = scmp.ne.s32.totalorder %s169_s27, %s1533_s21  ;;  %s1538_s22 = sshll.u32 %s1622_s17, 4  ;;  %s1539_s22 = int_to_ptr.vmem [resolvable:$false] %s1538_s22 }
  0x41   : > { %s1540_s23 = scalar_lea.vmem %s1539_s22, 256  ;;  %p1541_p12 = scmp.lt.s32.totalorder %s169_s27, %s1539_s22 }
  0x42   : > { %p1536_p6 = pnand %p1534_p4, %p1522_p5  ;;  %p1542_p3 = scmp.lt.s32.totalorder %s1540_s23, %s1533_s21 }
  0x44   : > { %p1537_p9 = pneg %p1536_p6  ;;  %p1543_p7 = por %p1542_p3, %p1541_p12 }
  0x46   : > { %p1544_p8 = pnand %p1543_p7, %p1537_p9 }
  0x48   : > { %1547 = shalt.err (!%p1544_p8)
}
  0x49   : > { %1346 = dma.hbm_to_vmem [thread:$0]  (!%p1757_p11), %s1755_s25, 128, %s169_s27, %s157_s29  }
  0x4a   : > { %p2325_p10 = scmp.ne.s32.totalorder %s2320_s20, 0 }
  0x4b   : > { %s1778_s24 = sand.u32 (!%p2325_p10), 1, %s1608_s13   ;;  %p2326_p5 = scmp.ne.s32.totalorder (!%p2325_p10), %s2318_s18, 0 }
  0x4c   : > { %177 = sbr.rel (%p2325_p10) target bundleno = 970 (0x3ca), region = 32  ;;  %s1313_s26 = sshll.u32 (!%p2325_p10), %s1778_s24, 3 }
  0x4d   : > { %s180_s30 = scalar_lea.sflag (!%p2325_p10), [#allocation3], %s1778_s24  ;;  %s1782_s4 = scalar_lea.vmem (!%p2325_p10), [#allocation2], %s1313_s26 }
  0x51   : > { %1591 = dma.done.wait (%p2326_p5), %s180_s30, 128  }
  0x52   : > { %1593 = vsyncadd (%p2326_p5), %s180_s30, 4294967168  ;;  %p2327_p8 = scmp.eq.s32.totalorder %s1681_s16, 0 }
  0x54   : > { %1595 = dma.done.wait (%p2327_p8), [#allocation6], 2048   ;;  %p2328_p11 = pmov %p2327_p8 }
  0x55   : > { %v1623_v0 = vmov 0   ;;  %v1624_v1 = vmov 1   ;;  %v224_v2 = vld [vmem:[#allocation7] sm:$0xf]  ;;  %v1795_v3 = vld [vmem:[%s1782_s4] sm:$0xff]  ;;  %v1625_v4 = vmov 6   ;;  %v235_v14 = vlaneseq }
  0x56   : > { %1597 = vsyncadd (%p2328_p11), [#allocation6], 4294965248  ;;  %1411 = vset.pattern.permute.xlu1 %v1623_v0  ;;  %1409 = vset.pattern.permute.xlu0 %v1624_v1  ;;  %v1626_v5 = vmov 7   ;;  %v1800_v6 = vmax.f32 %v1795_v3, 0.0  ;;  %s1627_s18 = smov 1   ;;  %v1628_v7 = vmov 2  }
  0x57   : > { %306 = vperm.xlu1 %1411, %v224_v2   ;;  %312 = vperm.xlu0 %1409, %v224_v2   ;;  %v1629_v9 = vmov 8   ;;  %s1630_s20 = smov 127   ;;  %v1631_v10 = vmov 4   ;;  %v1632_v11 = vmov 3   ;;  %v1633_v12 = vmov 5   ;;  %v1816_v13 = vld [vmem:[#allocation7 + $0x8] sm:$0xff] }
  0x58   : > { %v229_v8 = vcombine.high %v1800_v6, %v1800_v6  ;;  %v1634_v15 = vmov 839922192   ;;  %v1821_v19 = vshrl.u32 %v235_v14, 7  ;;  %v1830_v26 = vand.u32 127, %v235_v14  ;;  %s1635_s25 = smov 16   ;;  %s1636_s27 = smov 112  }
  0x59   : > { %v284_v16 = vunpack.c.l.s4 %v1634_v15  ;;  %v217_v27 = vld [vmem:[#allocation5] ss:$4 sm:$0x3]  ;;  %v219_v33 = vld [vmem:[#allocation5 + $0x1] ss:$4 sm:$0x3] }
  0x5a   : > { %v1825_v24 = vsub.s32 0, %v1821_v19  ;;  %v1828_v25 = vsub.s32 1, %v1821_v19  ;;  %vm237_vm0 = vcmp.lt.s32.totalorder %v1830_v26, 1  ;;  %vm257_vm1 = vcmp.lt.s32.totalorder %v1830_v26, 127  ;;  %s1316_s28 = sshll.u32 %s1778_s24, 5  ;;  %s1323_s6 = sshll.u32 %s1681_s16, 8 }
  0x5b   : > { %1413 = vset.pattern.permute.xlu1 %v1625_v4  ;;  %1410 = vset.pattern.permute.xlu0 %v1626_v5  ;;  %v285_v20 = vunpack.c.0.s8 %v284_v16  ;;  %vm340_vm2 = vcmp.lt.s32.totalorder %v1830_v26, 16  ;;  %vm393_vm3 = vcmp.lt.s32.totalorder %v1830_v26, 112  ;;  %s213_s29 = scalar_lea.vmem [#allocation8], %s1316_s28  ;;  %s2266_s21 = scalar_lea.hbm %s2313_s3, %s1323_s6 }
  0x5c   : > { %359 = vperm.xlu1 %1413, %v224_v2   ;;  %365 = vperm.xlu0 %1410, %v224_v2   ;;  %v1834_v31 = vrot.slane %v217_v27, %v1825_v24  ;;  %v1837_v32 = vrot.slane %v217_v27, %v1828_v25  ;;  %v1848_v42 = vrot.slane %v219_v33, %v1825_v24  ;;  %s1212_s5 = sshll.u32 %s213_s29, 4  ;;  %s1199_s16 = scalar_lea.sflag [#allocation4], %s1778_s24  ;;  %s2261_s5 = int_to_ptr.vmem [resolvable:$true] %s1212_s5 }
  0x5d   : > { %v288_v23 = vsub.s32 %v285_v20, %v1821_v19  ;;  %v1851_v43 = vrot.slane %v219_v33, %v1828_v25  ;;  %s1548_s17 = scalar_lea.vmem %s2261_s5, 512  ;;  %p2329_p0 = scmp.ne.s32.totalorder %s2323_s10, 0 }
  0x5e   : > { %p1549_p13 = scmp.ne.s32.totalorder %s2261_s5, %s1548_s17  ;;  %s1637_s22 = smov [#allocation8]  }
  0x5f   : > { %s1552_s23 = sshll.u32 %s1637_s22, 4  ;;  %s1553_s23 = int_to_ptr.vmem [resolvable:$false] %s1552_s23 }
  0x60   : > { %231 = vrot.lane.b32.xlu1 %v1800_v6, %s1627_s18  ;;  %1412 = vset.pattern.permute.xlu0 %v1628_v7  ;;  %p1550_p1 = pnand %p1549_p13, %p2329_p0  ;;  %s1554_s26 = scalar_lea.vmem %s1553_s23, 1024 }
  0x61   : > { %329 = vperm.xlu0 %1412, %v224_v2   ;;  %1414 = vset.pattern.permute.xlu1 %v1629_v9  ;;  %p1555_p4 = scmp.lt.s32.totalorder %s2261_s5, %s1553_s23  ;;  %p1556_p6 = scmp.lt.s32.totalorder %s1554_s26, %s1548_s17 }
  0x62   : > { %p1551_p2 = pneg %p1550_p1 }
  0x63   : > { %p1557_p9 = por %p1556_p6, %p1555_p4 }
  0x64   : > { %233 = vrot.lane.b32.xlu1 %v229_v8, %s1627_s18 }
  0x65   : > { %255 = vrot.lane.b32.xlu0 %v229_v8, %s1630_s20  ;;  %p1558_p12 = pnand %p1557_p9, %p1551_p2 }
  0x66   : > { %1415 = vset.pattern.permute.xlu0 %v1631_v10 }
  0x68   : > { %253 = vrot.lane.b32.xlu1 %v1800_v6, %s1630_s20 }
  0x69   : > { %281 = vperm.xlu0 %1415, %v224_v2  }
  0x6c   : > { %382 = vperm.xlu1 %1414, %v224_v2  }
  0x6d   : > { %1418 = vset.pattern.permute.xlu0 %v1623_v0 }
  0x70   : > { %1416 = vset.pattern.permute.xlu1 %v1632_v11 }
  0x71   : > { %275 = vperm.xlu1 %1416, %v224_v2  }
  0x75   : > { %1417 = vset.pattern.permute.xlu1 %v1633_v12 }
  0x76   : > { %298 = vperm.xlu1 %1417, %v224_v2  }
  0x7a   : > { %1419 = vset.pattern.permute.xlu1 %v1624_v1 }
  0x7b   : > { %427 = vperm.xlu1 %1419, %v1816_v13  }
  0x7f   : > { %1420 = vset.pattern.permute.xlu1 %v1628_v7 }
  0xd2   : > { %v307_v17 = vpop.permute.xlu1 %306  ;;  %v313_v18 = vpop.permute.xlu0 %312 }
  0xd3   : > { %v320_v29 = vrot.slane %v313_v18, %v288_v23 }
  0xd5   : > { %v322_v35 = vmul.f32 %v320_v29, %v1800_v6 }
  0xd7   : > { %v360_v21 = vpop.permute.xlu1 %359  ;;  %v366_v22 = vpop.permute.xlu0 %365  ;;  %v324_v47 = vcombine.high %v322_v35, %v322_v35 }
  0xd8   : > { %v373_v36 = vrot.slane %v366_v22, %v288_v23 }
  0xda   : > { %v375_v48 = vmul.f32 %v373_v36, %v1800_v6  ;;  %v226_v36 = vld [vmem:[#allocation7 + $0x10] sm:$0xff] }
  0xdb   : > { %v232_v28 = vpop.permute.xlu1 %231 }
  0xdc   : > { %v330_v30 = vpop.permute.xlu0 %329  ;;  %v377_v63 = vcombine.high %v375_v48, %v375_v48 }
  0xdf   : > { %v234_v34 = vpop.permute.xlu1 %233 }
  0xe0   : > { %v238_v37 = vsel %vm237_vm0, %v232_v28, %v234_v34  ;;  %v239_v38 = vsel %vm237_vm0, %v234_v34, %v232_v28  ;;  %v256_v39 = vpop.permute.xlu0 %255 }
  0xe1   : > { %v251_v40 = vmul.f32 %v1834_v31, %v239_v38  ;;  %v252_v41 = vmul.f32 %v1837_v32, %v238_v37  ;;  %v1870_v37 = vld [vmem:[#allocation7 + $0x18] sm:$0xff] }
  0xe2   : > { %v221_v38 = vld [vmem:[#allocation5 + $0x2] ss:$4 sm:$0x3] }
  0xe3   : > { %v254_v44 = vpop.permute.xlu1 %253  ;;  %v310_v45 = vmul.f32 %v307_v17, %v252_v41  ;;  %v309_v46 = vmul.f32 %v307_v17, %v251_v40  ;;  %v363_v56 = vmul.f32 %v360_v21, %v252_v41  ;;  %v362_v57 = vmul.f32 %v360_v21, %v251_v40 }
  0xe4   : > { %v258_v49 = vsel %vm257_vm1, %v254_v44, %v256_v39  ;;  %v259_v50 = vsel %vm257_vm1, %v256_v39, %v254_v44  ;;  %v282_v51 = vpop.permute.xlu0 %281  ;;  %v223_v39 = vld [vmem:[#allocation5 + $0x3] ss:$4 sm:$0x3]  ;;  %v1888_v44 = vrot.slane %v221_v38, %v1828_v25 }
  0xe5   : > { %v271_v52 = vmul.f32 %v1848_v42, %v258_v49  ;;  %v272_v53 = vmul.f32 %v1851_v43, %v259_v50  ;;  %v289_v54 = vrot.slane %v282_v51, %v288_v23  ;;  %v327_v55 = vadd.f32 %v324_v47, %v310_v45 }
  0xe6   : > { %v326_v61 = vadd.f32 %v322_v35, %v309_v46  ;;  %v380_v17 = vadd.f32 %v377_v63, %v363_v56  ;;  %v379_v18 = vadd.f32 %v375_v48, %v362_v57  ;;  %v1896_v48 = vrot.slane %v223_v39, %v1825_v24 }
  0xe7   : > { %v383_v58 = vpop.permute.xlu1 %382  ;;  %v291_v59 = vmul.f32 %v289_v54, %v1800_v6  ;;  %v333_v60 = vmul.f32 %v330_v30, %v272_v53  ;;  %v332_v62 = vmul.f32 %v330_v30, %v271_v52  ;;  %v1899_v49 = vrot.slane %v223_v39, %v1828_v25 }
  0xe8   : > { %v385_v2 = vmul.f32 %v383_v58, %v271_v52  ;;  %v386_v8 = vmul.f32 %v383_v58, %v272_v53 }
  0xe9   : > { %v335_v14 = vadd.f32 %v333_v60, %v327_v55  ;;  %v334_v15 = vadd.f32 %v332_v62, %v326_v61  ;;  %v293_v16 = vcombine.high %v291_v59, %v291_v59  ;;  %v1910_v62 = vsub.s32 2, %v1821_v19 }
  0xea   : > { %v388_v6 = vadd.f32 %v386_v8, %v380_v17  ;;  %v387_v23 = vadd.f32 %v385_v2, %v379_v18 }
  0xeb   : > { %338 = vrot.lane.b32.xlu1 %v335_v14, %s1635_s25  ;;  %336 = vrot.lane.b32.xlu0 %v334_v15, %s1635_s25 }
  0xec   : > { %v276_v20 = vpop.permute.xlu1 %275 }
  0xed   : > { %v278_v21 = vmul.f32 %v276_v20, %v251_v40  ;;  %v279_v22 = vmul.f32 %v276_v20, %v252_v41  ;;  %v1885_v41 = vrot.slane %v221_v38, %v1825_v24  ;;  %v1919_v20 = vsub.s32 3, %v1821_v19 }
  0xef   : > { %v295_v27 = vadd.f32 %v291_v59, %v278_v21  ;;  %v296_v28 = vadd.f32 %v293_v16, %v279_v22  ;;  %391 = vrot.lane.b32.xlu1 %v388_v6, %s1636_s27  ;;  %389 = vrot.lane.b32.xlu0 %v387_v23, %s1636_s27 }
  0xf1   : > { %v299_v29 = vpop.permute.xlu1 %298 }
  0xf2   : > { %v301_v30 = vmul.f32 %v299_v29, %v271_v52  ;;  %v302_v33 = vmul.f32 %v299_v29, %v272_v53 }
  0xf3   : > { %443 = vperm.xlu1 %1420, %v1816_v13   ;;  %413 = vperm.xlu0 %1418, %v1816_v13  }
  0xf4   : > { %v303_v34 = vadd.f32 %v301_v30, %v295_v27  ;;  %v304_v35 = vadd.f32 %v302_v33, %v296_v28 }
  0xf7   : > { %1422 = vset.pattern.permute.xlu1 %v1623_v0  ;;  %1421 = vset.pattern.permute.xlu0 %v1632_v11 }
  0xf8   : > { %476 = vperm.xlu1 %1422, %v226_v36   ;;  %459 = vperm.xlu0 %1421, %v1816_v13   ;;  %v428_v13 = vpop.permute.xlu1 %427 }
  0xfc   : > { %526 = vperm.xlu1 %1422, %v1870_v37   ;;  %1423 = vset.pattern.permute.xlu0 %v1624_v1 }
  0xfd   : > { %532 = vperm.xlu0 %1423, %v1870_v37  }
 0x100   : > { %1425 = vset.pattern.permute.xlu1 %v1625_v4 }
 0x101   : > { %558 = vperm.xlu1 %1425, %v1870_v37   ;;  %1424 = vset.pattern.permute.xlu0 %v1628_v7 }
 0x102   : > { %540 = vperm.xlu0 %1424, %v1870_v37  }
 0x105   : > { %1426 = vset.pattern.permute.xlu1 %v1626_v5 }
 0x106   : > { %564 = vperm.xlu1 %1426, %v1870_v37   ;;  %1427 = vset.pattern.permute.xlu0 %v1629_v9 }
 0x10a   : > { %1428 = vset.pattern.permute.xlu1 %v1632_v11 }
 0x15d   : > { %v337_v40 = vpop.permute.xlu0 %336  ;;  %v339_v45 = vpop.permute.xlu1 %338 }
 0x15e   : > { %v341_v46 = vsel %vm340_vm2, %v337_v40, %v339_v45  ;;  %v342_v47 = vsel %vm340_vm2, %v339_v45, %v337_v40 }
 0x15f   : > { %v354_v50 = vmul.f32 %v1885_v41, %v342_v47  ;;  %v355_v51 = vmul.f32 %v1888_v44, %v341_v46 }
 0x161   : > { %v390_v52 = vpop.permute.xlu0 %389  ;;  %v392_v53 = vpop.permute.xlu1 %391  ;;  %v356_v58 = vadd.f32 %v354_v50, %v303_v34  ;;  %v357_v59 = vadd.f32 %v355_v51, %v304_v35 }
 0x162   : > { %v394_v54 = vsel %vm393_vm3, %v390_v52, %v392_v53  ;;  %v395_v55 = vsel %vm393_vm3, %v392_v53, %v390_v52  ;;  %v1939_v53 = vld [vmem:[#allocation7 + $0x20] sm:$0xff] }
 0x163   : > { %v407_v56 = vmul.f32 %v1896_v48, %v394_v54  ;;  %v408_v57 = vmul.f32 %v1899_v49, %v395_v55 }
 0x165   : > { %v409_v60 = vadd.f32 %v407_v56, %v356_v58  ;;  %v410_v61 = vadd.f32 %v408_v57, %v357_v59 }
 0x167   : > { %v433_v63 = vrot.slane %v409_v60, %v1828_v25  ;;  %v437_v2 = vrot.slane %v410_v61, %v1828_v25  ;;  %v419_v8 = vrot.slane %v409_v60, %v1825_v24  ;;  %v423_v14 = vrot.slane %v410_v61, %v1825_v24 }
 0x168   : > { %v449_v16 = vrot.slane %v409_v60, %v1910_v62  ;;  %v453_v17 = vrot.slane %v410_v61, %v1910_v62  ;;  %v465_v33 = vrot.slane %v409_v60, %v1919_v20  ;;  %v469_v34 = vrot.slane %v410_v61, %v1919_v20 }
 0x169   : > { %v438_v6 = vmul.f32 %v433_v63, %v428_v13  ;;  %v439_v23 = vmul.f32 %v437_v2, %v428_v13 }
 0x16e   : > { %v414_v15 = vpop.permute.xlu0 %413  ;;  %v444_v18 = vpop.permute.xlu1 %443 }
 0x16f   : > { %v424_v21 = vmul.f32 %v419_v8, %v414_v15  ;;  %v425_v22 = vmul.f32 %v423_v14, %v414_v15  ;;  %v454_v29 = vmul.f32 %v449_v16, %v444_v18  ;;  %v455_v30 = vmul.f32 %v453_v17, %v444_v18 }
 0x171   : > { %v440_v27 = vadd.f32 %v438_v6, %v424_v21  ;;  %v441_v28 = vadd.f32 %v439_v23, %v425_v22 }
 0x173   : > { %v456_v35 = vadd.f32 %v454_v29, %v440_v27  ;;  %v457_v36 = vadd.f32 %v455_v30, %v441_v28  ;;  %v460_v38 = vpop.permute.xlu0 %459  ;;  %v477_v47 = vpop.permute.xlu1 %476 }
 0x174   : > { %v470_v39 = vmul.f32 %v465_v33, %v460_v38  ;;  %v471_v40 = vmul.f32 %v469_v34, %v460_v38 }
 0x176   : > { %v472_v45 = vadd.f32 %v470_v39, %v456_v35  ;;  %v473_v46 = vadd.f32 %v471_v40, %v457_v36 }
 0x177   : > { %v527_v54 = vpop.permute.xlu1 %526 }
 0x178   : > { %v479_v50 = vadd.f32 %v477_v47, %v472_v45  ;;  %v480_v51 = vadd.f32 %v477_v47, %v473_v46  ;;  %v533_v57 = vpop.permute.xlu0 %532 }
 0x17a   : > { %v1923_v52 = vmax.f32 %v479_v50, 0.0  ;;  %v1929_v13 = vmax.f32 %v480_v51, 0.0 }
 0x17c   : > { %494 = vrot.lane.b32.xlu0 %v1923_v52, %s1630_s20  ;;  %486 = vrot.lane.b32.xlu1 %v1923_v52, %s1627_s18  ;;  %v559_v55 = vpop.permute.xlu1 %558  ;;  %v535_v18 = vmul.f32 %v533_v57, %v1923_v52  ;;  %v536_v30 = vmul.f32 %v533_v57, %v1929_v13 }
 0x17d   : > { %v541_v59 = vpop.permute.xlu0 %540 }
 0x180   : > { %572 = vperm.xlu0 %1427, %v1870_v37   ;;  %488 = vrot.lane.b32.xlu1 %v1929_v13, %s1627_s18 }
 0x181   : > { %v565_v56 = vpop.permute.xlu1 %564 }
 0x182   : > { %v567_v23 = vmul.f32 %v565_v56, %v1923_v52  ;;  %v568_v46 = vmul.f32 %v565_v56, %v1929_v13 }
 0x184   : > { %1430 = vset.pattern.permute.xlu0 %v1633_v12  ;;  %496 = vrot.lane.b32.xlu1 %v1929_v13, %s1630_s20 }
 0x185   : > { %518 = vperm.xlu0 %1430, %v1870_v37  }
 0x188   : > { %504 = vperm.xlu1 %1428, %v1870_v37  }
 0x189   : > { %1431 = vset.pattern.permute.xlu0 %v1623_v0 }
 0x18a   : > { %591 = vperm.xlu0 %1431, %v1939_v53  }
 0x18c   : > { %1429 = vset.pattern.permute.xlu1 %v1631_v10 }
 0x18d   : > { %510 = vperm.xlu1 %1429, %v1870_v37  }
 0x18e   : > { %1434 = vset.pattern.permute.xlu0 %v1632_v11 }
 0x191   : > { %1432 = vset.pattern.permute.xlu1 %v1624_v1 }
 0x192   : > { %605 = vperm.xlu1 %1432, %v1939_v53  }
 0x196   : > { %1433 = vset.pattern.permute.xlu1 %v1628_v7 }
 0x1ee   : > { %v487_v58 = vpop.permute.xlu1 %486  ;;  %v495_v2 = vpop.permute.xlu0 %494 }
 0x1f2   : > { %v489_v60 = vpop.permute.xlu1 %488 }
 0x1f3   : > { %v490_v61 = vsel %vm237_vm0, %v487_v58, %v489_v60  ;;  %v491_v37 = vsel %vm237_vm0, %v489_v60, %v487_v58 }
 0x1f4   : > { %v492_v63 = vmul.f32 %v491_v37, %v1834_v31  ;;  %v493_v8 = vmul.f32 %v490_v61, %v1837_v32 }
 0x1f6   : > { %v529_v14 = vmul.f32 %v527_v54, %v492_v63  ;;  %v497_v15 = vpop.permute.xlu1 %496  ;;  %v561_v21 = vmul.f32 %v559_v55, %v492_v63  ;;  %v530_v27 = vmul.f32 %v527_v54, %v493_v8  ;;  %v562_v39 = vmul.f32 %v559_v55, %v493_v8 }
 0x1f7   : > { %v498_v16 = vsel %vm257_vm1, %v495_v2, %v497_v15  ;;  %v499_v17 = vsel %vm257_vm1, %v497_v15, %v495_v2 }
 0x1f8   : > { %v500_v22 = vmul.f32 %v498_v16, %v1848_v42  ;;  %v501_v6 = vmul.f32 %v499_v17, %v1851_v43  ;;  %v537_v28 = vadd.f32 %v535_v18, %v529_v14  ;;  %v569_v34 = vadd.f32 %v567_v23, %v561_v21  ;;  %v1975_v18 = vld [vmem:[#allocation7 + $0x30] sm:$0xff] }
 0x1f9   : > { %v538_v45 = vadd.f32 %v536_v30, %v530_v27  ;;  %v570_v51 = vadd.f32 %v568_v46, %v562_v39 }
 0x1fa   : > { %v543_v29 = vmul.f32 %v541_v59, %v500_v22  ;;  %v544_v38 = vmul.f32 %v541_v59, %v501_v6 }
 0x1fb   : > { %v573_v33 = vpop.permute.xlu0 %572 }
 0x1fc   : > { %v575_v35 = vmul.f32 %v573_v33, %v500_v22  ;;  %v545_v36 = vadd.f32 %v543_v29, %v537_v28  ;;  %v576_v47 = vmul.f32 %v573_v33, %v501_v6  ;;  %v546_v50 = vadd.f32 %v544_v38, %v538_v45 }
 0x1fe   : > { %v577_v40 = vadd.f32 %v575_v35, %v569_v34  ;;  %547 = vrot.lane.b32.xlu1 %v545_v36, %s1635_s25  ;;  %v578_v57 = vadd.f32 %v576_v47, %v570_v51 }
 0x200   : > { %579 = vrot.lane.b32.xlu0 %v577_v40, %s1636_s27  ;;  %v519_v55 = vpop.permute.xlu0 %518 }
 0x201   : > { %v521_v37 = vmul.f32 %v519_v55, %v500_v22  ;;  %v522_v2 = vmul.f32 %v519_v55, %v501_v6 }
 0x202   : > { %549 = vrot.lane.b32.xlu1 %v546_v50, %s1635_s25 }
 0x203   : > { %v505_v54 = vpop.permute.xlu1 %504 }
 0x204   : > { %637 = vperm.xlu0 %1434, %v1939_v53   ;;  %v507_v59 = vmul.f32 %v505_v54, %v492_v63  ;;  %v508_v60 = vmul.f32 %v505_v54, %v493_v8 }
 0x206   : > { %581 = vrot.lane.b32.xlu1 %v578_v57, %s1636_s27 }
 0x208   : > { %1437 = vset.pattern.permute.xlu0 %v1625_v4  ;;  %v511_v58 = vpop.permute.xlu1 %510 }
 0x209   : > { %v513_v56 = vmul.f32 %v511_v58, %v1923_v52  ;;  %v514_v61 = vmul.f32 %v511_v58, %v1929_v13  ;;  %685 = vperm.xlu0 %1437, %v1939_v53   ;;  %v483_v52 = vld [vmem:[#allocation7 + $0x28] sm:$0xff] }
 0x20a   : > { %621 = vperm.xlu1 %1433, %v1939_v53  }
 0x20b   : > { %v515_v14 = vadd.f32 %v513_v56, %v507_v59  ;;  %v516_v15 = vadd.f32 %v514_v61, %v508_v60  ;;  %v2016_v56 = vsub.s32 4, %v1821_v19 }
 0x20d   : > { %v523_v16 = vadd.f32 %v521_v37, %v515_v14  ;;  %v524_v17 = vadd.f32 %v522_v2, %v516_v15  ;;  %1441 = vset.pattern.permute.xlu0 %v1628_v7 }
 0x20e   : > { %1435 = vset.pattern.permute.xlu1 %v1631_v10  ;;  %784 = vperm.xlu0 %1441, %v1975_v18  }
 0x20f   : > { %653 = vperm.xlu1 %1435, %v1939_v53  }
 0x212   : > { %1444 = vset.pattern.permute.xlu0 %v1629_v9  ;;  %v606_v9 = vpop.permute.xlu1 %605 }
 0x213   : > { %1436 = vset.pattern.permute.xlu1 %v1633_v12 }
 0x214   : > { %669 = vperm.xlu1 %1436, %v1939_v53  }
 0x218   : > { %1438 = vset.pattern.permute.xlu1 %v1626_v5 }
 0x219   : > { %701 = vperm.xlu1 %1438, %v1939_v53   ;;  %v592_v53 = vpop.permute.xlu0 %591 }
 0x21d   : > { %1439 = vset.pattern.permute.xlu1 %v1623_v0 }
 0x21e   : > { %718 = vperm.xlu1 %1439, %v483_v52   ;;  %v2019_v52 = vsub.s32 5, %v1821_v19 }
 0x222   : > { %770 = vperm.xlu1 %1439, %v1975_v18  }
 0x226   : > { %1440 = vset.pattern.permute.xlu1 %v1624_v1 }
 0x227   : > { %776 = vperm.xlu1 %1440, %v1975_v18  }
 0x22b   : > { %1442 = vset.pattern.permute.xlu1 %v1625_v4 }
 0x22c   : > { %802 = vperm.xlu1 %1442, %v1975_v18  }
 0x230   : > { %1443 = vset.pattern.permute.xlu1 %v1626_v5 }
 0x231   : > { %808 = vperm.xlu1 %1443, %v1975_v18  }
 0x235   : > { %1445 = vset.pattern.permute.xlu1 %v1631_v10 }
 0x270   : > { %v548_v13 = vpop.permute.xlu1 %547 }
 0x272   : > { %v580_v23 = vpop.permute.xlu0 %579 }
 0x274   : > { %v550_v63 = vpop.permute.xlu1 %549 }
 0x275   : > { %v551_v8 = vsel %vm340_vm2, %v548_v13, %v550_v63  ;;  %v552_v21 = vsel %vm340_vm2, %v550_v63, %v548_v13 }
 0x276   : > { %v553_v22 = vmul.f32 %v552_v21, %v1885_v41  ;;  %v554_v6 = vmul.f32 %v551_v8, %v1888_v44  ;;  %v2024_v21 = vsub.s32 6, %v1821_v19 }
 0x278   : > { %v582_v27 = vpop.permute.xlu1 %581  ;;  %v555_v30 = vadd.f32 %v553_v22, %v523_v16  ;;  %v556_v33 = vadd.f32 %v554_v6, %v524_v17 }
 0x279   : > { %v583_v28 = vsel %vm393_vm3, %v580_v23, %v582_v27  ;;  %v584_v29 = vsel %vm393_vm3, %v582_v27, %v580_v23 }
 0x27a   : > { %v585_v34 = vmul.f32 %v583_v28, %v1896_v48  ;;  %v586_v35 = vmul.f32 %v584_v29, %v1899_v49 }
 0x27c   : > { %v587_v36 = vadd.f32 %v585_v34, %v555_v30  ;;  %v588_v38 = vadd.f32 %v586_v35, %v556_v33 }
 0x27e   : > { %v597_v39 = vrot.slane %v587_v36, %v1825_v24  ;;  %v601_v40 = vrot.slane %v588_v38, %v1825_v24  ;;  %v611_v45 = vrot.slane %v587_v36, %v1828_v25  ;;  %v615_v46 = vrot.slane %v588_v38, %v1828_v25 }
 0x27f   : > { %v627_v57 = vrot.slane %v587_v36, %v1910_v62  ;;  %v631_v55 = vrot.slane %v588_v38, %v1910_v62  ;;  %v643_v58 = vrot.slane %v587_v36, %v1919_v20  ;;  %v647_v59 = vrot.slane %v588_v38, %v1919_v20  ;;  %v638_v15 = vpop.permute.xlu0 %637 }
 0x280   : > { %v602_v47 = vmul.f32 %v597_v39, %v592_v53  ;;  %v603_v50 = vmul.f32 %v601_v40, %v592_v53  ;;  %v616_v51 = vmul.f32 %v611_v45, %v606_v9  ;;  %v617_v54 = vmul.f32 %v615_v46, %v606_v9 }
 0x281   : > { %v648_v9 = vmul.f32 %v643_v58, %v638_v15  ;;  %v649_v13 = vmul.f32 %v647_v59, %v638_v15  ;;  %v659_v53 = vrot.slane %v587_v36, %v2016_v56  ;;  %v663_v63 = vrot.slane %v588_v38, %v2016_v56 }
 0x282   : > { %v618_v61 = vadd.f32 %v616_v51, %v602_v47  ;;  %v619_v37 = vadd.f32 %v617_v54, %v603_v50  ;;  %v675_v28 = vrot.slane %v587_v36, %v2019_v52  ;;  %v679_v29 = vrot.slane %v588_v38, %v2019_v52 }
 0x283   : > { %v691_v33 = vrot.slane %v587_v36, %v2024_v21  ;;  %v695_v34 = vrot.slane %v588_v38, %v2024_v21  ;;  %v2031_v39 = vsub.s32 7, %v1821_v19 }
 0x284   : > { %v686_v30 = vpop.permute.xlu0 %685 }
 0x285   : > { %v622_v60 = vpop.permute.xlu1 %621  ;;  %v696_v50 = vmul.f32 %v691_v33, %v686_v30  ;;  %v697_v51 = vmul.f32 %v695_v34, %v686_v30  ;;  %v711_v58 = vrot.slane %v588_v38, %v2031_v39  ;;  %v2055_v38 = vld [vmem:[#allocation7 + $0x40] sm:$0xff] }
 0x286   : > { %v632_v2 = vmul.f32 %v627_v57, %v622_v60  ;;  %v633_v14 = vmul.f32 %v631_v55, %v622_v60  ;;  %v707_v55 = vrot.slane %v587_v36, %v2031_v39  ;;  %v2049_v36 = vld [vmem:[#allocation7 + $0x38] sm:$0xff] }
 0x288   : > { %v634_v16 = vadd.f32 %v632_v2, %v618_v61  ;;  %v635_v17 = vadd.f32 %v633_v14, %v619_v37 }
 0x28a   : > { %v654_v8 = vpop.permute.xlu1 %653  ;;  %v650_v22 = vadd.f32 %v648_v9, %v634_v16  ;;  %v651_v6 = vadd.f32 %v649_v13, %v635_v17 }
 0x28b   : > { %v664_v23 = vmul.f32 %v659_v53, %v654_v8  ;;  %v665_v27 = vmul.f32 %v663_v63, %v654_v8  ;;  %v2076_v53 = vld [vmem:[#allocation7 + $0x58] sm:$0xff]  ;;  %v785_v8 = vpop.permute.xlu0 %784 }
 0x28d   : > { %v666_v40 = vadd.f32 %v664_v23, %v650_v22  ;;  %v667_v45 = vadd.f32 %v665_v27, %v651_v6 }
 0x28f   : > { %v670_v35 = vpop.permute.xlu1 %669 }
 0x290   : > { %v680_v46 = vmul.f32 %v675_v28, %v670_v35  ;;  %v681_v47 = vmul.f32 %v679_v29, %v670_v35 }
 0x292   : > { %v682_v54 = vadd.f32 %v680_v46, %v666_v40  ;;  %v683_v57 = vadd.f32 %v681_v47, %v667_v45 }
 0x294   : > { %v702_v59 = vpop.permute.xlu1 %701  ;;  %v698_v60 = vadd.f32 %v696_v50, %v682_v54  ;;  %v699_v61 = vadd.f32 %v697_v51, %v683_v57 }
 0x295   : > { %v712_v37 = vmul.f32 %v707_v55, %v702_v59  ;;  %v713_v2 = vmul.f32 %v711_v58, %v702_v59 }
 0x297   : > { %v714_v14 = vadd.f32 %v712_v37, %v698_v60  ;;  %v715_v19 = vadd.f32 %v713_v2, %v699_v61 }
 0x299   : > { %v719_v15 = vpop.permute.xlu1 %718 }
 0x29a   : > { %v721_v16 = vadd.f32 %v719_v15, %v714_v14  ;;  %v722_v17 = vadd.f32 %v719_v15, %v715_v19 }
 0x29c   : > { %v2035_v9 = vmax.f32 %v721_v16, 0.0  ;;  %v2037_v13 = vmax.f32 %v722_v17, 0.0 }
 0x29e   : > { %732 = vrot.lane.b32.xlu1 %v2037_v13, %s1627_s18  ;;  %730 = vrot.lane.b32.xlu0 %v2035_v9, %s1627_s18 }
 0x2a2   : > { %740 = vrot.lane.b32.xlu1 %v2037_v13, %s1630_s20  ;;  %738 = vrot.lane.b32.xlu0 %v2035_v9, %s1630_s20 }
 0x2a6   : > { %754 = vperm.xlu1 %1445, %v1975_v18   ;;  %816 = vperm.xlu0 %1444, %v1975_v18  }
 0x2aa   : > { %1446 = vset.pattern.permute.xlu1 %v1633_v12  ;;  %1447 = vset.pattern.permute.xlu0 %v1623_v0 }
 0x2ab   : > { %762 = vperm.xlu1 %1446, %v1975_v18   ;;  %835 = vperm.xlu0 %1447, %v2049_v36  }
 0x2af   : > { %1448 = vset.pattern.permute.xlu0 %v1632_v11  ;;  %1449 = vset.pattern.permute.xlu1 %v1623_v0 }
 0x2b0   : > { %748 = vperm.xlu0 %1448, %v1975_v18   ;;  %840 = vperm.xlu1 %1449, %v2055_v38   ;;  %v2071_v18 = vld [vmem:[#allocation7 + $0x60] sm:$0xff] }
 0x2b4   : > { %1450 = vset.pattern.permute.xlu1 %v1624_v1  ;;  %904 = vperm.xlu0 %1448, %v2049_v36  }
 0x2b5   : > { %856 = vperm.xlu1 %1450, %v2049_v36  }
 0x2b8   : > { %1454 = vset.pattern.permute.xlu0 %v1631_v10 }
 0x2b9   : > { %1451 = vset.pattern.permute.xlu1 %v1628_v7  ;;  %932 = vperm.xlu0 %1454, %v2055_v38  }
 0x2ba   : > { %880 = vperm.xlu1 %1451, %v2049_v36  }
 0x2bd   : > { %1455 = vset.pattern.permute.xlu0 %v1624_v1 }
 0x2be   : > { %884 = vperm.xlu1 %1451, %v2055_v38   ;;  %860 = vperm.xlu0 %1455, %v2055_v38  }
 0x2c2   : > { %1452 = vset.pattern.permute.xlu1 %v1632_v11  ;;  %1079 = vperm.xlu0 %1455, %v2071_v18  }
 0x2c3   : > { %908 = vperm.xlu1 %1452, %v2055_v38  }
 0x2c6   : > { %1460 = vset.pattern.permute.xlu0 %v1628_v7 }
 0x2c7   : > { %1453 = vset.pattern.permute.xlu1 %v1631_v10  ;;  %1109 = vperm.xlu0 %1460, %v2076_v53   ;;  %v771_v10 = vpop.permute.xlu1 %770 }
 0x2c8   : > { %928 = vperm.xlu1 %1453, %v2049_v36  }
 0x2cb   : > { %1463 = vset.pattern.permute.xlu0 %v1626_v5 }
 0x2cc   : > { %1456 = vset.pattern.permute.xlu1 %v1633_v12  ;;  %v777_v12 = vpop.permute.xlu1 %776 }
 0x2cd   : > { %952 = vperm.xlu1 %1456, %v2049_v36   ;;  %v779_v35 = vmul.f32 %v777_v12, %v2035_v9  ;;  %v780_v40 = vmul.f32 %v777_v12, %v2037_v13 }
 0x2d0   : > { %v803_v63 = vpop.permute.xlu1 %802 }
 0x2d1   : > { %956 = vperm.xlu1 %1456, %v2055_v38  }
 0x2d4   : > { %v809_v22 = vpop.permute.xlu1 %808 }
 0x2d5   : > { %1457 = vset.pattern.permute.xlu1 %v1623_v0  ;;  %v811_v58 = vmul.f32 %v809_v22, %v2035_v9  ;;  %v812_v59 = vmul.f32 %v809_v22, %v2037_v13 }
 0x2d6   : > { %1048 = vperm.xlu1 %1457, %v2071_v18  }
 0x2da   : > { %1458 = vset.pattern.permute.xlu1 %v1624_v1 }
 0x2db   : > { %1075 = vperm.xlu1 %1458, %v2076_v53  }
 0x2df   : > { %1459 = vset.pattern.permute.xlu1 %v1625_v4 }
 0x2e0   : > { %976 = vperm.xlu1 %1459, %v2049_v36  }
 0x2e4   : > { %980 = vperm.xlu1 %1459, %v2055_v38  }
 0x2e8   : > { %1461 = vset.pattern.permute.xlu1 %v1628_v7 }
 0x2e9   : > { %1113 = vperm.xlu1 %1461, %v2071_v18  }
 0x2ed   : > { %1462 = vset.pattern.permute.xlu1 %v1626_v5 }
 0x310   : > { %v731_v1 = vpop.permute.xlu0 %730  ;;  %v733_v6 = vpop.permute.xlu1 %732 }
 0x311   : > { %v734_v4 = vsel %vm237_vm0, %v731_v1, %v733_v6  ;;  %v735_v23 = vsel %vm237_vm0, %v733_v6, %v731_v1 }
 0x312   : > { %v736_v27 = vmul.f32 %v735_v23, %v1834_v31  ;;  %v737_v7 = vmul.f32 %v734_v4, %v1837_v32  ;;  %v726_v23 = vld [vmem:[#allocation7 + $0x48] sm:$0xff] }
 0x314   : > { %v773_v28 = vmul.f32 %v771_v10, %v736_v27  ;;  %v774_v29 = vmul.f32 %v771_v10, %v737_v7  ;;  %v739_v5 = vpop.permute.xlu0 %738  ;;  %v741_v30 = vpop.permute.xlu1 %740  ;;  %v805_v57 = vmul.f32 %v803_v63, %v736_v27  ;;  %v806_v55 = vmul.f32 %v803_v63, %v737_v7 }
 0x315   : > { %v742_v33 = vsel %vm257_vm1, %v739_v5, %v741_v30  ;;  %v743_v34 = vsel %vm257_vm1, %v741_v30, %v739_v5 }
 0x316   : > { %v744_v45 = vmul.f32 %v742_v33, %v1848_v42  ;;  %v745_v31 = vmul.f32 %v743_v34, %v1851_v43  ;;  %v782_v46 = vadd.f32 %v780_v40, %v774_v29  ;;  %v781_v47 = vadd.f32 %v779_v35, %v773_v28 }
 0x317   : > { %v813_v42 = vadd.f32 %v811_v58, %v805_v57  ;;  %v814_v61 = vadd.f32 %v812_v59, %v806_v55  ;;  %v1055_v55 = vrot.slane %v1795_v3, %v1825_v24  ;;  %v1059_v58 = vrot.slane %v1795_v3, %v2016_v56 }
 0x318   : > { %v788_v32 = vmul.f32 %v785_v8, %v745_v31  ;;  %v787_v50 = vmul.f32 %v785_v8, %v744_v45 }
 0x31a   : > { %v790_v51 = vadd.f32 %v788_v32, %v782_v46  ;;  %v789_v54 = vadd.f32 %v787_v50, %v781_v47  ;;  %v1085_v50 = vrot.slane %v1795_v3, %v1828_v25 }
 0x31c   : > { %793 = vrot.lane.b32.xlu1 %v790_v51, %s1635_s25  ;;  %791 = vrot.lane.b32.xlu0 %v789_v54, %s1635_s25  ;;  %v1089_v51 = vrot.slane %v1795_v3, %v2019_v52 }
 0x321   : > { %v817_v60 = vpop.permute.xlu0 %816  ;;  %v755_v19 = vpop.permute.xlu1 %754 }
 0x322   : > { %v819_v43 = vmul.f32 %v817_v60, %v744_v45  ;;  %v820_v37 = vmul.f32 %v817_v60, %v745_v31  ;;  %v757_v10 = vmul.f32 %v755_v19, %v2035_v9  ;;  %v758_v12 = vmul.f32 %v755_v19, %v2037_v13  ;;  %v1040_v9 = vld [vmem:[#allocation7 + $0x70] sm:$0xff] }
 0x323   : > { %v727_v13 = vld [vmem:[#allocation7 + $0x50] sm:$0xff] }
 0x324   : > { %v821_v2 = vadd.f32 %v819_v43, %v813_v42  ;;  %v822_v14 = vadd.f32 %v820_v37, %v814_v61  ;;  %v1095_v42 = vrot.slane %v1085_v50, %v1828_v25  ;;  %v1099_v61 = vrot.slane %v1089_v51, %v1828_v25 }
 0x325   : > { %v2169_v43 = vrot.slane %v1055_v55, %v1825_v24  ;;  %v2172_v37 = vrot.slane %v1059_v58, %v1825_v24 }
 0x326   : > { %825 = vrot.lane.b32.xlu1 %v822_v14, %s1636_s27  ;;  %823 = vrot.lane.b32.xlu0 %v821_v2, %s1636_s27  ;;  %v2116_v15 = vpop.permute.xlu0 %835  ;;  %v763_v16 = vpop.permute.xlu1 %762  ;;  %v1467_v14 = vld [vmem:[%s1782_s4] sm:$0xff] }
 0x327   : > { %v765_v22 = vmul.f32 %v763_v16, %v744_v45  ;;  %v766_v1 = vmul.f32 %v763_v16, %v745_v31  ;;  %v1119_v19 = vrot.slane %v1467_v14, %v1910_v62  ;;  %v1123_v16 = vrot.slane %v1467_v14, %v2024_v21 }
 0x32a   : > { %1000 = vperm.xlu1 %1462, %v2049_v36   ;;  %1004 = vperm.xlu0 %1463, %v2055_v38  }
 0x32b   : > { %v749_v17 = vpop.permute.xlu0 %748 }
 0x32c   : > { %v751_v63 = vmul.f32 %v749_v17, %v736_v27  ;;  %v752_v8 = vmul.f32 %v749_v17, %v737_v7  ;;  %v1039_v27 = vld [vmem:[#allocation7 + $0x68] sm:$0xff] }
 0x32e   : > { %v759_v6 = vadd.f32 %v757_v10, %v751_v63  ;;  %v760_v4 = vadd.f32 %v758_v12, %v752_v8  ;;  %1465 = vset.pattern.permute.xlu1 %v1632_v11  ;;  %1464 = vset.pattern.permute.xlu0 %v1623_v0  ;;  %v2128_v11 = vpop.permute.xlu1 %840  ;;  %v1153_v8 = vrot.slane %v1467_v14, %v1919_v20 }
 0x32f   : > { %1143 = vperm.xlu1 %1465, %v2076_v53   ;;  %1043 = vperm.xlu0 %1464, %v2076_v53  }
 0x330   : > { %v767_v36 = vadd.f32 %v765_v22, %v759_v6  ;;  %v768_v38 = vadd.f32 %v766_v1, %v760_v4  ;;  %v1157_v22 = vrot.slane %v1467_v14, %v2031_v39 }
 0x332   : > { %v2130_v7 = vpop.permute.xlu1 %856 }
 0x333   : > { %1147 = vperm.xlu1 %1465, %v2071_v18   ;;  %1025 = vperm.xlu0 %1464, %v726_v23  }
 0x336   : > { %v2132_v28 = vpop.permute.xlu1 %880 }
 0x337   : > { %1466 = vset.pattern.permute.xlu1 %v1623_v0  ;;  %1183 = vperm.xlu0 %1464, %v1040_v9   ;;  %v2144_v0 = vpop.permute.xlu0 %904 }
 0x338   : > { %1030 = vperm.xlu1 %1466, %v727_v13  }
 0x33a   : > { %v2134_v53 = vpop.permute.xlu1 %884 }
 0x33b   : > { %v2146_v34 = vpop.permute.xlu0 %932 }
 0x33c   : > { %1178 = vperm.xlu1 %1466, %v1039_v27   ;;  %v1129_v27 = vrot.slane %v1119_v19, %v1910_v62 }
 0x33e   : > { %v2136_v29 = vpop.permute.xlu1 %908 }
 0x33f   : > { %v2148_v40 = vpop.permute.xlu0 %860 }
 0x343   : > { %v2138_v18 = vpop.permute.xlu1 %928  ;;  %v1080_v31 = vpop.permute.xlu0 %1079 }
 0x344   : > { %v1102_v17 = vmul.f32 %v1095_v42, %v1080_v31  ;;  %v1103_v10 = vmul.f32 %v1099_v61, %v1080_v31  ;;  %v1133_v31 = vrot.slane %v1123_v16, %v1910_v62 }
 0x347   : > { %v1110_v32 = vpop.permute.xlu0 %1109 }
 0x348   : > { %v2140_v5 = vpop.permute.xlu1 %952 }
 0x34c   : > { %v2142_v30 = vpop.permute.xlu1 %956 }
 0x351   : > { %v1049_v33 = vpop.permute.xlu1 %1048 }
 0x352   : > { %v1072_v1 = vmul.f32 %v2169_v43, %v1049_v33  ;;  %v1073_v6 = vmul.f32 %v2172_v37, %v1049_v33  ;;  %v2192_v33 = vrot.slane %v1153_v8, %v1919_v20 }
 0x354   : > { %v1106_v26 = vadd.f32 %v1102_v17, %v1072_v1 }
 0x356   : > { %v1076_v35 = vpop.permute.xlu1 %1075 }
 0x35b   : > { %v2150_v45 = vpop.permute.xlu1 %976 }
 0x35f   : > { %v2152_v46 = vpop.permute.xlu1 %980 }
 0x364   : > { %v1114_v47 = vpop.permute.xlu1 %1113 }
 0x365   : > { %v1136_v14 = vmul.f32 %v1129_v27, %v1114_v47  ;;  %v1137_v19 = vmul.f32 %v1133_v31, %v1114_v47 }
 0x367   : > { %v1140_v8 = vadd.f32 %v1136_v14, %v1106_v26 }
 0x38e   : > { %v792_v54 = vpop.permute.xlu0 %791  ;;  %v794_v57 = vpop.permute.xlu1 %793 }
 0x38f   : > { %v795_v59 = vsel %vm340_vm2, %v792_v54, %v794_v57  ;;  %v796_v60 = vsel %vm340_vm2, %v794_v57, %v792_v54  ;;  %v2195_v54 = vrot.slane %v1157_v22, %v1919_v20  ;;  %v1107_v57 = vadd.f32 %v1103_v10, %v1073_v6 }
 0x390   : > { %v797_v2 = vmul.f32 %v796_v60, %v1885_v41  ;;  %v798_v3 = vmul.f32 %v795_v59, %v1888_v44 }
 0x392   : > { %v799_v4 = vadd.f32 %v797_v2, %v767_v36  ;;  %v800_v23 = vadd.f32 %v798_v3, %v768_v38  ;;  %v2197_v36 = vmul.f32 %v1129_v27, %v1110_v32  ;;  %v2199_v38 = vmul.f32 %v1133_v31, %v1110_v32 }
 0x398   : > { %v824_v12 = vpop.permute.xlu0 %823  ;;  %v826_v63 = vpop.permute.xlu1 %825 }
 0x399   : > { %v827_v41 = vsel %vm393_vm3, %v824_v12, %v826_v63  ;;  %v828_v44 = vsel %vm393_vm3, %v826_v63, %v824_v12 }
 0x39a   : > { %v829_v9 = vmul.f32 %v827_v41, %v1896_v48  ;;  %v830_v13 = vmul.f32 %v828_v44, %v1899_v49  ;;  %v2201_v48 = vmul.f32 %v1095_v42, %v1076_v35  ;;  %v2203_v49 = vmul.f32 %v1099_v61, %v1076_v35 }
 0x39c   : > { %v831_v50 = vadd.f32 %v829_v9, %v799_v4  ;;  %v832_v51 = vadd.f32 %v830_v13, %v800_v23 }
 0x39e   : > { %v846_v55 = vrot.slane %v831_v50, %v1825_v24  ;;  %v850_v58 = vrot.slane %v832_v51, %v1825_v24  ;;  %v866_v59 = vrot.slane %v831_v50, %v1828_v25  ;;  %v870_v60 = vrot.slane %v832_v51, %v1828_v25 }
 0x39f   : > { %v890_v2 = vrot.slane %v831_v50, %v1910_v62  ;;  %v894_v3 = vrot.slane %v832_v51, %v1910_v62  ;;  %v914_v24 = vrot.slane %v831_v50, %v1919_v20  ;;  %v918_v16 = vrot.slane %v832_v51, %v1919_v20 }
 0x3a0   : > { %v851_v32 = vmul.f32 %v846_v55, %v2116_v15  ;;  %v852_v42 = vmul.f32 %v850_v58, %v2116_v15  ;;  %v871_v35 = vmul.f32 %v866_v59, %v2130_v7  ;;  %v872_v61 = vmul.f32 %v870_v60, %v2130_v7 }
 0x3a1   : > { %v895_v25 = vmul.f32 %v890_v2, %v2132_v28  ;;  %v896_v17 = vmul.f32 %v894_v3, %v2132_v28  ;;  %v938_v62 = vrot.slane %v831_v50, %v2016_v56  ;;  %v942_v47 = vrot.slane %v832_v51, %v2016_v56 }
 0x3a2   : > { %v875_v10 = vadd.f32 %v871_v35, %v851_v32  ;;  %v876_v12 = vadd.f32 %v872_v61, %v852_v42  ;;  %v962_v15 = vrot.slane %v831_v50, %v2019_v52  ;;  %v966_v63 = vrot.slane %v832_v51, %v2019_v52 }
 0x3a3   : > { %v1141_v7 = vadd.f32 %v1137_v19, %v1107_v57  ;;  %v1010_v22 = vrot.slane %v831_v50, %v2031_v39  ;;  %v1014_v20 = vrot.slane %v832_v51, %v2031_v39  ;;  %v919_v44 = vmul.f32 %v914_v24, %v2144_v0 }
 0x3a4   : > { %v899_v41 = vadd.f32 %v895_v25, %v875_v10  ;;  %v900_v28 = vadd.f32 %v896_v17, %v876_v12  ;;  %v920_v56 = vmul.f32 %v918_v16, %v2144_v0  ;;  %v943_v4 = vmul.f32 %v938_v62, %v2138_v18 }
 0x3a5   : > { %v1005_v1 = vpop.permute.xlu0 %1004  ;;  %v1001_v6 = vpop.permute.xlu1 %1000  ;;  %v944_v23 = vmul.f32 %v942_v47, %v2138_v18  ;;  %v986_v52 = vrot.slane %v831_v50, %v2024_v21  ;;  %v990_v9 = vrot.slane %v832_v51, %v2024_v21  ;;  %v967_v39 = vmul.f32 %v962_v15, %v2140_v5 }
 0x3a6   : > { %v923_v13 = vadd.f32 %v919_v44, %v899_v41  ;;  %v924_v27 = vadd.f32 %v920_v56, %v900_v28  ;;  %v968_v31 = vmul.f32 %v966_v63, %v2140_v5  ;;  %v853_v26 = vmul.f32 %v846_v55, %v2128_v11 }
 0x3a7   : > { %v854_v57 = vmul.f32 %v850_v58, %v2128_v11  ;;  %v873_v0 = vmul.f32 %v866_v59, %v2148_v40  ;;  %v874_v14 = vmul.f32 %v870_v60, %v2148_v40  ;;  %v1017_v19 = vmul.f32 %v1010_v22, %v1005_v1 }
 0x3a8   : > { %v1018_v18 = vmul.f32 %v1014_v20, %v1005_v1  ;;  %v947_v32 = vadd.f32 %v943_v4, %v923_v13  ;;  %v948_v50 = vadd.f32 %v944_v23, %v924_v27  ;;  %v897_v61 = vmul.f32 %v890_v2, %v2134_v53 }
 0x3a9   : > { %v877_v51 = vadd.f32 %v873_v0, %v853_v26  ;;  %v878_v35 = vadd.f32 %v874_v14, %v854_v57  ;;  %v898_v5 = vmul.f32 %v894_v3, %v2134_v53  ;;  %v921_v58 = vmul.f32 %v914_v24, %v2136_v29 }
 0x3aa   : > { %v1044_v42 = vpop.permute.xlu0 %1043  ;;  %v1144_v21 = vpop.permute.xlu1 %1143  ;;  %v922_v40 = vmul.f32 %v918_v16, %v2136_v29  ;;  %v971_v59 = vadd.f32 %v967_v39, %v947_v32  ;;  %v972_v60 = vadd.f32 %v968_v31, %v948_v50  ;;  %v991_v2 = vmul.f32 %v986_v52, %v2150_v45 }
 0x3ab   : > { %v1070_v55 = vmul.f32 %v2169_v43, %v1044_v42  ;;  %v1071_v11 = vmul.f32 %v2172_v37, %v1044_v42  ;;  %v901_v25 = vadd.f32 %v897_v61, %v877_v51  ;;  %v902_v17 = vadd.f32 %v898_v5, %v878_v35 }
 0x3ac   : > { %v992_v53 = vmul.f32 %v990_v9, %v2150_v45  ;;  %v945_v24 = vmul.f32 %v938_v62, %v2146_v34  ;;  %v946_v29 = vmul.f32 %v942_v47, %v2146_v34  ;;  %v995_v16 = vadd.f32 %v991_v2, %v971_v59 }
 0x3ad   : > { %v1104_v10 = vadd.f32 %v2201_v48, %v1070_v55  ;;  %v1105_v12 = vadd.f32 %v2203_v49, %v1071_v11  ;;  %v925_v1 = vadd.f32 %v921_v58, %v901_v25  ;;  %v926_v37 = vadd.f32 %v922_v40, %v902_v17 }
 0x3ae   : > { %v1026_v3 = vpop.permute.xlu0 %1025  ;;  %v1148_v43 = vpop.permute.xlu1 %1147  ;;  %v996_v41 = vadd.f32 %v992_v53, %v972_v60  ;;  %v969_v56 = vmul.f32 %v962_v15, %v2142_v30  ;;  %v970_v45 = vmul.f32 %v966_v63, %v2142_v30  ;;  %v1015_v4 = vmul.f32 %v1010_v22, %v1001_v6 }
 0x3af   : > { %v1170_v28 = vmul.f32 %v2192_v33, %v1148_v43  ;;  %v1171_v48 = vmul.f32 %v2195_v54, %v1148_v43  ;;  %v949_v49 = vadd.f32 %v945_v24, %v925_v1  ;;  %v950_v44 = vadd.f32 %v946_v29, %v926_v37 }
 0x3b0   : > { %v1016_v23 = vmul.f32 %v1014_v20, %v1001_v6  ;;  %v993_v47 = vmul.f32 %v986_v52, %v2152_v46  ;;  %v994_v31 = vmul.f32 %v990_v9, %v2152_v46  ;;  %v1019_v26 = vadd.f32 %v1015_v4, %v995_v16 }
 0x3b1   : > { %v1174_v13 = vadd.f32 %v1170_v28, %v1140_v8  ;;  %v1175_v27 = vadd.f32 %v1171_v48, %v1141_v7  ;;  %v973_v39 = vadd.f32 %v969_v56, %v949_v49  ;;  %v974_v34 = vadd.f32 %v970_v45, %v950_v44 }
 0x3b2   : > { %v1184_v62 = vpop.permute.xlu0 %1183  ;;  %v1020_v57 = vadd.f32 %v1016_v23, %v996_v41  ;;  %v1138_v15 = vadd.f32 %v2197_v36, %v1104_v10  ;;  %v1139_v30 = vadd.f32 %v2199_v38, %v1105_v12  ;;  %v1168_v63 = vmul.f32 %v2192_v33, %v1144_v21 }
 0x3b3   : > { %v1031_v0 = vpop.permute.xlu1 %1030  ;;  %v1169_v8 = vmul.f32 %v2195_v54, %v1144_v21  ;;  %v997_v7 = vadd.f32 %v993_v47, %v973_v39  ;;  %v998_v22 = vadd.f32 %v994_v31, %v974_v34  ;;  %v1188_v20 = vadd.f32 %v1184_v62, %v1174_v13 }
 0x3b4   : > { %v1189_v6 = vadd.f32 %v1184_v62, %v1175_v27  ;;  %v1172_v9 = vadd.f32 %v1168_v63, %v1138_v15  ;;  %v1033_v32 = vadd.f32 %v1026_v3, %v1019_v26  ;;  %v1034_v50 = vadd.f32 %v1026_v3, %v1020_v57 }
 0x3b5   : > { %v1021_v52 = vadd.f32 %v1017_v19, %v997_v7  ;;  %v1022_v46 = vadd.f32 %v1018_v18, %v998_v22  ;;  %v1173_v14 = vadd.f32 %v1169_v8, %v1139_v30 }
 0x3b7   : > { %v1179_v36 = vpop.permute.xlu1 %1178  ;;  %v1035_v33 = vadd.f32 %v1031_v0, %v1021_v52  ;;  %v1036_v54 = vadd.f32 %v1031_v0, %v1022_v46 }
 0x3b8   : > { %v1186_v38 = vadd.f32 %v1179_v36, %v1172_v9  ;;  %v1187_v42 = vadd.f32 %v1179_v36, %v1173_v14 }
 0x3b9   : > { %v1192_v19 = vadd.f32 %v1188_v20, %v1035_v33  ;;  %v1193_v18 = vadd.f32 %v1189_v6, %v1036_v54 }
 0x3ba   : > { %v1190_v21 = vadd.f32 %v1186_v38, %v1033_v32  ;;  %v1191_v51 = vadd.f32 %v1187_v42, %v1034_v50 }
 0x3bb   : > { %1196 = vst [vmem:[%s213_s29 + $0x10] sm:$0xff] %v1192_v19  ;;  %1197 = vst [vmem:[%s213_s29 + $0x18] sm:$0xff] %v1193_v18 }
 0x3bc   : > { %1194 = vst [vmem:[%s213_s29] sm:$0xff] %v1190_v21  ;;  %1195 = vst [vmem:[%s213_s29 + $0x8] sm:$0xff] %v1191_v51 }
 0x3bd   : > { %1561 = shalt.err (!%p1558_p12)
}
 0x3be   : > { %s1562_s30 = scalar_lea.hbm %s2266_s21, 512  ;;  %s1566_s20 = scalar_lea.hbm %s2313_s3, 1024 }
 0x3bf   : > { %p1563_p3 = scmp.ne.s32.totalorder %s2266_s21, %s1562_s30  ;;  %p1567_p5 = scmp.lt.s32.totalorder %s2266_s21, %s2313_s3 }
 0x3c0   : > { %p1568_p8 = scmp.lt.s32.totalorder %s1566_s20, %s1562_s30 }
 0x3c1   : > { %p1564_p7 = pnand %p1563_p3, %p2329_p0 }
 0x3c2   : > { %p1569_p11 = por %p1568_p8, %p1567_p5 }
 0x3c3   : > { %p1565_p10 = pneg %p1564_p7 }
 0x3c5   : > { %p1570_p13 = pnand %p1569_p11, %p1565_p10 }
 0x3c7   : > { %1573 = shalt.err (!%p1570_p13)
}
 0x3c8   : > { %s1638_s29 = smov 256   ;;  %s1639_s6 = smov 512  }
 0x3c9   : > { %1334 = dma.vmem_to_hbm [thread:$0]  (%p2329_p0), %s2261_s5, 512, %s2266_s21, %s1199_s16, %s1638_s29, %s1639_s6, %s1635_s25  }
 0x3ca PF: > { %s1227_s8 = sand.u32 1, %s1604_s12   ;;  %p2330_p1 = scmp.ne.s32.totalorder %s2319_s19, 0 }
 0x3cb   : > { %p2331_p2 = scmp.ge.s32.totalorder %s1616_s15, 2  ;;  %s1228_s9 = scalar_lea.sflag [#allocation4], %s1227_s8 }
 0x3cd   : > { %p1348_p4 = pnand %p2331_p2, %p2330_p1 }
 0x3cf   : > { %p1349_p6 = pneg %p1348_p4 }
 0x3d1   : > { %1599 = dma.done.wait (%p1349_p6), %s1228_s9, 512  }
 0x3d2   : > { %1601 = vsyncadd (%p1349_p6), %s1228_s9, 4294966784  ;;  %p17_p9 = scmp.ge.s32.totalorder %s1732_s7, 4   ;;  %s2332_s12 = smov %s1608_s13 }
 0x3d3   : > { %s2333_s13 = smov %s1612_s14  ;;  %s2334_s14 = smov %s1748_s11 }
 0x3d4   : > { %s2335_s15 = smov %s1732_s7  ;;  %19 = sbr.rel (!%p17_p9) target bundleno = 6 (0x6), region = 88 }
 0x3d9   :  { %1233 = vsyncpa [#allocation3], 1 }
 0x3da   :  { %1235 = vsyncpa [#allocation3 + $0x1], 1 }
 0x3db   :  { %1236 = vsyncpa [#allocation6], 1 }
 0x3dc   :  { %1237 = vsyncpa [#allocation4], 1 }
 0x3dd   :  { %1239 = vsyncpa [#allocation4 + $0x1], 1 }

// kernel: tpu_custom_call.1
= control target key start
LH: loop header
LB: loop body
LE: loop exit
PB: predicated region body
PF: predicated region fallthrough
CT: control target
= control target key end

     0   :  { %8 = vsyncpa [#allocation3], 0  ;;  %s2310_s0 = inlined_call_operand.hbm [shape: f32[4,512], index: 0, kind: input, shape index: {}]   ;;  %s2311_s1 = inlined_call_operand.hbm [shape: f32[4,256], index: 1, kind: input, shape index: {}]   ;;  %s2312_s2 = inlined_call_operand.hbm [shape: f32[120,128], index: 2, kind: input, shape index: {}]   ;;  %s2313_s3 = inlined_call_operand.hbm [shape: f32[16,512], index: 3, kind: output, shape index: {}]  }
   0x1   :  { %10 = vsyncpa [#allocation3 + $0x1], 0 }
   0x2   :  { %11 = vsyncpa [#allocation6], 0 }
   0x3   :  { %12 = vsyncpa [#allocation4], 0 }
   0x4   :  { %14 = vsyncpa [#allocation4 + $0x1], 0  ;;  %s1660_s12 = smov 0   ;;  %s1662_s13 = smov 0  }
   0x5   :  { %s1664_s14 = smov 0   ;;  %s1666_s15 = smov 0  }
   0x6 LB: > { %s1681_s16 = sadd.s32 4294967295, %s1616_s15   ;;  %s1304_s17 = sadd.s32 4294967294, %s1616_s15   ;;  %s1616_s15 = sphi %s1666_s15, %s2335_s15   ;;  %s1612_s14 = sphi %s1664_s14, %s2334_s14   ;;  %s1608_s13 = sphi %s1662_s13, %s2333_s13   ;;  %s1604_s12 = sphi %s1660_s12, %s2332_s12  }
   0x7   : > { %p40_p0 = scmp.ne.s32.totalorder %s1608_s13, %s1604_s12  ;;  %p2314_p1 = scmp.eq.s32.totalorder %s1681_s16, 0 }
   0x8   : > { %p112_p3 = scmp.eq.s32.totalorder %s1304_s17, 1  ;;  %p1305_p5 = scmp.ge.s32.totalorder %s1616_s15, 1 }
   0x9   : > { %p1690_p4 = por %p2314_p1, %p40_p0  ;;  %p119_p7 = scmp.lt.s32.totalorder %s1616_s15, 3 }
   0xa   : > { %p1695_p6 = por %p112_p3, %p40_p0  ;;  %s1618_s21 = smov [#allocation5]  }
   0xb   : > { %s2318_s18 = scalar_select %p1690_p4, 1, 0 }
   0xc   : > { %s2319_s19 = scalar_select %p1695_p6, 1, 0 }
   0xd   : > { %p1700_p8 = pnand %p1305_p5, %p119_p7  ;;  %s132_s22 = sshll.u32 %s1618_s21, 4  ;;  %s133_s22 = int_to_ptr.vmem [resolvable:$true] %s132_s22 }
   0xe   : > { %s1619_s23 = smov [#allocation7]   ;;  %s1479_s26 = scalar_lea.vmem %s133_s22, 128 }
   0xf   : > { %s2320_s20 = scalar_select %p1700_p8, 1, 0 }
  0x10   : > { %p1336_p10 = pneg %p1700_p8  ;;  %s142_s24 = sshll.u32 %s1619_s23, 4  ;;  %s143_s24 = int_to_ptr.vmem [resolvable:$true] %s142_s24 }
  0x11   : > { %p1480_p13 = scmp.ne.s32.totalorder %s133_s22, %s1479_s26  ;;  %p1487_p5 = scmp.lt.s32.totalorder %s133_s22, %s133_s22 }
  0x12   : > { %p1709_p11 = pnand %p1336_p10, %p2314_p1  ;;  %p1488_p7 = scmp.lt.s32.totalorder %s1479_s26, %s1479_s26 }
  0x14   : > { %p1470_p12 = pneg %p1709_p11  ;;  %p1489_p9 = por %p1488_p7, %p1487_p5 }
  0x16   : > { %p1482_p0 = pnand %p1480_p13, %p1470_p12 }
  0x18   : > { %p1483_p3 = pneg %p1482_p0 }
  0x1a   : > { %p1490_p2 = pnand %p1489_p9, %p1483_p3 }
  0x1c   : > { %1493 = shalt.err (!%p1490_p2)
}
  0x1d   : > { %1339 = dma.hbm_to_vmem [thread:$0]  (!%p1709_p11), %s2311_s1, 128, %s133_s22, [#allocation6]  }
  0x1e   : > { %s1505_s29 = scalar_lea.vmem %s143_s24, 1920  ;;  %p1513_p13 = scmp.lt.s32.totalorder %s143_s24, %s143_s24 }
  0x1f   : > { %p1506_p10 = scmp.ne.s32.totalorder %s143_s24, %s1505_s29  ;;  %p1514_p0 = scmp.lt.s32.totalorder %s1505_s29, %s1505_s29 }
  0x21   : > { %p1508_p1 = pnand %p1506_p10, %p1470_p12  ;;  %p1515_p4 = por %p1514_p0, %p1513_p13 }
  0x23   : > { %p1509_p6 = pneg %p1508_p1 }
  0x25   : > { %p1516_p8 = pnand %p1515_p4, %p1509_p6 }
  0x27   : > { %1519 = shalt.err (!%p1516_p8)
}
  0x28   : > { %s1620_s30 = smov 128   ;;  %s1621_s4 = smov 8  }
  0x29   : > { %1342 = dma.hbm_to_vmem [thread:$0]  (!%p1709_p11), %s2312_s2, 1920, %s143_s24, [#allocation6], %s1620_s30, %s1620_s30, %s1621_s4  }
  0x2a   : > { %s1732_s7 = sadd.s32 1, %s1616_s15   ;;  %s27_s8 = sadd.s32 1, %s1612_s14 }
  0x2b   : > { %s24_s9 = ssub.s32 %s1616_s15, %s1732_s7  ;;  %p34_p1 = scmp.ne.s32.totalorder %s1612_s14, %s1608_s13 }
  0x2c   : > { %p25_p2 = scmp.eq.s32.totalorder %s24_s9, 0  ;;  %p35_p4 = scmp.eq.s32.totalorder %s1616_s15, 0 }
  0x2d   : > { %p2322_p6 = scmp.eq.s32.totalorder %s1681_s16, 1  ;;  %p1353_p9 = scmp.lt.s32.totalorder %s1616_s15, 2 }
  0x2e   : > { %s1748_s11 = scalar_select %p25_p2, %s1612_s14, %s27_s8  }
  0x2f   : > { %p1742_p8 = por %p2322_p6, %p34_p1  ;;  %p36_p12 = por %p35_p4, %p34_p1 }
  0x30   : > { %s156_s17 = sand.u32 1, %s1612_s14   ;;  %s1322_s22 = sshll.u32 %s1616_s15, 7 }
  0x31   : > { %s2323_s10 = scalar_select %p1742_p8, 1, 0 }
  0x32   : > { %s1309_s21 = sshll.u32 %s156_s17, 3  ;;  %s1755_s25 = scalar_lea.hbm %s2310_s0, %s1322_s22 }
  0x33   : > { %s160_s26 = scalar_lea.vmem [#allocation2], %s1309_s21  ;;  %p1757_p11 = pnand %p1353_p9, %p36_p12 }
  0x34   : > { %s168_s27 = sshll.u32 %s160_s26, 4  ;;  %s157_s29 = scalar_lea.sflag [#allocation3], %s156_s17  ;;  %s169_s27 = int_to_ptr.vmem [resolvable:$true] %s168_s27 }
  0x35   : > { %s1520_s30 = scalar_lea.hbm %s1755_s25, 128  ;;  %p1522_p5 = pneg %p1757_p11 }
  0x36   : > { %p1521_p3 = scmp.ne.s32.totalorder %s1755_s25, %s1520_s30  ;;  %s1525_s6 = scalar_lea.hbm %s2310_s0, 256 }
  0x37   : > { %p1526_p13 = scmp.lt.s32.totalorder %s1755_s25, %s2310_s0  ;;  %p1527_p0 = scmp.lt.s32.totalorder %s1525_s6, %s1520_s30 }
  0x38   : > { %p1523_p7 = pnand %p1522_p5, %p1521_p3 }
  0x39   : > { %p1528_p1 = por %p1527_p0, %p1526_p13 }
  0x3a   : > { %p1524_p10 = pneg %p1523_p7 }
  0x3c   : > { %p1529_p2 = pnand %p1528_p1, %p1524_p10 }
  0x3e   : > { %1532 = shalt.err (!%p1529_p2)
}
  0x3f   : > { %s1533_s21 = scalar_lea.vmem %s169_s27, 128  ;;  %s1622_s17 = smov [#allocation2]  }
  0x40   : > { %p1534_p4 = scmp.ne.s32.totalorder %s169_s27, %s1533_s21  ;;  %s1538_s22 = sshll.u32 %s1622_s17, 4  ;;  %s1539_s22 = int_to_ptr.vmem [resolvable:$false] %s1538_s22 }
  0x41   : > { %s1540_s23 = scalar_lea.vmem %s1539_s22, 256  ;;  %p1541_p12 = scmp.lt.s32.totalorder %s169_s27, %s1539_s22 }
  0x42   : > { %p1536_p6 = pnand %p1534_p4, %p1522_p5  ;;  %p1542_p3 = scmp.lt.s32.totalorder %s1540_s23, %s1533_s21 }
  0x44   : > { %p1537_p9 = pneg %p1536_p6  ;;  %p1543_p7 = por %p1542_p3, %p1541_p12 }
  0x46   : > { %p1544_p8 = pnand %p1543_p7, %p1537_p9 }
  0x48   : > { %1547 = shalt.err (!%p1544_p8)
}
  0x49   : > { %1346 = dma.hbm_to_vmem [thread:$0]  (!%p1757_p11), %s1755_s25, 128, %s169_s27, %s157_s29  }
  0x4a   : > { %p2325_p10 = scmp.ne.s32.totalorder %s2320_s20, 0 }
  0x4b   : > { %s1778_s24 = sand.u32 (!%p2325_p10), 1, %s1608_s13   ;;  %p2326_p5 = scmp.ne.s32.totalorder (!%p2325_p10), %s2318_s18, 0 }
  0x4c   : > { %177 = sbr.rel (%p2325_p10) target bundleno = 970 (0x3ca), region = 32  ;;  %s1313_s26 = sshll.u32 (!%p2325_p10), %s1778_s24, 3 }
  0x4d   : > { %s180_s30 = scalar_lea.sflag (!%p2325_p10), [#allocation3], %s1778_s24  ;;  %s1782_s4 = scalar_lea.vmem (!%p2325_p10), [#allocation2], %s1313_s26 }
  0x51   : > { %1591 = dma.done.wait (%p2326_p5), %s180_s30, 128  }
  0x52   : > { %1593 = vsyncadd (%p2326_p5), %s180_s30, 4294967168  ;;  %p2327_p8 = scmp.eq.s32.totalorder %s1681_s16, 0 }
  0x54   : > { %1595 = dma.done.wait (%p2327_p8), [#allocation6], 2048   ;;  %p2328_p11 = pmov %p2327_p8 }
  0x55   : > { %v1623_v0 = vmov 0   ;;  %v1624_v1 = vmov 1   ;;  %v224_v2 = vld [vmem:[#allocation7] sm:$0xf]  ;;  %v1795_v3 = vld [vmem:[%s1782_s4] sm:$0xff]  ;;  %v1625_v4 = vmov 6   ;;  %v235_v14 = vlaneseq }
  0x56   : > { %1597 = vsyncadd (%p2328_p11), [#allocation6], 4294965248  ;;  %1411 = vset.pattern.permute.xlu1 %v1623_v0  ;;  %1409 = vset.pattern.permute.xlu0 %v1624_v1  ;;  %v1626_v5 = vmov 7   ;;  %v1800_v6 = vmax.f32 %v1795_v3, 0.0  ;;  %s1627_s18 = smov 1   ;;  %v1628_v7 = vmov 2  }
  0x57   : > { %306 = vperm.xlu1 %1411, %v224_v2   ;;  %312 = vperm.xlu0 %1409, %v224_v2   ;;  %v1629_v9 = vmov 8   ;;  %s1630_s20 = smov 127   ;;  %v1631_v10 = vmov 4   ;;  %v1632_v11 = vmov 3   ;;  %v1633_v12 = vmov 5   ;;  %v1816_v13 = vld [vmem:[#allocation7 + $0x8] sm:$0xff] }
  0x58   : > { %v229_v8 = vcombine.high %v1800_v6, %v1800_v6  ;;  %v1634_v15 = vmov 839922192   ;;  %v1821_v19 = vshrl.u32 %v235_v14, 7  ;;  %v1830_v26 = vand.u32 127, %v235_v14  ;;  %s1635_s25 = smov 16   ;;  %s1636_s27 = smov 112  }
  0x59   : > { %v284_v16 = vunpack.c.l.s4 %v1634_v15  ;;  %v217_v27 = vld [vmem:[#allocation5] ss:$4 sm:$0x3]  ;;  %v219_v33 = vld [vmem:[#allocation5 + $0x1] ss:$4 sm:$0x3] }
  0x5a   : > { %v1825_v24 = vsub.s32 0, %v1821_v19  ;;  %v1828_v25 = vsub.s32 1, %v1821_v19  ;;  %vm237_vm0 = vcmp.lt.s32.totalorder %v1830_v26, 1  ;;  %vm257_vm1 = vcmp.lt.s32.totalorder %v1830_v26, 127  ;;  %s1316_s28 = sshll.u32 %s1778_s24, 5  ;;  %s1323_s6 = sshll.u32 %s1681_s16, 8 }
  0x5b   : > { %1413 = vset.pattern.permute.xlu1 %v1625_v4  ;;  %1410 = vset.pattern.permute.xlu0 %v1626_v5  ;;  %v285_v20 = vunpack.c.0.s8 %v284_v16  ;;  %vm340_vm2 = vcmp.lt.s32.totalorder %v1830_v26, 16  ;;  %vm393_vm3 = vcmp.lt.s32.totalorder %v1830_v26, 112  ;;  %s213_s29 = scalar_lea.vmem [#allocation8], %s1316_s28  ;;  %s2266_s21 = scalar_lea.hbm %s2313_s3, %s1323_s6 }
  0x5c   : > { %359 = vperm.xlu1 %1413, %v224_v2   ;;  %365 = vperm.xlu0 %1410, %v224_v2   ;;  %v1834_v31 = vrot.slane %v217_v27, %v1825_v24  ;;  %v1837_v32 = vrot.slane %v217_v27, %v1828_v25  ;;  %v1848_v42 = vrot.slane %v219_v33, %v1825_v24  ;;  %s1212_s5 = sshll.u32 %s213_s29, 4  ;;  %s1199_s16 = scalar_lea.sflag [#allocation4], %s1778_s24  ;;  %s2261_s5 = int_to_ptr.vmem [resolvable:$true] %s1212_s5 }
  0x5d   : > { %v288_v23 = vsub.s32 %v285_v20, %v1821_v19  ;;  %v1851_v43 = vrot.slane %v219_v33, %v1828_v25  ;;  %s1548_s17 = scalar_lea.vmem %s2261_s5, 512  ;;  %p2329_p0 = scmp.ne.s32.totalorder %s2323_s10, 0 }
  0x5e   : > { %p1549_p13 = scmp.ne.s32.totalorder %s2261_s5, %s1548_s17  ;;  %s1637_s22 = smov [#allocation8]  }
  0x5f   : > { %s1552_s23 = sshll.u32 %s1637_s22, 4  ;;  %s1553_s23 = int_to_ptr.vmem [resolvable:$false] %s1552_s23 }
  0x60   : > { %231 = vrot.lane.b32.xlu1 %v1800_v6, %s1627_s18  ;;  %1412 = vset.pattern.permute.xlu0 %v1628_v7  ;;  %p1550_p1 = pnand %p1549_p13, %p2329_p0  ;;  %s1554_s26 = scalar_lea.vmem %s1553_s23, 1024 }
  0x61   : > { %329 = vperm.xlu0 %1412, %v224_v2   ;;  %1414 = vset.pattern.permute.xlu1 %v1629_v9  ;;  %p1555_p4 = scmp.lt.s32.totalorder %s2261_s5, %s1553_s23  ;;  %p1556_p6 = scmp.lt.s32.totalorder %s1554_s26, %s1548_s17 }
  0x62   : > { %p1551_p2 = pneg %p1550_p1 }
  0x63   : > { %p1557_p9 = por %p1556_p6, %p1555_p4 }
  0x64   : > { %233 = vrot.lane.b32.xlu1 %v229_v8, %s1627_s18 }
  0x65   : > { %255 = vrot.lane.b32.xlu0 %v229_v8, %s1630_s20  ;;  %p1558_p12 = pnand %p1557_p9, %p1551_p2 }
  0x66   : > { %1415 = vset.pattern.permute.xlu0 %v1631_v10 }
  0x68   : > { %253 = vrot.lane.b32.xlu1 %v1800_v6, %s1630_s20 }
  0x69   : > { %281 = vperm.xlu0 %1415, %v224_v2  }
  0x6c   : > { %382 = vperm.xlu1 %1414, %v224_v2  }
  0x6d   : > { %1418 = vset.pattern.permute.xlu0 %v1623_v0 }
  0x70   : > { %1416 = vset.pattern.permute.xlu1 %v1632_v11 }
  0x71   : > { %275 = vperm.xlu1 %1416, %v224_v2  }
  0x75   : > { %1417 = vset.pattern.permute.xlu1 %v1633_v12 }
  0x76   : > { %298 = vperm.xlu1 %1417, %v224_v2  }
  0x7a   : > { %1419 = vset.pattern.permute.xlu1 %v1624_v1 }
  0x7b   : > { %427 = vperm.xlu1 %1419, %v1816_v13  }
  0x7f   : > { %1420 = vset.pattern.permute.xlu1 %v1628_v7 }
  0xd2   : > { %v307_v17 = vpop.permute.xlu1 %306  ;;  %v313_v18 = vpop.permute.xlu0 %312 }
  0xd3   : > { %v320_v29 = vrot.slane %v313_v18, %v288_v23 }
  0xd5   : > { %v322_v35 = vmul.f32 %v320_v29, %v1800_v6 }
  0xd7   : > { %v360_v21 = vpop.permute.xlu1 %359  ;;  %v366_v22 = vpop.permute.xlu0 %365  ;;  %v324_v47 = vcombine.high %v322_v35, %v322_v35 }
  0xd8   : > { %v373_v36 = vrot.slane %v366_v22, %v288_v23 }
  0xda   : > { %v375_v48 = vmul.f32 %v373_v36, %v1800_v6  ;;  %v226_v36 = vld [vmem:[#allocation7 + $0x10] sm:$0xff] }
  0xdb   : > { %v232_v28 = vpop.permute.xlu1 %231 }
  0xdc   : > { %v330_v30 = vpop.permute.xlu0 %329  ;;  %v377_v63 = vcombine.high %v375_v48, %v375_v48 }
  0xdf   : > { %v234_v34 = vpop.permute.xlu1 %233 }
  0xe0   : > { %v238_v37 = vsel %vm237_vm0, %v232_v28, %v234_v34  ;;  %v239_v38 = vsel %vm237_vm0, %v234_v34, %v232_v28  ;;  %v256_v39 = vpop.permute.xlu0 %255 }
  0xe1   : > { %v251_v40 = vmul.f32 %v1834_v31, %v239_v38  ;;  %v252_v41 = vmul.f32 %v1837_v32, %v238_v37  ;;  %v1870_v37 = vld [vmem:[#allocation7 + $0x18] sm:$0xff] }
  0xe2   : > { %v221_v38 = vld [vmem:[#allocation5 + $0x2] ss:$4 sm:$0x3] }
  0xe3   : > { %v254_v44 = vpop.permute.xlu1 %253  ;;  %v310_v45 = vmul.f32 %v307_v17, %v252_v41  ;;  %v309_v46 = vmul.f32 %v307_v17, %v251_v40  ;;  %v363_v56 = vmul.f32 %v360_v21, %v252_v41  ;;  %v362_v57 = vmul.f32 %v360_v21, %v251_v40 }
  0xe4   : > { %v258_v49 = vsel %vm257_vm1, %v254_v44, %v256_v39  ;;  %v259_v50 = vsel %vm257_vm1, %v256_v39, %v254_v44  ;;  %v282_v51 = vpop.permute.xlu0 %281  ;;  %v223_v39 = vld [vmem:[#allocation5 + $0x3] ss:$4 sm:$0x3]  ;;  %v1888_v44 = vrot.slane %v221_v38, %v1828_v25 }
  0xe5   : > { %v271_v52 = vmul.f32 %v1848_v42, %v258_v49  ;;  %v272_v53 = vmul.f32 %v1851_v43, %v259_v50  ;;  %v289_v54 = vrot.slane %v282_v51, %v288_v23  ;;  %v327_v55 = vadd.f32 %v324_v47, %v310_v45 }
  0xe6   : > { %v326_v61 = vadd.f32 %v322_v35, %v309_v46  ;;  %v380_v17 = vadd.f32 %v377_v63, %v363_v56  ;;  %v379_v18 = vadd.f32 %v375_v48, %v362_v57  ;;  %v1896_v48 = vrot.slane %v223_v39, %v1825_v24 }
  0xe7   : > { %v383_v58 = vpop.permute.xlu1 %382  ;;  %v291_v59 = vmul.f32 %v289_v54, %v1800_v6  ;;  %v333_v60 = vmul.f32 %v330_v30, %v272_v53  ;;  %v332_v62 = vmul.f32 %v330_v30, %v271_v52  ;;  %v1899_v49 = vrot.slane %v223_v39, %v1828_v25 }
  0xe8   : > { %v385_v2 = vmul.f32 %v383_v58, %v271_v52  ;;  %v386_v8 = vmul.f32 %v383_v58, %v272_v53 }
  0xe9   : > { %v335_v14 = vadd.f32 %v333_v60, %v327_v55  ;;  %v334_v15 = vadd.f32 %v332_v62, %v326_v61  ;;  %v293_v16 = vcombine.high %v291_v59, %v291_v59  ;;  %v1910_v62 = vsub.s32 2, %v1821_v19 }
  0xea   : > { %v388_v6 = vadd.f32 %v386_v8, %v380_v17  ;;  %v387_v23 = vadd.f32 %v385_v2, %v379_v18 }
  0xeb   : > { %338 = vrot.lane.b32.xlu1 %v335_v14, %s1635_s25  ;;  %336 = vrot.lane.b32.xlu0 %v334_v15, %s1635_s25 }
  0xec   : > { %v276_v20 = vpop.permute.xlu1 %275 }
  0xed   : > { %v278_v21 = vmul.f32 %v276_v20, %v251_v40  ;;  %v279_v22 = vmul.f32 %v276_v20, %v252_v41  ;;  %v1885_v41 = vrot.slane %v221_v38, %v1825_v24  ;;  %v1919_v20 = vsub.s32 3, %v1821_v19 }
  0xef   : > { %v295_v27 = vadd.f32 %v291_v59, %v278_v21  ;;  %v296_v28 = vadd.f32 %v293_v16, %v279_v22  ;;  %391 = vrot.lane.b32.xlu1 %v388_v6, %s1636_s27  ;;  %389 = vrot.lane.b32.xlu0 %v387_v23, %s1636_s27 }
  0xf1   : > { %v299_v29 = vpop.permute.xlu1 %298 }
  0xf2   : > { %v301_v30 = vmul.f32 %v299_v29, %v271_v52  ;;  %v302_v33 = vmul.f32 %v299_v29, %v272_v53 }
  0xf3   : > { %443 = vperm.xlu1 %1420, %v1816_v13   ;;  %413 = vperm.xlu0 %1418, %v1816_v13  }
  0xf4   : > { %v303_v34 = vadd.f32 %v301_v30, %v295_v27  ;;  %v304_v35 = vadd.f32 %v302_v33, %v296_v28 }
  0xf7   : > { %1422 = vset.pattern.permute.xlu1 %v1623_v0  ;;  %1421 = vset.pattern.permute.xlu0 %v1632_v11 }
  0xf8   : > { %476 = vperm.xlu1 %1422, %v226_v36   ;;  %459 = vperm.xlu0 %1421, %v1816_v13   ;;  %v428_v13 = vpop.permute.xlu1 %427 }
  0xfc   : > { %526 = vperm.xlu1 %1422, %v1870_v37   ;;  %1423 = vset.pattern.permute.xlu0 %v1624_v1 }
  0xfd   : > { %532 = vperm.xlu0 %1423, %v1870_v37  }
 0x100   : > { %1425 = vset.pattern.permute.xlu1 %v1625_v4 }
 0x101   : > { %558 = vperm.xlu1 %1425, %v1870_v37   ;;  %1424 = vset.pattern.permute.xlu0 %v1628_v7 }
 0x102   : > { %540 = vperm.xlu0 %1424, %v1870_v37  }
 0x105   : > { %1426 = vset.pattern.permute.xlu1 %v1626_v5 }
 0x106   : > { %564 = vperm.xlu1 %1426, %v1870_v37   ;;  %1427 = vset.pattern.permute.xlu0 %v1629_v9 }
 0x10a   : > { %1428 = vset.pattern.permute.xlu1 %v1632_v11 }
 0x15d   : > { %v337_v40 = vpop.permute.xlu0 %336  ;;  %v339_v45 = vpop.permute.xlu1 %338 }
 0x15e   : > { %v341_v46 = vsel %vm340_vm2, %v337_v40, %v339_v45  ;;  %v342_v47 = vsel %vm340_vm2, %v339_v45, %v337_v40 }
 0x15f   : > { %v354_v50 = vmul.f32 %v1885_v41, %v342_v47  ;;  %v355_v51 = vmul.f32 %v1888_v44, %v341_v46 }
 0x161   : > { %v390_v52 = vpop.permute.xlu0 %389  ;;  %v392_v53 = vpop.permute.xlu1 %391  ;;  %v356_v58 = vadd.f32 %v354_v50, %v303_v34  ;;  %v357_v59 = vadd.f32 %v355_v51, %v304_v35 }
 0x162   : > { %v394_v54 = vsel %vm393_vm3, %v390_v52, %v392_v53  ;;  %v395_v55 = vsel %vm393_vm3, %v392_v53, %v390_v52  ;;  %v1939_v53 = vld [vmem:[#allocation7 + $0x20] sm:$0xff] }
 0x163   : > { %v407_v56 = vmul.f32 %v1896_v48, %v394_v54  ;;  %v408_v57 = vmul.f32 %v1899_v49, %v395_v55 }
 0x165   : > { %v409_v60 = vadd.f32 %v407_v56, %v356_v58  ;;  %v410_v61 = vadd.f32 %v408_v57, %v357_v59 }
 0x167   : > { %v433_v63 = vrot.slane %v409_v60, %v1828_v25  ;;  %v437_v2 = vrot.slane %v410_v61, %v1828_v25  ;;  %v419_v8 = vrot.slane %v409_v60, %v1825_v24  ;;  %v423_v14 = vrot.slane %v410_v61, %v1825_v24 }
 0x168   : > { %v449_v16 = vrot.slane %v409_v60, %v1910_v62  ;;  %v453_v17 = vrot.slane %v410_v61, %v1910_v62  ;;  %v465_v33 = vrot.slane %v409_v60, %v1919_v20  ;;  %v469_v34 = vrot.slane %v410_v61, %v1919_v20 }
 0x169   : > { %v438_v6 = vmul.f32 %v433_v63, %v428_v13  ;;  %v439_v23 = vmul.f32 %v437_v2, %v428_v13 }
 0x16e   : > { %v414_v15 = vpop.permute.xlu0 %413  ;;  %v444_v18 = vpop.permute.xlu1 %443 }
 0x16f   : > { %v424_v21 = vmul.f32 %v419_v8, %v414_v15  ;;  %v425_v22 = vmul.f32 %v423_v14, %v414_v15  ;;  %v454_v29 = vmul.f32 %v449_v16, %v444_v18  ;;  %v455_v30 = vmul.f32 %v453_v17, %v444_v18 }
 0x171   : > { %v440_v27 = vadd.f32 %v438_v6, %v424_v21  ;;  %v441_v28 = vadd.f32 %v439_v23, %v425_v22 }
 0x173   : > { %v456_v35 = vadd.f32 %v454_v29, %v440_v27  ;;  %v457_v36 = vadd.f32 %v455_v30, %v441_v28  ;;  %v460_v38 = vpop.permute.xlu0 %459  ;;  %v477_v47 = vpop.permute.xlu1 %476 }
 0x174   : > { %v470_v39 = vmul.f32 %v465_v33, %v460_v38  ;;  %v471_v40 = vmul.f32 %v469_v34, %v460_v38 }
 0x176   : > { %v472_v45 = vadd.f32 %v470_v39, %v456_v35  ;;  %v473_v46 = vadd.f32 %v471_v40, %v457_v36 }
 0x177   : > { %v527_v54 = vpop.permute.xlu1 %526 }
 0x178   : > { %v479_v50 = vadd.f32 %v477_v47, %v472_v45  ;;  %v480_v51 = vadd.f32 %v477_v47, %v473_v46  ;;  %v533_v57 = vpop.permute.xlu0 %532 }
 0x17a   : > { %v1923_v52 = vmax.f32 %v479_v50, 0.0  ;;  %v1929_v13 = vmax.f32 %v480_v51, 0.0 }
 0x17c   : > { %494 = vrot.lane.b32.xlu0 %v1923_v52, %s1630_s20  ;;  %486 = vrot.lane.b32.xlu1 %v1923_v52, %s1627_s18  ;;  %v559_v55 = vpop.permute.xlu1 %558  ;;  %v535_v18 = vmul.f32 %v533_v57, %v1923_v52  ;;  %v536_v30 = vmul.f32 %v533_v57, %v1929_v13 }
 0x17d   : > { %v541_v59 = vpop.permute.xlu0 %540 }
 0x180   : > { %572 = vperm.xlu0 %1427, %v1870_v37   ;;  %488 = vrot.lane.b32.xlu1 %v1929_v13, %s1627_s18 }
 0x181   : > { %v565_v56 = vpop.permute.xlu1 %564 }
 0x182   : > { %v567_v23 = vmul.f32 %v565_v56, %v1923_v52  ;;  %v568_v46 = vmul.f32 %v565_v56, %v1929_v13 }
 0x184   : > { %1430 = vset.pattern.permute.xlu0 %v1633_v12  ;;  %496 = vrot.lane.b32.xlu1 %v1929_v13, %s1630_s20 }
 0x185   : > { %518 = vperm.xlu0 %1430, %v1870_v37  }
 0x188   : > { %504 = vperm.xlu1 %1428, %v1870_v37  }
 0x189   : > { %1431 = vset.pattern.permute.xlu0 %v1623_v0 }
 0x18a   : > { %591 = vperm.xlu0 %1431, %v1939_v53  }
 0x18c   : > { %1429 = vset.pattern.permute.xlu1 %v1631_v10 }
 0x18d   : > { %510 = vperm.xlu1 %1429, %v1870_v37  }
 0x18e   : > { %1434 = vset.pattern.permute.xlu0 %v1632_v11 }
 0x191   : > { %1432 = vset.pattern.permute.xlu1 %v1624_v1 }
 0x192   : > { %605 = vperm.xlu1 %1432, %v1939_v53  }
 0x196   : > { %1433 = vset.pattern.permute.xlu1 %v1628_v7 }
 0x1ee   : > { %v487_v58 = vpop.permute.xlu1 %486  ;;  %v495_v2 = vpop.permute.xlu0 %494 }
 0x1f2   : > { %v489_v60 = vpop.permute.xlu1 %488 }
 0x1f3   : > { %v490_v61 = vsel %vm237_vm0, %v487_v58, %v489_v60  ;;  %v491_v37 = vsel %vm237_vm0, %v489_v60, %v487_v58 }
 0x1f4   : > { %v492_v63 = vmul.f32 %v491_v37, %v1834_v31  ;;  %v493_v8 = vmul.f32 %v490_v61, %v1837_v32 }
 0x1f6   : > { %v529_v14 = vmul.f32 %v527_v54, %v492_v63  ;;  %v497_v15 = vpop.permute.xlu1 %496  ;;  %v561_v21 = vmul.f32 %v559_v55, %v492_v63  ;;  %v530_v27 = vmul.f32 %v527_v54, %v493_v8  ;;  %v562_v39 = vmul.f32 %v559_v55, %v493_v8 }
 0x1f7   : > { %v498_v16 = vsel %vm257_vm1, %v495_v2, %v497_v15  ;;  %v499_v17 = vsel %vm257_vm1, %v497_v15, %v495_v2 }
 0x1f8   : > { %v500_v22 = vmul.f32 %v498_v16, %v1848_v42  ;;  %v501_v6 = vmul.f32 %v499_v17, %v1851_v43  ;;  %v537_v28 = vadd.f32 %v535_v18, %v529_v14  ;;  %v569_v34 = vadd.f32 %v567_v23, %v561_v21  ;;  %v1975_v18 = vld [vmem:[#allocation7 + $0x30] sm:$0xff] }
 0x1f9   : > { %v538_v45 = vadd.f32 %v536_v30, %v530_v27  ;;  %v570_v51 = vadd.f32 %v568_v46, %v562_v39 }
 0x1fa   : > { %v543_v29 = vmul.f32 %v541_v59, %v500_v22  ;;  %v544_v38 = vmul.f32 %v541_v59, %v501_v6 }
 0x1fb   : > { %v573_v33 = vpop.permute.xlu0 %572 }
 0x1fc   : > { %v575_v35 = vmul.f32 %v573_v33, %v500_v22  ;;  %v545_v36 = vadd.f32 %v543_v29, %v537_v28  ;;  %v576_v47 = vmul.f32 %v573_v33, %v501_v6  ;;  %v546_v50 = vadd.f32 %v544_v38, %v538_v45 }
 0x1fe   : > { %v577_v40 = vadd.f32 %v575_v35, %v569_v34  ;;  %547 = vrot.lane.b32.xlu1 %v545_v36, %s1635_s25  ;;  %v578_v57 = vadd.f32 %v576_v47, %v570_v51 }
 0x200   : > { %579 = vrot.lane.b32.xlu0 %v577_v40, %s1636_s27  ;;  %v519_v55 = vpop.permute.xlu0 %518 }
 0x201   : > { %v521_v37 = vmul.f32 %v519_v55, %v500_v22  ;;  %v522_v2 = vmul.f32 %v519_v55, %v501_v6 }
 0x202   : > { %549 = vrot.lane.b32.xlu1 %v546_v50, %s1635_s25 }
 0x203   : > { %v505_v54 = vpop.permute.xlu1 %504 }
 0x204   : > { %637 = vperm.xlu0 %1434, %v1939_v53   ;;  %v507_v59 = vmul.f32 %v505_v54, %v492_v63  ;;  %v508_v60 = vmul.f32 %v505_v54, %v493_v8 }
 0x206   : > { %581 = vrot.lane.b32.xlu1 %v578_v57, %s1636_s27 }
 0x208   : > { %1437 = vset.pattern.permute.xlu0 %v1625_v4  ;;  %v511_v58 = vpop.permute.xlu1 %510 }
 0x209   : > { %v513_v56 = vmul.f32 %v511_v58, %v1923_v52  ;;  %v514_v61 = vmul.f32 %v511_v58, %v1929_v13  ;;  %685 = vperm.xlu0 %1437, %v1939_v53   ;;  %v483_v52 = vld [vmem:[#allocation7 + $0x28] sm:$0xff] }
 0x20a   : > { %621 = vperm.xlu1 %1433, %v1939_v53  }
 0x20b   : > { %v515_v14 = vadd.f32 %v513_v56, %v507_v59  ;;  %v516_v15 = vadd.f32 %v514_v61, %v508_v60  ;;  %v2016_v56 = vsub.s32 4, %v1821_v19 }
 0x20d   : > { %v523_v16 = vadd.f32 %v521_v37, %v515_v14  ;;  %v524_v17 = vadd.f32 %v522_v2, %v516_v15  ;;  %1441 = vset.pattern.permute.xlu0 %v1628_v7 }
 0x20e   : > { %1435 = vset.pattern.permute.xlu1 %v1631_v10  ;;  %784 = vperm.xlu0 %1441, %v1975_v18  }
 0x20f   : > { %653 = vperm.xlu1 %1435, %v1939_v53  }
 0x212   : > { %1444 = vset.pattern.permute.xlu0 %v1629_v9  ;;  %v606_v9 = vpop.permute.xlu1 %605 }
 0x213   : > { %1436 = vset.pattern.permute.xlu1 %v1633_v12 }
 0x214   : > { %669 = vperm.xlu1 %1436, %v1939_v53  }
 0x218   : > { %1438 = vset.pattern.permute.xlu1 %v1626_v5 }
 0x219   : > { %701 = vperm.xlu1 %1438, %v1939_v53   ;;  %v592_v53 = vpop.permute.xlu0 %591 }
 0x21d   : > { %1439 = vset.pattern.permute.xlu1 %v1623_v0 }
 0x21e   : > { %718 = vperm.xlu1 %1439, %v483_v52   ;;  %v2019_v52 = vsub.s32 5, %v1821_v19 }
 0x222   : > { %770 = vperm.xlu1 %1439, %v1975_v18  }
 0x226   : > { %1440 = vset.pattern.permute.xlu1 %v1624_v1 }
 0x227   : > { %776 = vperm.xlu1 %1440, %v1975_v18  }
 0x22b   : > { %1442 = vset.pattern.permute.xlu1 %v1625_v4 }
 0x22c   : > { %802 = vperm.xlu1 %1442, %v1975_v18  }
 0x230   : > { %1443 = vset.pattern.permute.xlu1 %v1626_v5 }
 0x231   : > { %808 = vperm.xlu1 %1443, %v1975_v18  }
 0x235   : > { %1445 = vset.pattern.permute.xlu1 %v1631_v10 }
 0x270   : > { %v548_v13 = vpop.permute.xlu1 %547 }
 0x272   : > { %v580_v23 = vpop.permute.xlu0 %579 }
 0x274   : > { %v550_v63 = vpop.permute.xlu1 %549 }
 0x275   : > { %v551_v8 = vsel %vm340_vm2, %v548_v13, %v550_v63  ;;  %v552_v21 = vsel %vm340_vm2, %v550_v63, %v548_v13 }
 0x276   : > { %v553_v22 = vmul.f32 %v552_v21, %v1885_v41  ;;  %v554_v6 = vmul.f32 %v551_v8, %v1888_v44  ;;  %v2024_v21 = vsub.s32 6, %v1821_v19 }
 0x278   : > { %v582_v27 = vpop.permute.xlu1 %581  ;;  %v555_v30 = vadd.f32 %v553_v22, %v523_v16  ;;  %v556_v33 = vadd.f32 %v554_v6, %v524_v17 }
 0x279   : > { %v583_v28 = vsel %vm393_vm3, %v580_v23, %v582_v27  ;;  %v584_v29 = vsel %vm393_vm3, %v582_v27, %v580_v23 }
 0x27a   : > { %v585_v34 = vmul.f32 %v583_v28, %v1896_v48  ;;  %v586_v35 = vmul.f32 %v584_v29, %v1899_v49 }
 0x27c   : > { %v587_v36 = vadd.f32 %v585_v34, %v555_v30  ;;  %v588_v38 = vadd.f32 %v586_v35, %v556_v33 }
 0x27e   : > { %v597_v39 = vrot.slane %v587_v36, %v1825_v24  ;;  %v601_v40 = vrot.slane %v588_v38, %v1825_v24  ;;  %v611_v45 = vrot.slane %v587_v36, %v1828_v25  ;;  %v615_v46 = vrot.slane %v588_v38, %v1828_v25 }
 0x27f   : > { %v627_v57 = vrot.slane %v587_v36, %v1910_v62  ;;  %v631_v55 = vrot.slane %v588_v38, %v1910_v62  ;;  %v643_v58 = vrot.slane %v587_v36, %v1919_v20  ;;  %v647_v59 = vrot.slane %v588_v38, %v1919_v20  ;;  %v638_v15 = vpop.permute.xlu0 %637 }
 0x280   : > { %v602_v47 = vmul.f32 %v597_v39, %v592_v53  ;;  %v603_v50 = vmul.f32 %v601_v40, %v592_v53  ;;  %v616_v51 = vmul.f32 %v611_v45, %v606_v9  ;;  %v617_v54 = vmul.f32 %v615_v46, %v606_v9 }
 0x281   : > { %v648_v9 = vmul.f32 %v643_v58, %v638_v15  ;;  %v649_v13 = vmul.f32 %v647_v59, %v638_v15  ;;  %v659_v53 = vrot.slane %v587_v36, %v2016_v56  ;;  %v663_v63 = vrot.slane %v588_v38, %v2016_v56 }
 0x282   : > { %v618_v61 = vadd.f32 %v616_v51, %v602_v47  ;;  %v619_v37 = vadd.f32 %v617_v54, %v603_v50  ;;  %v675_v28 = vrot.slane %v587_v36, %v2019_v52  ;;  %v679_v29 = vrot.slane %v588_v38, %v2019_v52 }
 0x283   : > { %v691_v33 = vrot.slane %v587_v36, %v2024_v21  ;;  %v695_v34 = vrot.slane %v588_v38, %v2024_v21  ;;  %v2031_v39 = vsub.s32 7, %v1821_v19 }
 0x284   : > { %v686_v30 = vpop.permute.xlu0 %685 }
 0x285   : > { %v622_v60 = vpop.permute.xlu1 %621  ;;  %v696_v50 = vmul.f32 %v691_v33, %v686_v30  ;;  %v697_v51 = vmul.f32 %v695_v34, %v686_v30  ;;  %v711_v58 = vrot.slane %v588_v38, %v2031_v39  ;;  %v2055_v38 = vld [vmem:[#allocation7 + $0x40] sm:$0xff] }
 0x286   : > { %v632_v2 = vmul.f32 %v627_v57, %v622_v60  ;;  %v633_v14 = vmul.f32 %v631_v55, %v622_v60  ;;  %v707_v55 = vrot.slane %v587_v36, %v2031_v39  ;;  %v2049_v36 = vld [vmem:[#allocation7 + $0x38] sm:$0xff] }
 0x288   : > { %v634_v16 = vadd.f32 %v632_v2, %v618_v61  ;;  %v635_v17 = vadd.f32 %v633_v14, %v619_v37 }
 0x28a   : > { %v654_v8 = vpop.permute.xlu1 %653  ;;  %v650_v22 = vadd.f32 %v648_v9, %v634_v16  ;;  %v651_v6 = vadd.f32 %v649_v13, %v635_v17 }
 0x28b   : > { %v664_v23 = vmul.f32 %v659_v53, %v654_v8  ;;  %v665_v27 = vmul.f32 %v663_v63, %v654_v8  ;;  %v2076_v53 = vld [vmem:[#allocation7 + $0x58] sm:$0xff]  ;;  %v785_v8 = vpop.permute.xlu0 %784 }
 0x28d   : > { %v666_v40 = vadd.f32 %v664_v23, %v650_v22  ;;  %v667_v45 = vadd.f32 %v665_v27, %v651_v6 }
 0x28f   : > { %v670_v35 = vpop.permute.xlu1 %669 }
 0x290   : > { %v680_v46 = vmul.f32 %v675_v28, %v670_v35  ;;  %v681_v47 = vmul.f32 %v679_v29, %v670_v35 }
 0x292   : > { %v682_v54 = vadd.f32 %v680_v46, %v666_v40  ;;  %v683_v57 = vadd.f32 %v681_v47, %v667_v45 }
 0x294   : > { %v702_v59 = vpop.permute.xlu1 %701  ;;  %v698_v60 = vadd.f32 %v696_v50, %v682_v54  ;;  %v699_v61 = vadd.f32 %v697_v51, %v683_v57 }
 0x295   : > { %v712_v37 = vmul.f32 %v707_v55, %v702_v59  ;;  %v713_v2 = vmul.f32 %v711_v58, %v702_v59 }
 0x297   : > { %v714_v14 = vadd.f32 %v712_v37, %v698_v60  ;;  %v715_v19 = vadd.f32 %v713_v2, %v699_v61 }
 0x299   : > { %v719_v15 = vpop.permute.xlu1 %718 }
 0x29a   : > { %v721_v16 = vadd.f32 %v719_v15, %v714_v14  ;;  %v722_v17 = vadd.f32 %v719_v15, %v715_v19 }
 0x29c   : > { %v2035_v9 = vmax.f32 %v721_v16, 0.0  ;;  %v2037_v13 = vmax.f32 %v722_v17, 0.0 }
 0x29e   : > { %732 = vrot.lane.b32.xlu1 %v2037_v13, %s1627_s18  ;;  %730 = vrot.lane.b32.xlu0 %v2035_v9, %s1627_s18 }
 0x2a2   : > { %740 = vrot.lane.b32.xlu1 %v2037_v13, %s1630_s20  ;;  %738 = vrot.lane.b32.xlu0 %v2035_v9, %s1630_s20 }
 0x2a6   : > { %754 = vperm.xlu1 %1445, %v1975_v18   ;;  %816 = vperm.xlu0 %1444, %v1975_v18  }
 0x2aa   : > { %1446 = vset.pattern.permute.xlu1 %v1633_v12  ;;  %1447 = vset.pattern.permute.xlu0 %v1623_v0 }
 0x2ab   : > { %762 = vperm.xlu1 %1446, %v1975_v18   ;;  %835 = vperm.xlu0 %1447, %v2049_v36  }
 0x2af   : > { %1448 = vset.pattern.permute.xlu0 %v1632_v11  ;;  %1449 = vset.pattern.permute.xlu1 %v1623_v0 }
 0x2b0   : > { %748 = vperm.xlu0 %1448, %v1975_v18   ;;  %840 = vperm.xlu1 %1449, %v2055_v38   ;;  %v2071_v18 = vld [vmem:[#allocation7 + $0x60] sm:$0xff] }
 0x2b4   : > { %1450 = vset.pattern.permute.xlu1 %v1624_v1  ;;  %904 = vperm.xlu0 %1448, %v2049_v36  }
 0x2b5   : > { %856 = vperm.xlu1 %1450, %v2049_v36  }
 0x2b8   : > { %1454 = vset.pattern.permute.xlu0 %v1631_v10 }
 0x2b9   : > { %1451 = vset.pattern.permute.xlu1 %v1628_v7  ;;  %932 = vperm.xlu0 %1454, %v2055_v38  }
 0x2ba   : > { %880 = vperm.xlu1 %1451, %v2049_v36  }
 0x2bd   : > { %1455 = vset.pattern.permute.xlu0 %v1624_v1 }
 0x2be   : > { %884 = vperm.xlu1 %1451, %v2055_v38   ;;  %860 = vperm.xlu0 %1455, %v2055_v38  }
 0x2c2   : > { %1452 = vset.pattern.permute.xlu1 %v1632_v11  ;;  %1079 = vperm.xlu0 %1455, %v2071_v18  }
 0x2c3   : > { %908 = vperm.xlu1 %1452, %v2055_v38  }
 0x2c6   : > { %1460 = vset.pattern.permute.xlu0 %v1628_v7 }
 0x2c7   : > { %1453 = vset.pattern.permute.xlu1 %v1631_v10  ;;  %1109 = vperm.xlu0 %1460, %v2076_v53   ;;  %v771_v10 = vpop.permute.xlu1 %770 }
 0x2c8   : > { %928 = vperm.xlu1 %1453, %v2049_v36  }
 0x2cb   : > { %1463 = vset.pattern.permute.xlu0 %v1626_v5 }
 0x2cc   : > { %1456 = vset.pattern.permute.xlu1 %v1633_v12  ;;  %v777_v12 = vpop.permute.xlu1 %776 }
 0x2cd   : > { %952 = vperm.xlu1 %1456, %v2049_v36   ;;  %v779_v35 = vmul.f32 %v777_v12, %v2035_v9  ;;  %v780_v40 = vmul.f32 %v777_v12, %v2037_v13 }
 0x2d0   : > { %v803_v63 = vpop.permute.xlu1 %802 }
 0x2d1   : > { %956 = vperm.xlu1 %1456, %v2055_v38  }
 0x2d4   : > { %v809_v22 = vpop.permute.xlu1 %808 }
 0x2d5   : > { %1457 = vset.pattern.permute.xlu1 %v1623_v0  ;;  %v811_v58 = vmul.f32 %v809_v22, %v2035_v9  ;;  %v812_v59 = vmul.f32 %v809_v22, %v2037_v13 }
 0x2d6   : > { %1048 = vperm.xlu1 %1457, %v2071_v18  }
 0x2da   : > { %1458 = vset.pattern.permute.xlu1 %v1624_v1 }
 0x2db   : > { %1075 = vperm.xlu1 %1458, %v2076_v53  }
 0x2df   : > { %1459 = vset.pattern.permute.xlu1 %v1625_v4 }
 0x2e0   : > { %976 = vperm.xlu1 %1459, %v2049_v36  }
 0x2e4   : > { %980 = vperm.xlu1 %1459, %v2055_v38  }
 0x2e8   : > { %1461 = vset.pattern.permute.xlu1 %v1628_v7 }
 0x2e9   : > { %1113 = vperm.xlu1 %1461, %v2071_v18  }
 0x2ed   : > { %1462 = vset.pattern.permute.xlu1 %v1626_v5 }
 0x310   : > { %v731_v1 = vpop.permute.xlu0 %730  ;;  %v733_v6 = vpop.permute.xlu1 %732 }
 0x311   : > { %v734_v4 = vsel %vm237_vm0, %v731_v1, %v733_v6  ;;  %v735_v23 = vsel %vm237_vm0, %v733_v6, %v731_v1 }
 0x312   : > { %v736_v27 = vmul.f32 %v735_v23, %v1834_v31  ;;  %v737_v7 = vmul.f32 %v734_v4, %v1837_v32  ;;  %v726_v23 = vld [vmem:[#allocation7 + $0x48] sm:$0xff] }
 0x314   : > { %v773_v28 = vmul.f32 %v771_v10, %v736_v27  ;;  %v774_v29 = vmul.f32 %v771_v10, %v737_v7  ;;  %v739_v5 = vpop.permute.xlu0 %738  ;;  %v741_v30 = vpop.permute.xlu1 %740  ;;  %v805_v57 = vmul.f32 %v803_v63, %v736_v27  ;;  %v806_v55 = vmul.f32 %v803_v63, %v737_v7 }
 0x315   : > { %v742_v33 = vsel %vm257_vm1, %v739_v5, %v741_v30  ;;  %v743_v34 = vsel %vm257_vm1, %v741_v30, %v739_v5 }
 0x316   : > { %v744_v45 = vmul.f32 %v742_v33, %v1848_v42  ;;  %v745_v31 = vmul.f32 %v743_v34, %v1851_v43  ;;  %v782_v46 = vadd.f32 %v780_v40, %v774_v29  ;;  %v781_v47 = vadd.f32 %v779_v35, %v773_v28 }
 0x317   : > { %v813_v42 = vadd.f32 %v811_v58, %v805_v57  ;;  %v814_v61 = vadd.f32 %v812_v59, %v806_v55  ;;  %v1055_v55 = vrot.slane %v1795_v3, %v1825_v24  ;;  %v1059_v58 = vrot.slane %v1795_v3, %v2016_v56 }
 0x318   : > { %v788_v32 = vmul.f32 %v785_v8, %v745_v31  ;;  %v787_v50 = vmul.f32 %v785_v8, %v744_v45 }
 0x31a   : > { %v790_v51 = vadd.f32 %v788_v32, %v782_v46  ;;  %v789_v54 = vadd.f32 %v787_v50, %v781_v47  ;;  %v1085_v50 = vrot.slane %v1795_v3, %v1828_v25 }
 0x31c   : > { %793 = vrot.lane.b32.xlu1 %v790_v51, %s1635_s25  ;;  %791 = vrot.lane.b32.xlu0 %v789_v54, %s1635_s25  ;;  %v1089_v51 = vrot.slane %v1795_v3, %v2019_v52 }
 0x321   : > { %v817_v60 = vpop.permute.xlu0 %816  ;;  %v755_v19 = vpop.permute.xlu1 %754 }
 0x322   : > { %v819_v43 = vmul.f32 %v817_v60, %v744_v45  ;;  %v820_v37 = vmul.f32 %v817_v60, %v745_v31  ;;  %v757_v10 = vmul.f32 %v755_v19, %v2035_v9  ;;  %v758_v12 = vmul.f32 %v755_v19, %v2037_v13  ;;  %v1040_v9 = vld [vmem:[#allocation7 + $0x70] sm:$0xff] }
 0x323   : > { %v727_v13 = vld [vmem:[#allocation7 + $0x50] sm:$0xff] }
 0x324   : > { %v821_v2 = vadd.f32 %v819_v43, %v813_v42  ;;  %v822_v14 = vadd.f32 %v820_v37, %v814_v61  ;;  %v1095_v42 = vrot.slane %v1085_v50, %v1828_v25  ;;  %v1099_v61 = vrot.slane %v1089_v51, %v1828_v25 }
 0x325   : > { %v2169_v43 = vrot.slane %v1055_v55, %v1825_v24  ;;  %v2172_v37 = vrot.slane %v1059_v58, %v1825_v24 }
 0x326   : > { %825 = vrot.lane.b32.xlu1 %v822_v14, %s1636_s27  ;;  %823 = vrot.lane.b32.xlu0 %v821_v2, %s1636_s27  ;;  %v2116_v15 = vpop.permute.xlu0 %835  ;;  %v763_v16 = vpop.permute.xlu1 %762  ;;  %v1467_v14 = vld [vmem:[%s1782_s4] sm:$0xff] }
 0x327   : > { %v765_v22 = vmul.f32 %v763_v16, %v744_v45  ;;  %v766_v1 = vmul.f32 %v763_v16, %v745_v31  ;;  %v1119_v19 = vrot.slane %v1467_v14, %v1910_v62  ;;  %v1123_v16 = vrot.slane %v1467_v14, %v2024_v21 }
 0x32a   : > { %1000 = vperm.xlu1 %1462, %v2049_v36   ;;  %1004 = vperm.xlu0 %1463, %v2055_v38  }
 0x32b   : > { %v749_v17 = vpop.permute.xlu0 %748 }
 0x32c   : > { %v751_v63 = vmul.f32 %v749_v17, %v736_v27  ;;  %v752_v8 = vmul.f32 %v749_v17, %v737_v7  ;;  %v1039_v27 = vld [vmem:[#allocation7 + $0x68] sm:$0xff] }
 0x32e   : > { %v759_v6 = vadd.f32 %v757_v10, %v751_v63  ;;  %v760_v4 = vadd.f32 %v758_v12, %v752_v8  ;;  %1465 = vset.pattern.permute.xlu1 %v1632_v11  ;;  %1464 = vset.pattern.permute.xlu0 %v1623_v0  ;;  %v2128_v11 = vpop.permute.xlu1 %840  ;;  %v1153_v8 = vrot.slane %v1467_v14, %v1919_v20 }
 0x32f   : > { %1143 = vperm.xlu1 %1465, %v2076_v53   ;;  %1043 = vperm.xlu0 %1464, %v2076_v53  }
 0x330   : > { %v767_v36 = vadd.f32 %v765_v22, %v759_v6  ;;  %v768_v38 = vadd.f32 %v766_v1, %v760_v4  ;;  %v1157_v22 = vrot.slane %v1467_v14, %v2031_v39 }
 0x332   : > { %v2130_v7 = vpop.permute.xlu1 %856 }
 0x333   : > { %1147 = vperm.xlu1 %1465, %v2071_v18   ;;  %1025 = vperm.xlu0 %1464, %v726_v23  }
 0x336   : > { %v2132_v28 = vpop.permute.xlu1 %880 }
 0x337   : > { %1466 = vset.pattern.permute.xlu1 %v1623_v0  ;;  %1183 = vperm.xlu0 %1464, %v1040_v9   ;;  %v2144_v0 = vpop.permute.xlu0 %904 }
 0x338   : > { %1030 = vperm.xlu1 %1466, %v727_v13  }
 0x33a   : > { %v2134_v53 = vpop.permute.xlu1 %884 }
 0x33b   : > { %v2146_v34 = vpop.permute.xlu0 %932 }
 0x33c   : > { %1178 = vperm.xlu1 %1466, %v1039_v27   ;;  %v1129_v27 = vrot.slane %v1119_v19, %v1910_v62 }
 0x33e   : > { %v2136_v29 = vpop.permute.xlu1 %908 }
 0x33f   : > { %v2148_v40 = vpop.permute.xlu0 %860 }
 0x343   : > { %v2138_v18 = vpop.permute.xlu1 %928  ;;  %v1080_v31 = vpop.permute.xlu0 %1079 }
 0x344   : > { %v1102_v17 = vmul.f32 %v1095_v42, %v1080_v31  ;;  %v1103_v10 = vmul.f32 %v1099_v61, %v1080_v31  ;;  %v1133_v31 = vrot.slane %v1123_v16, %v1910_v62 }
 0x347   : > { %v1110_v32 = vpop.permute.xlu0 %1109 }
 0x348   : > { %v2140_v5 = vpop.permute.xlu1 %952 }
 0x34c   : > { %v2142_v30 = vpop.permute.xlu1 %956 }
 0x351   : > { %v1049_v33 = vpop.permute.xlu1 %1048 }
 0x352   : > { %v1072_v1 = vmul.f32 %v2169_v43, %v1049_v33  ;;  %v1073_v6 = vmul.f32 %v2172_v37, %v1049_v33  ;;  %v2192_v33 = vrot.slane %v1153_v8, %v1919_v20 }
 0x354   : > { %v1106_v26 = vadd.f32 %v1102_v17, %v1072_v1 }
 0x356   : > { %v1076_v35 = vpop.permute.xlu1 %1075 }
 0x35b   : > { %v2150_v45 = vpop.permute.xlu1 %976 }
 0x35f   : > { %v2152_v46 = vpop.permute.xlu1 %980 }
 0x364   : > { %v1114_v47 = vpop.permute.xlu1 %1113 }
 0x365   : > { %v1136_v14 = vmul.f32 %v1129_v27, %v1114_v47  ;;  %v1137_v19 = vmul.f32 %v1133_v31, %v1114_v47 }
 0x367   : > { %v1140_v8 = vadd.f32 %v1136_v14, %v1106_v26 }
 0x38e   : > { %v792_v54 = vpop.permute.xlu0 %791  ;;  %v794_v57 = vpop.permute.xlu1 %793 }
 0x38f   : > { %v795_v59 = vsel %vm340_vm2, %v792_v54, %v794_v57  ;;  %v796_v60 = vsel %vm340_vm2, %v794_v57, %v792_v54  ;;  %v2195_v54 = vrot.slane %v1157_v22, %v1919_v20  ;;  %v1107_v57 = vadd.f32 %v1103_v10, %v1073_v6 }
 0x390   : > { %v797_v2 = vmul.f32 %v796_v60, %v1885_v41  ;;  %v798_v3 = vmul.f32 %v795_v59, %v1888_v44 }
 0x392   : > { %v799_v4 = vadd.f32 %v797_v2, %v767_v36  ;;  %v800_v23 = vadd.f32 %v798_v3, %v768_v38  ;;  %v2197_v36 = vmul.f32 %v1129_v27, %v1110_v32  ;;  %v2199_v38 = vmul.f32 %v1133_v31, %v1110_v32 }
 0x398   : > { %v824_v12 = vpop.permute.xlu0 %823  ;;  %v826_v63 = vpop.permute.xlu1 %825 }
 0x399   : > { %v827_v41 = vsel %vm393_vm3, %v824_v12, %v826_v63  ;;  %v828_v44 = vsel %vm393_vm3, %v826_v63, %v824_v12 }
 0x39a   : > { %v829_v9 = vmul.f32 %v827_v41, %v1896_v48  ;;  %v830_v13 = vmul.f32 %v828_v44, %v1899_v49  ;;  %v2201_v48 = vmul.f32 %v1095_v42, %v1076_v35  ;;  %v2203_v49 = vmul.f32 %v1099_v61, %v1076_v35 }
 0x39c   : > { %v831_v50 = vadd.f32 %v829_v9, %v799_v4  ;;  %v832_v51 = vadd.f32 %v830_v13, %v800_v23 }
 0x39e   : > { %v846_v55 = vrot.slane %v831_v50, %v1825_v24  ;;  %v850_v58 = vrot.slane %v832_v51, %v1825_v24  ;;  %v866_v59 = vrot.slane %v831_v50, %v1828_v25  ;;  %v870_v60 = vrot.slane %v832_v51, %v1828_v25 }
 0x39f   : > { %v890_v2 = vrot.slane %v831_v50, %v1910_v62  ;;  %v894_v3 = vrot.slane %v832_v51, %v1910_v62  ;;  %v914_v24 = vrot.slane %v831_v50, %v1919_v20  ;;  %v918_v16 = vrot.slane %v832_v51, %v1919_v20 }
 0x3a0   : > { %v851_v32 = vmul.f32 %v846_v55, %v2116_v15  ;;  %v852_v42 = vmul.f32 %v850_v58, %v2116_v15  ;;  %v871_v35 = vmul.f32 %v866_v59, %v2130_v7  ;;  %v872_v61 = vmul.f32 %v870_v60, %v2130_v7 }
 0x3a1   : > { %v895_v25 = vmul.f32 %v890_v2, %v2132_v28  ;;  %v896_v17 = vmul.f32 %v894_v3, %v2132_v28  ;;  %v938_v62 = vrot.slane %v831_v50, %v2016_v56  ;;  %v942_v47 = vrot.slane %v832_v51, %v2016_v56 }
 0x3a2   : > { %v875_v10 = vadd.f32 %v871_v35, %v851_v32  ;;  %v876_v12 = vadd.f32 %v872_v61, %v852_v42  ;;  %v962_v15 = vrot.slane %v831_v50, %v2019_v52  ;;  %v966_v63 = vrot.slane %v832_v51, %v2019_v52 }
 0x3a3   : > { %v1141_v7 = vadd.f32 %v1137_v19, %v1107_v57  ;;  %v1010_v22 = vrot.slane %v831_v50, %v2031_v39  ;;  %v1014_v20 = vrot.slane %v832_v51, %v2031_v39  ;;  %v919_v44 = vmul.f32 %v914_v24, %v2144_v0 }
 0x3a4   : > { %v899_v41 = vadd.f32 %v895_v25, %v875_v10  ;;  %v900_v28 = vadd.f32 %v896_v17, %v876_v12  ;;  %v920_v56 = vmul.f32 %v918_v16, %v2144_v0  ;;  %v943_v4 = vmul.f32 %v938_v62, %v2138_v18 }
 0x3a5   : > { %v1005_v1 = vpop.permute.xlu0 %1004  ;;  %v1001_v6 = vpop.permute.xlu1 %1000  ;;  %v944_v23 = vmul.f32 %v942_v47, %v2138_v18  ;;  %v986_v52 = vrot.slane %v831_v50, %v2024_v21  ;;  %v990_v9 = vrot.slane %v832_v51, %v2024_v21  ;;  %v967_v39 = vmul.f32 %v962_v15, %v2140_v5 }
 0x3a6   : > { %v923_v13 = vadd.f32 %v919_v44, %v899_v41  ;;  %v924_v27 = vadd.f32 %v920_v56, %v900_v28  ;;  %v968_v31 = vmul.f32 %v966_v63, %v2140_v5  ;;  %v853_v26 = vmul.f32 %v846_v55, %v2128_v11 }
 0x3a7   : > { %v854_v57 = vmul.f32 %v850_v58, %v2128_v11  ;;  %v873_v0 = vmul.f32 %v866_v59, %v2148_v40  ;;  %v874_v14 = vmul.f32 %v870_v60, %v2148_v40  ;;  %v1017_v19 = vmul.f32 %v1010_v22, %v1005_v1 }
 0x3a8   : > { %v1018_v18 = vmul.f32 %v1014_v20, %v1005_v1  ;;  %v947_v32 = vadd.f32 %v943_v4, %v923_v13  ;;  %v948_v50 = vadd.f32 %v944_v23, %v924_v27  ;;  %v897_v61 = vmul.f32 %v890_v2, %v2134_v53 }
 0x3a9   : > { %v877_v51 = vadd.f32 %v873_v0, %v853_v26  ;;  %v878_v35 = vadd.f32 %v874_v14, %v854_v57  ;;  %v898_v5 = vmul.f32 %v894_v3, %v2134_v53  ;;  %v921_v58 = vmul.f32 %v914_v24, %v2136_v29 }
 0x3aa   : > { %v1044_v42 = vpop.permute.xlu0 %1043  ;;  %v1144_v21 = vpop.permute.xlu1 %1143  ;;  %v922_v40 = vmul.f32 %v918_v16, %v2136_v29  ;;  %v971_v59 = vadd.f32 %v967_v39, %v947_v32  ;;  %v972_v60 = vadd.f32 %v968_v31, %v948_v50  ;;  %v991_v2 = vmul.f32 %v986_v52, %v2150_v45 }
 0x3ab   : > { %v1070_v55 = vmul.f32 %v2169_v43, %v1044_v42  ;;  %v1071_v11 = vmul.f32 %v2172_v37, %v1044_v42  ;;  %v901_v25 = vadd.f32 %v897_v61, %v877_v51  ;;  %v902_v17 = vadd.f32 %v898_v5, %v878_v35 }
 0x3ac   : > { %v992_v53 = vmul.f32 %v990_v9, %v2150_v45  ;;  %v945_v24 = vmul.f32 %v938_v62, %v2146_v34  ;;  %v946_v29 = vmul.f32 %v942_v47, %v2146_v34  ;;  %v995_v16 = vadd.f32 %v991_v2, %v971_v59 }
 0x3ad   : > { %v1104_v10 = vadd.f32 %v2201_v48, %v1070_v55  ;;  %v1105_v12 = vadd.f32 %v2203_v49, %v1071_v11  ;;  %v925_v1 = vadd.f32 %v921_v58, %v901_v25  ;;  %v926_v37 = vadd.f32 %v922_v40, %v902_v17 }
 0x3ae   : > { %v1026_v3 = vpop.permute.xlu0 %1025  ;;  %v1148_v43 = vpop.permute.xlu1 %1147  ;;  %v996_v41 = vadd.f32 %v992_v53, %v972_v60  ;;  %v969_v56 = vmul.f32 %v962_v15, %v2142_v30  ;;  %v970_v45 = vmul.f32 %v966_v63, %v2142_v30  ;;  %v1015_v4 = vmul.f32 %v1010_v22, %v1001_v6 }
 0x3af   : > { %v1170_v28 = vmul.f32 %v2192_v33, %v1148_v43  ;;  %v1171_v48 = vmul.f32 %v2195_v54, %v1148_v43  ;;  %v949_v49 = vadd.f32 %v945_v24, %v925_v1  ;;  %v950_v44 = vadd.f32 %v946_v29, %v926_v37 }
 0x3b0   : > { %v1016_v23 = vmul.f32 %v1014_v20, %v1001_v6  ;;  %v993_v47 = vmul.f32 %v986_v52, %v2152_v46  ;;  %v994_v31 = vmul.f32 %v990_v9, %v2152_v46  ;;  %v1019_v26 = vadd.f32 %v1015_v4, %v995_v16 }
 0x3b1   : > { %v1174_v13 = vadd.f32 %v1170_v28, %v1140_v8  ;;  %v1175_v27 = vadd.f32 %v1171_v48, %v1141_v7  ;;  %v973_v39 = vadd.f32 %v969_v56, %v949_v49  ;;  %v974_v34 = vadd.f32 %v970_v45, %v950_v44 }
 0x3b2   : > { %v1184_v62 = vpop.permute.xlu0 %1183  ;;  %v1020_v57 = vadd.f32 %v1016_v23, %v996_v41  ;;  %v1138_v15 = vadd.f32 %v2197_v36, %v1104_v10  ;;  %v1139_v30 = vadd.f32 %v2199_v38, %v1105_v12  ;;  %v1168_v63 = vmul.f32 %v2192_v33, %v1144_v21 }
 0x3b3   : > { %v1031_v0 = vpop.permute.xlu1 %1030  ;;  %v1169_v8 = vmul.f32 %v2195_v54, %v1144_v21  ;;  %v997_v7 = vadd.f32 %v993_v47, %v973_v39  ;;  %v998_v22 = vadd.f32 %v994_v31, %v974_v34  ;;  %v1188_v20 = vadd.f32 %v1184_v62, %v1174_v13 }
 0x3b4   : > { %v1189_v6 = vadd.f32 %v1184_v62, %v1175_v27  ;;  %v1172_v9 = vadd.f32 %v1168_v63, %v1138_v15  ;;  %v1033_v32 = vadd.f32 %v1026_v3, %v1019_v26  ;;  %v1034_v50 = vadd.f32 %v1026_v3, %v1020_v57 }
 0x3b5   : > { %v1021_v52 = vadd.f32 %v1017_v19, %v997_v7  ;;  %v1022_v46 = vadd.f32 %v1018_v18, %v998_v22  ;;  %v1173_v14 = vadd.f32 %v1169_v8, %v1139_v30 }
 0x3b7   : > { %v1179_v36 = vpop.permute.xlu1 %1178  ;;  %v1035_v33 = vadd.f32 %v1031_v0, %v1021_v52  ;;  %v1036_v54 = vadd.f32 %v1031_v0, %v1022_v46 }
 0x3b8   : > { %v1186_v38 = vadd.f32 %v1179_v36, %v1172_v9  ;;  %v1187_v42 = vadd.f32 %v1179_v36, %v1173_v14 }
 0x3b9   : > { %v1192_v19 = vadd.f32 %v1188_v20, %v1035_v33  ;;  %v1193_v18 = vadd.f32 %v1189_v6, %v1036_v54 }
 0x3ba   : > { %v1190_v21 = vadd.f32 %v1186_v38, %v1033_v32  ;;  %v1191_v51 = vadd.f32 %v1187_v42, %v1034_v50 }
 0x3bb   : > { %1196 = vst [vmem:[%s213_s29 + $0x10] sm:$0xff] %v1192_v19  ;;  %1197 = vst [vmem:[%s213_s29 + $0x18] sm:$0xff] %v1193_v18 }
 0x3bc   : > { %1194 = vst [vmem:[%s213_s29] sm:$0xff] %v1190_v21  ;;  %1195 = vst [vmem:[%s213_s29 + $0x8] sm:$0xff] %v1191_v51 }
 0x3bd   : > { %1561 = shalt.err (!%p1558_p12)
}
 0x3be   : > { %s1562_s30 = scalar_lea.hbm %s2266_s21, 512  ;;  %s1566_s20 = scalar_lea.hbm %s2313_s3, 1024 }
 0x3bf   : > { %p1563_p3 = scmp.ne.s32.totalorder %s2266_s21, %s1562_s30  ;;  %p1567_p5 = scmp.lt.s32.totalorder %s2266_s21, %s2313_s3 }
 0x3c0   : > { %p1568_p8 = scmp.lt.s32.totalorder %s1566_s20, %s1562_s30 }
 0x3c1   : > { %p1564_p7 = pnand %p1563_p3, %p2329_p0 }
 0x3c2   : > { %p1569_p11 = por %p1568_p8, %p1567_p5 }
 0x3c3   : > { %p1565_p10 = pneg %p1564_p7 }
 0x3c5   : > { %p1570_p13 = pnand %p1569_p11, %p1565_p10 }
 0x3c7   : > { %1573 = shalt.err (!%p1570_p13)
}
 0x3c8   : > { %s1638_s29 = smov 256   ;;  %s1639_s6 = smov 512  }
 0x3c9   : > { %1334 = dma.vmem_to_hbm [thread:$0]  (%p2329_p0), %s2261_s5, 512, %s2266_s21, %s1199_s16, %s1638_s29, %s1639_s6, %s1635_s25  }
 0x3ca PF: > { %s1227_s8 = sand.u32 1, %s1604_s12   ;;  %p2330_p1 = scmp.ne.s32.totalorder %s2319_s19, 0 }
 0x3cb   : > { %p2331_p2 = scmp.ge.s32.totalorder %s1616_s15, 2  ;;  %s1228_s9 = scalar_lea.sflag [#allocation4], %s1227_s8 }
 0x3cd   : > { %p1348_p4 = pnand %p2331_p2, %p2330_p1 }
 0x3cf   : > { %p1349_p6 = pneg %p1348_p4 }
 0x3d1   : > { %1599 = dma.done.wait (%p1349_p6), %s1228_s9, 512  }
 0x3d2   : > { %1601 = vsyncadd (%p1349_p6), %s1228_s9, 4294966784  ;;  %p17_p9 = scmp.ge.s32.totalorder %s1732_s7, 4   ;;  %s2332_s12 = smov %s1608_s13 }
 0x3d3   : > { %s2333_s13 = smov %s1612_s14  ;;  %s2334_s14 = smov %s1748_s11 }
 0x3d4   : > { %s2335_s15 = smov %s1732_s7  ;;  %19 = sbr.rel (!%p17_p9) target bundleno = 6 (0x6), region = 88 }
 0x3d9   :  { %1233 = vsyncpa [#allocation3], 1 }
 0x3da   :  { %1235 = vsyncpa [#allocation3 + $0x1], 1 }
 0x3db   :  { %1236 = vsyncpa [#allocation6], 1 }
 0x3dc   :  { %1237 = vsyncpa [#allocation4], 1 }
 0x3dd   :  { %1239 = vsyncpa [#allocation4 + $0x1], 1 }

</bundles_post_ra>
